<compile_context>
chip_gen: v7x
topology: tpu7x:2x2x1
jax: 0.10.0
libtpu: 0.0.40
codegen_flags: <defaults>
</compile_context>

<pallas_src>
import jax
import jax.numpy as jnp
from jax.experimental import pallas as pl
from jax.experimental.pallas import tpu as pltpu

_LANE = 128  # TPU lane width; channels are padded to this inside the kernel.


def _fused_basicblock_kernel(x_ref, w1_ref, b1_ref, w2_ref, b2_ref, out_ref,
                             xpad_s, ypad_s, col_s):
    """Fused BasicBlock forward for one batch element.

    x_ref  : (1, H, W, Cin)        unpadded input (halo + channel pad done here)
    w*_ref : (9*Cp, Cp)            BN-scale-folded conv weights (im2col layout)
    b*_ref : (1, Cp)               BN bias (beta - mean*scale), zero in pad lanes
    out_ref: (1, H, W, Cp)         lane-dense output (padded channels are zero)
    xpad_s : (H+2, W+2, Cp)        zero-padded, channel-extended input
    ypad_s : (H+2, W+2, Cp)        zero-padded intermediate (stays in VMEM)
    col_s  : (H*W, 9*Cp)           im2col scratch (reused by both convs)
    """
    H = out_ref.shape[1]
    W = out_ref.shape[2]
    Cp = out_ref.shape[3]
    Cin = x_ref.shape[3]
    HW = H * W

    # --- halo + channel padding handled in-kernel (no wrapper jnp.pad) -------
    xpad_s[...] = jnp.zeros_like(xpad_s)
    xpad_s[1:H + 1, 1:W + 1, 0:Cin] = x_ref[0].astype(xpad_s.dtype)

    # --- conv1: im2col into VMEM scratch, single MXU matmul (K = 9*Cp) -------
    for dy in range(3):
        for dx in range(3):
            t = dy * 3 + dx
            col_s[:, t * Cp:(t + 1) * Cp] = (
                xpad_s[dy:dy + H, dx:dx + W, :].reshape(HW, Cp))
    y1 = jnp.dot(col_s[...], w1_ref[...], preferred_element_type=jnp.float32)
    y1 = jnp.maximum(y1 + b1_ref[...], 0.0)           # BN bias + ReLU

    # --- intermediate stays in VMEM (padded for the second conv's halo) ------
    ypad_s[...] = jnp.zeros_like(ypad_s)
    ypad_s[1:H + 1, 1:W + 1, :] = y1.reshape(H, W, Cp)

    # --- conv2: im2col (reuse scratch), matmul, bias + residual + ReLU -------
    for dy in range(3):
        for dx in range(3):
            t = dy * 3 + dx
            col_s[:, t * Cp:(t + 1) * Cp] = (
                ypad_s[dy:dy + H, dx:dx + W, :].reshape(HW, Cp))
    y2 = jnp.dot(col_s[...], w2_ref[...], preferred_element_type=jnp.float32)
    y2 = y2 + b2_ref[...]
    # Residual add: original (channel-extended) input interior, already in VMEM.
    y2 = y2 + xpad_s[1:H + 1, 1:W + 1, :].reshape(HW, Cp)
    y2 = jnp.maximum(y2, 0.0)

    out_ref[...] = y2.reshape(1, H, W, Cp).astype(out_ref.dtype)


def _round_up(x, m):
    return (x + m - 1) // m * m


def _fold_bn_into_weight(w, gamma, beta, mean, var, eps=1e-5):
    """Fold BN scale into the conv weight; return (scaled weight, bias)."""
    s = gamma / jnp.sqrt(var + eps)
    return w * s[None, None, None, :], beta - mean * s


def _pad_weight_im2col(w, cin_p, cout_p):
    """(3,3,Cin,Cout) -> zero-pad channels -> (9*Cin_p, Cout_p) im2col layout."""
    kh, kw, cin, cout = w.shape
    wp = jnp.pad(w, ((0, 0), (0, 0), (0, cin_p - cin), (0, cout_p - cout)))
    return wp.reshape(kh * kw * cin_p, cout_p)


def basic_block_forward_nhwc(x_nhwc, params):
    """BasicBlock forward, NHWC in / NHWC out (channels-last native path)."""
    N, H, W, C = x_nhwc.shape
    Cp = _round_up(max(C, _LANE), _LANE)

    w1f, b1 = _fold_bn_into_weight(params["w1"], params["gamma1"],
                                   params["beta1"], params["mean1"],
                                   params["var1"])
    w2f, b2 = _fold_bn_into_weight(params["w2"], params["gamma2"],
                                   params["beta2"], params["mean2"],
                                   params["var2"])
    w1p = _pad_weight_im2col(w1f, Cp, Cp)          # (9*Cp, Cp)
    w2p = _pad_weight_im2col(w2f, Cp, Cp)
    b1p = jnp.pad(b1, (0, Cp - C))[None, :]        # (1, Cp), zeros in pad lanes
    b2p = jnp.pad(b2, (0, Cp - C))[None, :]

    out_p = pl.pallas_call(
        _fused_basicblock_kernel,
        out_shape=jax.ShapeDtypeStruct((N, H, W, Cp), jnp.float32),
        grid_spec=pltpu.PrefetchScalarGridSpec(
            num_scalar_prefetch=0,
            grid=(N,),
            in_specs=[
                pl.BlockSpec((1, H, W, C), lambda n: (n, 0, 0, 0)),
                pl.BlockSpec((9 * Cp, Cp), lambda n: (0, 0)),
                pl.BlockSpec((1, Cp), lambda n: (0, 0)),
                pl.BlockSpec((9 * Cp, Cp), lambda n: (0, 0)),
                pl.BlockSpec((1, Cp), lambda n: (0, 0)),
            ],
            out_specs=pl.BlockSpec((1, H, W, Cp), lambda n: (n, 0, 0, 0)),
            scratch_shapes=[
                pltpu.VMEM((H + 2, W + 2, Cp), jnp.float32),   # xpad
                pltpu.VMEM((H + 2, W + 2, Cp), jnp.float32),   # ypad
                pltpu.VMEM((H * W, 9 * Cp), jnp.float32),      # im2col
            ]),
        compiler_params=pltpu.CompilerParams(
            dimension_semantics=("parallel",)),
    )(x_nhwc, w1p, b1p, w2p, b2p)

    if Cp != C:
        out_p = out_p[..., :C]
    return out_p


@jax.jit
def basic_block_forward(x_nchw, params):
    """PyTorch-convention entry point (NCHW in / NCHW out)."""
    x = jnp.transpose(x_nchw, (0, 2, 3, 1))           # -> NHWC
    out = basic_block_forward_nhwc(x, params)
    return jnp.transpose(out, (0, 3, 1, 2))           # -> NCHW


@jax.jit
def _reference_forward(x_nchw, params):
    """Pure-JAX reference for verification."""
    x = jnp.transpose(x_nchw, (0, 2, 3, 1))
    dn = ("NHWC", "HWIO", "NHWC")

    def conv(inp, w):
        return jax.lax.conv_general_dilated(inp, w, (1, 1), "SAME",
                                            dimension_numbers=dn)

    s1 = params["gamma1"] / jnp.sqrt(params["var1"] + 1e-5)
    b1 = params["beta1"] - params["mean1"] * s1
    s2 = params["gamma2"] / jnp.sqrt(params["var2"] + 1e-5)
    b2 = params["beta2"] - params["mean2"] * s2

    out = jnp.maximum(conv(x, params["w1"]) * s1 + b1, 0.0)
    out = conv(out, params["w2"]) * s2 + b2
    out = jnp.maximum(out + x, 0.0)
    return jnp.transpose(out, (0, 3, 1, 2))


if __name__ == "__main__":
    key = jax.random.PRNGKey(0)
    inplanes = planes = 4
    N, H, W = 2, 16, 16

    ks = jax.random.split(key, 10)
    x = jax.random.normal(ks[0], (N, inplanes, H, W), jnp.float32)  # NCHW input
    params = {
        "w1": jax.random.normal(ks[1], (3, 3, inplanes, planes), jnp.float32) * 0.1,
        "w2": jax.random.normal(ks[2], (3, 3, planes, planes), jnp.float32) * 0.1,
        "gamma1": jax.random.normal(ks[3], (planes,), jnp.float32) * 0.1 + 1.0,
        "beta1": jax.random.normal(ks[4], (planes,), jnp.float32) * 0.1,
        "mean1": jax.random.normal(ks[5], (planes,), jnp.float32) * 0.1,
        "var1": jax.random.uniform(ks[6], (planes,), jnp.float32, 0.5, 1.5),
        "gamma2": jax.random.normal(ks[7], (planes,), jnp.float32) * 0.1 + 1.0,
        "beta2": jax.random.normal(ks[8], (planes,), jnp.float32) * 0.1,
        "mean2": jax.random.normal(ks[9], (planes,), jnp.float32) * 0.1,
        "var2": jnp.linspace(0.8, 1.2, planes, dtype=jnp.float32),
    }

    out = jax.block_until_ready(basic_block_forward(x, params))
    ref = jax.block_until_ready(_reference_forward(x, params))

    assert out.shape == (N, planes, H, W), out.shape
    assert jnp.allclose(out, ref, atol=1e-3, rtol=1e-3), float(
        jnp.max(jnp.abs(out - ref)))
    print("KERNEL_OK")
</pallas_src>

<mosaic_0001>
module attributes {stable_mosaic.version = 11 : i64} {
  func.func @_fused_basicblock_kernel(%arg0: i32, %arg1: memref<1x16x16x4xf32, #tpu.memory_space<vmem>>, %arg2: memref<1152x128xf32, #tpu.memory_space<vmem>>, %arg3: memref<1x128xf32, #tpu.memory_space<vmem>>, %arg4: memref<1152x128xf32, #tpu.memory_space<vmem>>, %arg5: memref<1x128xf32, #tpu.memory_space<vmem>>, %arg6: memref<1x16x16x128xf32, #tpu.memory_space<vmem>>, %arg7: memref<18x18x128xf32, #tpu.memory_space<vmem>>, %arg8: memref<18x18x128xf32, #tpu.memory_space<vmem>>, %arg9: memref<256x1152xf32, #tpu.memory_space<vmem>>) attributes {dimension_semantics = [#tpu.dimension_semantics<parallel>], iteration_bounds = array<i64: 2>, scalar_prefetch = 0 : i64, scratch_operands = 3 : i64, tpu.core_type = #tpu.core_type<tc>, window_params = [{transform_indices = @transform_0, window_bounds = array<i64: 1, 16, 16, 4>}, {pipeline_mode = #tpu.pipeline_mode<synchronous>, transform_indices = @transform_1, window_bounds = array<i64: 1152, 128>}, {pipeline_mode = #tpu.pipeline_mode<synchronous>, transform_indices = @transform_2, window_bounds = array<i64: 1, 128>}, {pipeline_mode = #tpu.pipeline_mode<synchronous>, transform_indices = @transform_3, window_bounds = array<i64: 1152, 128>}, {pipeline_mode = #tpu.pipeline_mode<synchronous>, transform_indices = @transform_4, window_bounds = array<i64: 1, 128>}, {transform_indices = @transform_5, window_bounds = array<i64: 1, 16, 16, 128>}]} {
    %cst = arith.constant 0.000000e+00 : f32
    %0 = vector.broadcast %cst : f32 to vector<18x18x128xf32>
    %c0 = arith.constant 0 : index
    %c0_0 = arith.constant 0 : index
    %c0_1 = arith.constant 0 : index
    %1 = vector.load %arg7[%c0, %c0_0, %c0_1] : memref<18x18x128xf32, #tpu.memory_space<vmem>>, vector<18x18x128xf32>
    tpu.vector_store %arg7[%c0, %c0_0, %c0_1], %0 {strides = array<i32>} : memref<18x18x128xf32, #tpu.memory_space<vmem>>, vector<18x18x128xf32>,
    %c0_2 = arith.constant 0 : index
    %c0_3 = arith.constant 0 : index
    %c0_4 = arith.constant 0 : index
    %c0_5 = arith.constant 0 : index
    %2 = vector.load %arg1[%c0_2, %c0_3, %c0_4, %c0_5] : memref<1x16x16x4xf32, #tpu.memory_space<vmem>>, vector<1x16x16x4xf32>
    %3 = vector.shape_cast %2 : vector<1x16x16x4xf32> to vector<16x16x4xf32>
    %c1 = arith.constant 1 : index
    %c1_6 = arith.constant 1 : index
    %c0_7 = arith.constant 0 : index
    %4 = vector.load %arg7[%c1, %c1_6, %c0_7] : memref<18x18x128xf32, #tpu.memory_space<vmem>>, vector<16x16x4xf32>
    tpu.vector_store %arg7[%c1, %c1_6, %c0_7], %3 {strides = array<i32>} : memref<18x18x128xf32, #tpu.memory_space<vmem>>, vector<16x16x4xf32>,
    %c0_8 = arith.constant 0 : index
    %c0_9 = arith.constant 0 : index
    %c0_10 = arith.constant 0 : index
    %5 = vector.load %arg7[%c0_8, %c0_9, %c0_10] : memref<18x18x128xf32, #tpu.memory_space<vmem>>, vector<16x16x128xf32>
    %6 = vector.shape_cast %5 : vector<16x16x128xf32> to vector<256x128xf32>
    %c0_11 = arith.constant 0 : index
    %c0_12 = arith.constant 0 : index
    %7 = vector.load %arg9[%c0_11, %c0_12] : memref<256x1152xf32, #tpu.memory_space<vmem>>, vector<256x128xf32>
    tpu.vector_store %arg9[%c0_11, %c0_12], %6 {strides = array<i32>} : memref<256x1152xf32, #tpu.memory_space<vmem>>, vector<256x128xf32>,
    %c0_13 = arith.constant 0 : index
    %c1_14 = arith.constant 1 : index
    %c0_15 = arith.constant 0 : index
    %8 = vector.load %arg7[%c0_13, %c1_14, %c0_15] : memref<18x18x128xf32, #tpu.memory_space<vmem>>, vector<16x16x128xf32>
    %9 = vector.shape_cast %8 : vector<16x16x128xf32> to vector<256x128xf32>
    %c0_16 = arith.constant 0 : index
    %c128 = arith.constant 128 : index
    %10 = vector.load %arg9[%c0_16, %c128] : memref<256x1152xf32, #tpu.memory_space<vmem>>, vector<256x128xf32>
    tpu.vector_store %arg9[%c0_16, %c128], %9 {strides = array<i32>} : memref<256x1152xf32, #tpu.memory_space<vmem>>, vector<256x128xf32>,
    %c0_17 = arith.constant 0 : index
    %c2 = arith.constant 2 : index
    %c0_18 = arith.constant 0 : index
    %11 = vector.load %arg7[%c0_17, %c2, %c0_18] : memref<18x18x128xf32, #tpu.memory_space<vmem>>, vector<16x16x128xf32>
    %12 = vector.shape_cast %11 : vector<16x16x128xf32> to vector<256x128xf32>
    %c0_19 = arith.constant 0 : index
    %c256 = arith.constant 256 : index
    %13 = vector.load %arg9[%c0_19, %c256] : memref<256x1152xf32, #tpu.memory_space<vmem>>, vector<256x128xf32>
    tpu.vector_store %arg9[%c0_19, %c256], %12 {strides = array<i32>} : memref<256x1152xf32, #tpu.memory_space<vmem>>, vector<256x128xf32>,
    %c1_20 = arith.constant 1 : index
    %c0_21 = arith.constant 0 : index
    %c0_22 = arith.constant 0 : index
    %14 = vector.load %arg7[%c1_20, %c0_21, %c0_22] : memref<18x18x128xf32, #tpu.memory_space<vmem>>, vector<16x16x128xf32>
    %15 = vector.shape_cast %14 : vector<16x16x128xf32> to vector<256x128xf32>
    %c0_23 = arith.constant 0 : index
    %c384 = arith.constant 384 : index
    %16 = vector.load %arg9[%c0_23, %c384] : memref<256x1152xf32, #tpu.memory_space<vmem>>, vector<256x128xf32>
    tpu.vector_store %arg9[%c0_23, %c384], %15 {strides = array<i32>} : memref<256x1152xf32, #tpu.memory_space<vmem>>, vector<256x128xf32>,
    %c1_24 = arith.constant 1 : index
    %c1_25 = arith.constant 1 : index
    %c0_26 = arith.constant 0 : index
    %17 = vector.load %arg7[%c1_24, %c1_25, %c0_26] : memref<18x18x128xf32, #tpu.memory_space<vmem>>, vector<16x16x128xf32>
    %18 = vector.shape_cast %17 : vector<16x16x128xf32> to vector<256x128xf32>
    %c0_27 = arith.constant 0 : index
    %c512 = arith.constant 512 : index
    %19 = vector.load %arg9[%c0_27, %c512] : memref<256x1152xf32, #tpu.memory_space<vmem>>, vector<256x128xf32>
    tpu.vector_store %arg9[%c0_27, %c512], %18 {strides = array<i32>} : memref<256x1152xf32, #tpu.memory_space<vmem>>, vector<256x128xf32>,
    %c1_28 = arith.constant 1 : index
    %c2_29 = arith.constant 2 : index
    %c0_30 = arith.constant 0 : index
    %20 = vector.load %arg7[%c1_28, %c2_29, %c0_30] : memref<18x18x128xf32, #tpu.memory_space<vmem>>, vector<16x16x128xf32>
    %21 = vector.shape_cast %20 : vector<16x16x128xf32> to vector<256x128xf32>
    %c0_31 = arith.constant 0 : index
    %c640 = arith.constant 640 : index
    %22 = vector.load %arg9[%c0_31, %c640] : memref<256x1152xf32, #tpu.memory_space<vmem>>, vector<256x128xf32>
    tpu.vector_store %arg9[%c0_31, %c640], %21 {strides = array<i32>} : memref<256x1152xf32, #tpu.memory_space<vmem>>, vector<256x128xf32>,
    %c2_32 = arith.constant 2 : index
    %c0_33 = arith.constant 0 : index
    %c0_34 = arith.constant 0 : index
    %23 = vector.load %arg7[%c2_32, %c0_33, %c0_34] : memref<18x18x128xf32, #tpu.memory_space<vmem>>, vector<16x16x128xf32>
    %24 = vector.shape_cast %23 : vector<16x16x128xf32> to vector<256x128xf32>
    %c0_35 = arith.constant 0 : index
    %c768 = arith.constant 768 : index
    %25 = vector.load %arg9[%c0_35, %c768] : memref<256x1152xf32, #tpu.memory_space<vmem>>, vector<256x128xf32>
    tpu.vector_store %arg9[%c0_35, %c768], %24 {strides = array<i32>} : memref<256x1152xf32, #tpu.memory_space<vmem>>, vector<256x128xf32>,
    %c2_36 = arith.constant 2 : index
    %c1_37 = arith.constant 1 : index
    %c0_38 = arith.constant 0 : index
    %26 = vector.load %arg7[%c2_36, %c1_37, %c0_38] : memref<18x18x128xf32, #tpu.memory_space<vmem>>, vector<16x16x128xf32>
    %27 = vector.shape_cast %26 : vector<16x16x128xf32> to vector<256x128xf32>
    %c0_39 = arith.constant 0 : index
    %c896 = arith.constant 896 : index
    %28 = vector.load %arg9[%c0_39, %c896] : memref<256x1152xf32, #tpu.memory_space<vmem>>, vector<256x128xf32>
    tpu.vector_store %arg9[%c0_39, %c896], %27 {strides = array<i32>} : memref<256x1152xf32, #tpu.memory_space<vmem>>, vector<256x128xf32>,
    %c2_40 = arith.constant 2 : index
    %c2_41 = arith.constant 2 : index
    %c0_42 = arith.constant 0 : index
    %29 = vector.load %arg7[%c2_40, %c2_41, %c0_42] : memref<18x18x128xf32, #tpu.memory_space<vmem>>, vector<16x16x128xf32>
    %30 = vector.shape_cast %29 : vector<16x16x128xf32> to vector<256x128xf32>
    %c0_43 = arith.constant 0 : index
    %c1024 = arith.constant 1024 : index
    %31 = vector.load %arg9[%c0_43, %c1024] : memref<256x1152xf32, #tpu.memory_space<vmem>>, vector<256x128xf32>
    tpu.vector_store %arg9[%c0_43, %c1024], %30 {strides = array<i32>} : memref<256x1152xf32, #tpu.memory_space<vmem>>, vector<256x128xf32>,
    %c0_44 = arith.constant 0 : index
    %c0_45 = arith.constant 0 : index
    %32 = vector.load %arg9[%c0_44, %c0_45] : memref<256x1152xf32, #tpu.memory_space<vmem>>, vector<256x1152xf32>
    %c0_46 = arith.constant 0 : index
    %c0_47 = arith.constant 0 : index
    %33 = vector.load %arg2[%c0_46, %c0_47] : memref<1152x128xf32, #tpu.memory_space<vmem>>, vector<1152x128xf32>
    %cst_48 = arith.constant dense<0.000000e+00> : vector<256x128xf32>
    %34 = tpu.matmul %32, %33, %cst_48 {dimension_numbers = #tpu.dot_dimension_numbers<[1], [0], [0], [1], [0, 0, 1, 1], [], []>} : vector<256x1152xf32>, vector<1152x128xf32>, vector<256x128xf32> -> vector<256x128xf32>
    %c0_49 = arith.constant 0 : index
    %c0_50 = arith.constant 0 : index
    %35 = vector.load %arg3[%c0_49, %c0_50] : memref<1x128xf32, #tpu.memory_space<vmem>>, vector<1x128xf32>
    %36 = vector.broadcast %35 : vector<1x128xf32> to vector<256x128xf32>
    %37 = arith.addf %34, %36 : vector<256x128xf32>
    %cst_51 = arith.constant 0.000000e+00 : f32
    %38 = vector.broadcast %cst_51 : f32 to vector<256x128xf32>
    %39 = arith.maximumf %37, %38 : vector<256x128xf32>
    %cst_52 = arith.constant 0.000000e+00 : f32
    %40 = vector.broadcast %cst_52 : f32 to vector<18x18x128xf32>
    %c0_53 = arith.constant 0 : index
    %c0_54 = arith.constant 0 : index
    %c0_55 = arith.constant 0 : index
    %41 = vector.load %arg8[%c0_53, %c0_54, %c0_55] : memref<18x18x128xf32, #tpu.memory_space<vmem>>, vector<18x18x128xf32>
    tpu.vector_store %arg8[%c0_53, %c0_54, %c0_55], %40 {strides = array<i32>} : memref<18x18x128xf32, #tpu.memory_space<vmem>>, vector<18x18x128xf32>,
    %42 = vector.shape_cast %39 : vector<256x128xf32> to vector<16x16x128xf32>
    %c1_56 = arith.constant 1 : index
    %c1_57 = arith.constant 1 : index
    %c0_58 = arith.constant 0 : index
    %43 = vector.load %arg8[%c1_56, %c1_57, %c0_58] : memref<18x18x128xf32, #tpu.memory_space<vmem>>, vector<16x16x128xf32>
    tpu.vector_store %arg8[%c1_56, %c1_57, %c0_58], %42 {strides = array<i32>} : memref<18x18x128xf32, #tpu.memory_space<vmem>>, vector<16x16x128xf32>,
    %c0_59 = arith.constant 0 : index
    %c0_60 = arith.constant 0 : index
    %c0_61 = arith.constant 0 : index
    %44 = vector.load %arg8[%c0_59, %c0_60, %c0_61] : memref<18x18x128xf32, #tpu.memory_space<vmem>>, vector<16x16x128xf32>
    %45 = vector.shape_cast %44 : vector<16x16x128xf32> to vector<256x128xf32>
    %c0_62 = arith.constant 0 : index
    %c0_63 = arith.constant 0 : index
    %46 = vector.load %arg9[%c0_62, %c0_63] : memref<256x1152xf32, #tpu.memory_space<vmem>>, vector<256x128xf32>
    tpu.vector_store %arg9[%c0_62, %c0_63], %45 {strides = array<i32>} : memref<256x1152xf32, #tpu.memory_space<vmem>>, vector<256x128xf32>,
    %c0_64 = arith.constant 0 : index
    %c1_65 = arith.constant 1 : index
    %c0_66 = arith.constant 0 : index
    %47 = vector.load %arg8[%c0_64, %c1_65, %c0_66] : memref<18x18x128xf32, #tpu.memory_space<vmem>>, vector<16x16x128xf32>
    %48 = vector.shape_cast %47 : vector<16x16x128xf32> to vector<256x128xf32>
    %c0_67 = arith.constant 0 : index
    %c128_68 = arith.constant 128 : index
    %49 = vector.load %arg9[%c0_67, %c128_68] : memref<256x1152xf32, #tpu.memory_space<vmem>>, vector<256x128xf32>
    tpu.vector_store %arg9[%c0_67, %c128_68], %48 {strides = array<i32>} : memref<256x1152xf32, #tpu.memory_space<vmem>>, vector<256x128xf32>,
    %c0_69 = arith.constant 0 : index
    %c2_70 = arith.constant 2 : index
    %c0_71 = arith.constant 0 : index
    %50 = vector.load %arg8[%c0_69, %c2_70, %c0_71] : memref<18x18x128xf32, #tpu.memory_space<vmem>>, vector<16x16x128xf32>
    %51 = vector.shape_cast %50 : vector<16x16x128xf32> to vector<256x128xf32>
    %c0_72 = arith.constant 0 : index
    %c256_73 = arith.constant 256 : index
    %52 = vector.load %arg9[%c0_72, %c256_73] : memref<256x1152xf32, #tpu.memory_space<vmem>>, vector<256x128xf32>
    tpu.vector_store %arg9[%c0_72, %c256_73], %51 {strides = array<i32>} : memref<256x1152xf32, #tpu.memory_space<vmem>>, vector<256x128xf32>,
    %c1_74 = arith.constant 1 : index
    %c0_75 = arith.constant 0 : index
    %c0_76 = arith.constant 0 : index
    %53 = vector.load %arg8[%c1_74, %c0_75, %c0_76] : memref<18x18x128xf32, #tpu.memory_space<vmem>>, vector<16x16x128xf32>
    %54 = vector.shape_cast %53 : vector<16x16x128xf32> to vector<256x128xf32>
    %c0_77 = arith.constant 0 : index
    %c384_78 = arith.constant 384 : index
    %55 = vector.load %arg9[%c0_77, %c384_78] : memref<256x1152xf32, #tpu.memory_space<vmem>>, vector<256x128xf32>
    tpu.vector_store %arg9[%c0_77, %c384_78], %54 {strides = array<i32>} : memref<256x1152xf32, #tpu.memory_space<vmem>>, vector<256x128xf32>,
    %c1_79 = arith.constant 1 : index
    %c1_80 = arith.constant 1 : index
    %c0_81 = arith.constant 0 : index
    %56 = vector.load %arg8[%c1_79, %c1_80, %c0_81] : memref<18x18x128xf32, #tpu.memory_space<vmem>>, vector<16x16x128xf32>
    %57 = vector.shape_cast %56 : vector<16x16x128xf32> to vector<256x128xf32>
    %c0_82 = arith.constant 0 : index
    %c512_83 = arith.constant 512 : index
    %58 = vector.load %arg9[%c0_82, %c512_83] : memref<256x1152xf32, #tpu.memory_space<vmem>>, vector<256x128xf32>
    tpu.vector_store %arg9[%c0_82, %c512_83], %57 {strides = array<i32>} : memref<256x1152xf32, #tpu.memory_space<vmem>>, vector<256x128xf32>,
    %c1_84 = arith.constant 1 : index
    %c2_85 = arith.constant 2 : index
    %c0_86 = arith.constant 0 : index
    %59 = vector.load %arg8[%c1_84, %c2_85, %c0_86] : memref<18x18x128xf32, #tpu.memory_space<vmem>>, vector<16x16x128xf32>
    %60 = vector.shape_cast %59 : vector<16x16x128xf32> to vector<256x128xf32>
    %c0_87 = arith.constant 0 : index
    %c640_88 = arith.constant 640 : index
    %61 = vector.load %arg9[%c0_87, %c640_88] : memref<256x1152xf32, #tpu.memory_space<vmem>>, vector<256x128xf32>
    tpu.vector_store %arg9[%c0_87, %c640_88], %60 {strides = array<i32>} : memref<256x1152xf32, #tpu.memory_space<vmem>>, vector<256x128xf32>,
    %c2_89 = arith.constant 2 : index
    %c0_90 = arith.constant 0 : index
    %c0_91 = arith.constant 0 : index
    %62 = vector.load %arg8[%c2_89, %c0_90, %c0_91] : memref<18x18x128xf32, #tpu.memory_space<vmem>>, vector<16x16x128xf32>
    %63 = vector.shape_cast %62 : vector<16x16x128xf32> to vector<256x128xf32>
    %c0_92 = arith.constant 0 : index
    %c768_93 = arith.constant 768 : index
    %64 = vector.load %arg9[%c0_92, %c768_93] : memref<256x1152xf32, #tpu.memory_space<vmem>>, vector<256x128xf32>
    tpu.vector_store %arg9[%c0_92, %c768_93], %63 {strides = array<i32>} : memref<256x1152xf32, #tpu.memory_space<vmem>>, vector<256x128xf32>,
    %c2_94 = arith.constant 2 : index
    %c1_95 = arith.constant 1 : index
    %c0_96 = arith.constant 0 : index
    %65 = vector.load %arg8[%c2_94, %c1_95, %c0_96] : memref<18x18x128xf32, #tpu.memory_space<vmem>>, vector<16x16x128xf32>
    %66 = vector.shape_cast %65 : vector<16x16x128xf32> to vector<256x128xf32>
    %c0_97 = arith.constant 0 : index
    %c896_98 = arith.constant 896 : index
    %67 = vector.load %arg9[%c0_97, %c896_98] : memref<256x1152xf32, #tpu.memory_space<vmem>>, vector<256x128xf32>
    tpu.vector_store %arg9[%c0_97, %c896_98], %66 {strides = array<i32>} : memref<256x1152xf32, #tpu.memory_space<vmem>>, vector<256x128xf32>,
    %c2_99 = arith.constant 2 : index
    %c2_100 = arith.constant 2 : index
    %c0_101 = arith.constant 0 : index
    %68 = vector.load %arg8[%c2_99, %c2_100, %c0_101] : memref<18x18x128xf32, #tpu.memory_space<vmem>>, vector<16x16x128xf32>
    %69 = vector.shape_cast %68 : vector<16x16x128xf32> to vector<256x128xf32>
    %c0_102 = arith.constant 0 : index
    %c1024_103 = arith.constant 1024 : index
    %70 = vector.load %arg9[%c0_102, %c1024_103] : memref<256x1152xf32, #tpu.memory_space<vmem>>, vector<256x128xf32>
    tpu.vector_store %arg9[%c0_102, %c1024_103], %69 {strides = array<i32>} : memref<256x1152xf32, #tpu.memory_space<vmem>>, vector<256x128xf32>,
    %c0_104 = arith.constant 0 : index
    %c0_105 = arith.constant 0 : index
    %71 = vector.load %arg9[%c0_104, %c0_105] : memref<256x1152xf32, #tpu.memory_space<vmem>>, vector<256x1152xf32>
    %c0_106 = arith.constant 0 : index
    %c0_107 = arith.constant 0 : index
    %72 = vector.load %arg4[%c0_106, %c0_107] : memref<1152x128xf32, #tpu.memory_space<vmem>>, vector<1152x128xf32>
    %cst_108 = arith.constant dense<0.000000e+00> : vector<256x128xf32>
    %73 = tpu.matmul %71, %72, %cst_108 {dimension_numbers = #tpu.dot_dimension_numbers<[1], [0], [0], [1], [0, 0, 1, 1], [], []>} : vector<256x1152xf32>, vector<1152x128xf32>, vector<256x128xf32> -> vector<256x128xf32>
    %c0_109 = arith.constant 0 : index
    %c0_110 = arith.constant 0 : index
    %74 = vector.load %arg5[%c0_109, %c0_110] : memref<1x128xf32, #tpu.memory_space<vmem>>, vector<1x128xf32>
    %75 = vector.broadcast %74 : vector<1x128xf32> to vector<256x128xf32>
    %76 = arith.addf %73, %75 : vector<256x128xf32>
    %c1_111 = arith.constant 1 : index
    %c1_112 = arith.constant 1 : index
    %c0_113 = arith.constant 0 : index
    %77 = vector.load %arg7[%c1_111, %c1_112, %c0_113] : memref<18x18x128xf32, #tpu.memory_space<vmem>>, vector<16x16x128xf32>
    %78 = vector.shape_cast %77 : vector<16x16x128xf32> to vector<256x128xf32>
    %79 = arith.addf %76, %78 : vector<256x128xf32>
    %cst_114 = arith.constant 0.000000e+00 : f32
    %80 = vector.broadcast %cst_114 : f32 to vector<256x128xf32>
    %81 = arith.maximumf %79, %80 : vector<256x128xf32>
    %82 = vector.shape_cast %81 : vector<256x128xf32> to vector<1x16x16x128xf32>
    %c0_115 = arith.constant 0 : index
    %c0_116 = arith.constant 0 : index
    %c0_117 = arith.constant 0 : index
    %c0_118 = arith.constant 0 : index
    %83 = vector.load %arg6[%c0_115, %c0_116, %c0_117, %c0_118] : memref<1x16x16x128xf32, #tpu.memory_space<vmem>>, vector<1x16x16x128xf32>
    tpu.vector_store %arg6[%c0_115, %c0_116, %c0_117, %c0_118], %82 {strides = array<i32>} : memref<1x16x16x128xf32, #tpu.memory_space<vmem>>, vector<1x16x16x128xf32>,
    return
  }
  func.func @transform_0(%arg0: i32) -> (i32, i32, i32, i32) {
    %c0_i32 = arith.constant 0 : i32
    %c0_i32_0 = arith.constant 0 : i32
    %c0_i32_1 = arith.constant 0 : i32
    %c0_i32_2 = arith.constant 0 : i32
    return %arg0, %c0_i32, %c0_i32_0, %c0_i32_1 : i32, i32, i32, i32
  }
  func.func @transform_1(%arg0: i32) -> (i32, i32) {
    %c0_i32 = arith.constant 0 : i32
    %c0_i32_0 = arith.constant 0 : i32
    %c0_i32_1 = arith.constant 0 : i32
    return %c0_i32, %c0_i32_0 : i32, i32
  }
  func.func @transform_2(%arg0: i32) -> (i32, i32) {
    %c0_i32 = arith.constant 0 : i32
    %c0_i32_0 = arith.constant 0 : i32
    %c0_i32_1 = arith.constant 0 : i32
    return %c0_i32, %c0_i32_0 : i32, i32
  }
  func.func @transform_3(%arg0: i32) -> (i32, i32) {
    %c0_i32 = arith.constant 0 : i32
    %c0_i32_0 = arith.constant 0 : i32
    %c0_i32_1 = arith.constant 0 : i32
    return %c0_i32, %c0_i32_0 : i32, i32
  }
  func.func @transform_4(%arg0: i32) -> (i32, i32) {
    %c0_i32 = arith.constant 0 : i32
    %c0_i32_0 = arith.constant 0 : i32
    %c0_i32_1 = arith.constant 0 : i32
    return %c0_i32, %c0_i32_0 : i32, i32
  }
  func.func @transform_5(%arg0: i32) -> (i32, i32, i32, i32) {
    %c0_i32 = arith.constant 0 : i32
    %c0_i32_0 = arith.constant 0 : i32
    %c0_i32_1 = arith.constant 0 : i32
    %c0_i32_2 = arith.constant 0 : i32
    return %arg0, %c0_i32, %c0_i32_0, %c0_i32_1 : i32, i32, i32, i32
  }
}

</mosaic_0001>

<bundles_post_ra>
// kernel: basic_block_forward.1
= control target key start
LH: loop header
LB: loop body
LE: loop exit
PB: predicated region body
PF: predicated region fallthrough
CT: control target
= control target key end

     0   :  { %s6164_s18 = smov 0   ;;  %s8517_s0 = inlined_call_operand.vmem [shape: f32[2,16,16,4], index: 0, kind: input, shape index: {}]   ;;  %s8518_s1 = inlined_call_operand.vmem [shape: f32[1152,128], index: 1, kind: input, shape index: {}]   ;;  %s8519_s2 = inlined_call_operand.vmem [shape: f32[1,128], index: 2, kind: input, shape index: {}]   ;;  %s8520_s3 = inlined_call_operand.vmem [shape: f32[1152,128], index: 3, kind: input, shape index: {}]   ;;  %s8521_s4 = inlined_call_operand.vmem [shape: f32[1,128], index: 4, kind: input, shape index: {}]   ;;  %s8522_s5 = inlined_call_operand.vmem [shape: f32[2,16,16,128], index: 5, kind: output, shape index: {}]  }
   0x1 LB: > { %s4929_s19 = sadd.s32 4294967295, %s6130_s18   ;;  %p4933_p0 = scmp.ge.s32.totalorder %s6130_s18, 1  ;;  %s6130_s18 = sphi %s6164_s18, %s15_s18  }
   0x2   : > { %p187_p1 = scmp.lt.s32.totalorder %s6130_s18, 3 }
   0x4   : > { %p188_p2 = pnand %p4933_p0, %p187_p1 }
   0x6   : > { %191 = sbr.rel (%p188_p2) target bundleno = 1427 (0x593), region = 40 }
   0xd   : > { %v6175_v0 = vld [vmem:[%s8518_s1] sm:$0xff]  ;;  %v6180_v1 = vld [vmem:[%s8518_s1 + $0x8] sm:$0xff]  ;;  %v6185_v2 = vld [vmem:[%s8518_s1 + $0x10] sm:$0xff]  ;;  %p6189_p3 = scmp.lt.s32.totalorder %s4929_s19, 1  ;;  %v8523_v3 = vmov 0.0|0.0   ;;  %v6133_v6 = vmov 0.0  }
   0xe   : > { %5200 = vmatprep.subr.bf16.mxu0 %v8523_v3  ;;  %v5201_v4 = vpack.c.bf16 %v6180_v1, %v6175_v0  ;;  %v6199_v5 = vld [vmem:[%s8518_s1 + $0x18] sm:$0xff]  ;;  %225 = vst [vmem:[#allocation2] sm:$0xff] %v6133_v6  ;;  %226 = vst [vmem:[#allocation2 + $0x8] sm:$0xff] %v6133_v6  ;;  %v1214_v8 = vld [vmem:[%s8518_s1 + $0x20] sm:$0xff]  ;;  %vm312_vm0 = vcmask 31744  }
   0xf   : > { %227 = vst [vmem:[#allocation2 + $0x10] sm:$0x3] %v6133_v6  ;;  %228 = vst [vmem:[#allocation2 + $0x18] sm:$0xff] %v6133_v6  ;;  %s8611_s19 = smov (!%p6189_p3, %s4929_s19), 1  ;;  %v5204_v7 = vpack.c.bf16 %v6199_v5, %v6185_v2  ;;  %v1215_v9 = vld [vmem:[%s8518_s1 + $0x28] sm:$0xff]  ;;  %v1216_v11 = vld [vmem:[%s8518_s1 + $0x30] sm:$0xff] }
  0x10   : > { %229 = vst [vmem:[#allocation2 + $0x20] sm:$0xff] %v6133_v6  ;;  %230 = vst [vmem:[#allocation2 + $0x28] sm:$0x3] %v6133_v6  ;;  %5202 = vmatpush1.bf16.msra.mxu0 %v5201_v4  ;;  %s4942_s8 = sshll.u32 %s8611_s19, 8  ;;  %v5207_v10 = vpack.c.bf16 %v1215_v9, %v1214_v8  ;;  %v1217_v12 = vld [vmem:[%s8518_s1 + $0x38] sm:$0xff]  ;;  %v1218_v15 = vld [vmem:[%s8518_s1 + $0x40] sm:$0xff] }
  0x11   : > { %231 = vst [vmem:[#allocation2 + $0x30] sm:$0xff] %v6133_v6  ;;  %232 = vst [vmem:[#allocation2 + $0x38] sm:$0xff] %v6133_v6  ;;  %5203 = vmatprep.subr.bf16.mxu0 %v8523_v3  ;;  %s6340_s15 = scalar_lea.vmem %s8517_s0, %s4942_s8  ;;  %v5210_v14 = vpack.c.bf16 %v1217_v12, %v1216_v11  ;;  %v1219_v16 = vld [vmem:[%s8518_s1 + $0x48] sm:$0xff]  ;;  %v1220_v24 = vld [vmem:[%s8518_s1 + $0x50] sm:$0xff]  ;;  %s8427_s14 = scalar_lea.vmem %s8522_s5, %s4942_s8 }
  0x12   : > { %233 = vst [vmem:[#allocation2 + $0x40] sm:$0x3] %v6133_v6  ;;  %234 = vst [vmem:[#allocation2 + $0x48] sm:$0xff] %v6133_v6  ;;  %v279_v17 = vld [vmem:[%s6340_s15] sm:$0xff]  ;;  %v280_v18 = vld [vmem:[%s6340_s15 + $0x8] sm:$0xff]  ;;  %v5213_v22 = vpack.c.bf16 %v1219_v16, %v1218_v15 }
  0x13   : > { %235 = vst [vmem:[#allocation2 + $0x50] sm:$0xff] %v6133_v6  ;;  %236 = vst [vmem:[#allocation2 + $0x58] sm:$0x3] %v6133_v6  ;;  %v281_v19 = vld [vmem:[%s6340_s15 + $0x10] sm:$0xff]  ;;  %v282_v20 = vld [vmem:[%s6340_s15 + $0x18] sm:$0xff] }
  0x14   : > { %237 = vst [vmem:[#allocation2 + $0x60] sm:$0xff] %v6133_v6  ;;  %238 = vst [vmem:[#allocation2 + $0x68] sm:$0xff] %v6133_v6  ;;  %5205 = vmatpush1.bf16.msra.mxu0 %v5204_v7  ;;  %v283_v21 = vld [vmem:[%s6340_s15 + $0x20] sm:$0xff]  ;;  %v284_v23 = vld [vmem:[%s6340_s15 + $0x28] sm:$0xff] }
  0x15   : > { %239 = vst [vmem:[#allocation2 + $0x70] sm:$0x3] %v6133_v6  ;;  %240 = vst [vmem:[#allocation2 + $0x78] sm:$0xff] %v6133_v6  ;;  %5206 = vmatprep.subr.bf16.mxu0 %v8523_v3  ;;  %v409_v13 = vld [vmem:[#allocation2 + $0x1] sm:$0xff]  ;;  %v1221_v25 = vld [vmem:[%s8518_s1 + $0x58] sm:$0xff] }
  0x16   : > { %241 = vst [vmem:[#allocation2 + $0x80] sm:$0xff] %v6133_v6  ;;  %242 = vst [vmem:[#allocation2 + $0x88] sm:$0x3] %v6133_v6  ;;  %1425 = vmatprep.mubr.f32.mxu0 %v409_v13  ;;  %v285_v26 = vld [vmem:[%s6340_s15 + $0x30] sm:$0xff]  ;;  %v286_v27 = vld [vmem:[%s6340_s15 + $0x38] sm:$0xff]  ;;  %v5216_v31 = vpack.c.bf16 %v1221_v25, %v1220_v24 }
  0x17   : > { %243 = vst [vmem:[#allocation2 + $0x90] sm:$0xff] %v6133_v6  ;;  %244 = vst [vmem:[#allocation2 + $0x98] sm:$0xff] %v6133_v6  ;;  %v287_v28 = vld [vmem:[%s6340_s15 + $0x40] sm:$0xff]  ;;  %v288_v29 = vld [vmem:[%s6340_s15 + $0x48] sm:$0xff] }
  0x18   : > { %245 = vst [vmem:[#allocation2 + $0xa0] sm:$0x3] %v6133_v6  ;;  %246 = vst [vmem:[#allocation2 + $0xa8] sm:$0xff] %v6133_v6  ;;  %5208 = vmatpush1.bf16.msra.mxu0 %v5207_v10  ;;  %v289_v30 = vld [vmem:[%s6340_s15 + $0x50] sm:$0xff]  ;;  %v290_v32 = vld [vmem:[%s6340_s15 + $0x58] sm:$0xff] }
  0x19   : > { %247 = vst [vmem:[#allocation2 + $0xb0] sm:$0xff] %v6133_v6  ;;  %248 = vst [vmem:[#allocation2 + $0xb8] sm:$0x3] %v6133_v6  ;;  %5209 = vmatprep.subr.bf16.mxu0 %v8523_v3  ;;  %v1222_v33 = vld [vmem:[%s8518_s1 + $0x60] sm:$0xff]  ;;  %v1223_v34 = vld [vmem:[%s8518_s1 + $0x68] sm:$0xff] }
  0x1a   : > { %249 = vst [vmem:[#allocation2 + $0xc0] sm:$0xff] %v6133_v6  ;;  %250 = vst [vmem:[#allocation2 + $0xc8] sm:$0xff] %v6133_v6  ;;  %v291_v35 = vld [vmem:[%s6340_s15 + $0x60] sm:$0xff]  ;;  %v5219_v36 = vpack.c.bf16 %v1223_v34, %v1222_v33  ;;  %v1224_v37 = vld [vmem:[%s8518_s1 + $0x70] sm:$0xff] }
  0x1b   : > { %251 = vst [vmem:[#allocation2 + $0xd0] sm:$0x3] %v6133_v6  ;;  %252 = vst [vmem:[#allocation2 + $0xd8] sm:$0xff] %v6133_v6  ;;  %v1225_v38 = vld [vmem:[%s8518_s1 + $0x78] sm:$0xff]  ;;  %v1226_v40 = vld [vmem:[%s8518_s1 + $0x80] sm:$0xff] }
  0x1c   : > { %253 = vst [vmem:[#allocation2 + $0xe0] sm:$0xff] %v6133_v6  ;;  %254 = vst [vmem:[#allocation2 + $0xe8] sm:$0x3] %v6133_v6  ;;  %5211 = vmatpush1.bf16.msra.mxu0 %v5210_v14  ;;  %v5222_v39 = vpack.c.bf16 %v1225_v38, %v1224_v37  ;;  %v1227_v41 = vld [vmem:[%s8518_s1 + $0x88] sm:$0xff]  ;;  %v293_v43 = vld [vmem:[%s6340_s15 + $0x70] sm:$0xff] }
  0x1d   : > { %255 = vst [vmem:[#allocation2 + $0xf0] sm:$0xff] %v6133_v6  ;;  %256 = vst [vmem:[#allocation2 + $0xf8] sm:$0xff] %v6133_v6  ;;  %5212 = vmatprep.subr.bf16.mxu0 %v8523_v3  ;;  %v292_v42 = vld [vmem:[%s6340_s15 + $0x68] sm:$0xff]  ;;  %v5225_v44 = vpack.c.bf16 %v1227_v41, %v1226_v40  ;;  %v1228_v45 = vld [vmem:[%s8518_s1 + $0x90] sm:$0xff] }
  0x1e   : > { %257 = vst [vmem:[#allocation2 + $0x100] sm:$0x3] %v6133_v6  ;;  %258 = vst [vmem:[#allocation2 + $0x108] sm:$0xff] %v6133_v6  ;;  %v294_v46 = vld [vmem:[%s6340_s15 + $0x78] sm:$0xff]  ;;  %v295_v47 = vld [vmem:[%s6340_s15 + $0x80] sm:$0xff] }
  0x1f   : > { %259 = vst [vmem:[#allocation2 + $0x110] sm:$0xff] %v6133_v6  ;;  %260 = vst [vmem:[#allocation2 + $0x118] sm:$0x3] %v6133_v6  ;;  %v1229_v48 = vld [vmem:[%s8518_s1 + $0x98] sm:$0xff]  ;;  %v296_v49 = vld [vmem:[%s6340_s15 + $0x88] sm:$0xff] }
  0x20   : > { %261 = vst [vmem:[#allocation2 + $0x120] sm:$0xff] %v6133_v6  ;;  %262 = vst [vmem:[#allocation2 + $0x128] sm:$0xff] %v6133_v6  ;;  %5214 = vmatpush1.bf16.msra.mxu0 %v5213_v22  ;;  %v297_v50 = vld [vmem:[%s6340_s15 + $0x90] sm:$0xff]  ;;  %v298_v51 = vld [vmem:[%s6340_s15 + $0x98] sm:$0xff]  ;;  %v5228_v53 = vpack.c.bf16 %v1229_v48, %v1228_v45 }
  0x21   : > { %263 = vst [vmem:[#allocation2 + $0x130] sm:$0x3] %v6133_v6  ;;  %264 = vst [vmem:[#allocation2 + $0x138] sm:$0xff] %v6133_v6  ;;  %5215 = vmatprep.subr.bf16.mxu0 %v8523_v3  ;;  %v299_v52 = vld [vmem:[%s6340_s15 + $0xa0] sm:$0xff]  ;;  %v300_v55 = vld [vmem:[%s6340_s15 + $0xa8] sm:$0xff] }
  0x22   : > { %265 = vst [vmem:[#allocation2 + $0x140] sm:$0xff] %v6133_v6  ;;  %266 = vst [vmem:[#allocation2 + $0x148] sm:$0x3] %v6133_v6  ;;  %v1230_v54 = vld [vmem:[%s8518_s1 + $0xa0] sm:$0xff]  ;;  %v301_v56 = vld [vmem:[%s6340_s15 + $0xb0] sm:$0xff] }
  0x23   : > { %267 = vst [vmem:[#allocation2 + $0x150] sm:$0xff] %v6133_v6  ;;  %268 = vst [vmem:[#allocation2 + $0x158] sm:$0xff] %v6133_v6  ;;  %v1231_v57 = vld [vmem:[%s8518_s1 + $0xa8] sm:$0xff]  ;;  %v302_v58 = vld [vmem:[%s6340_s15 + $0xb8] sm:$0xff] }
  0x24   : > { %269 = vst [vmem:[#allocation2 + $0x160] sm:$0x3] %v6133_v6  ;;  %270 = vst [vmem:[#allocation2 + $0x168] sm:$0xff] %v6133_v6  ;;  %5217 = vmatpush1.bf16.msra.mxu0 %v5216_v31  ;;  %v303_v59 = vld [vmem:[%s6340_s15 + $0xc0] sm:$0xff]  ;;  %v304_v60 = vld [vmem:[%s6340_s15 + $0xc8] sm:$0xff]  ;;  %v5231_v61 = vpack.c.bf16 %v1231_v57, %v1230_v54 }
  0x25   : > { %271 = vst [vmem:[#allocation2 + $0x170] sm:$0xff] %v6133_v6  ;;  %272 = vst [vmem:[#allocation2 + $0x178] sm:$0x3] %v6133_v6  ;;  %5218 = vmatprep.subr.bf16.mxu0 %v8523_v3  ;;  %v1232_v62 = vld [vmem:[%s8518_s1 + $0xb0] sm:$0xff]  ;;  %v1233_v63 = vld [vmem:[%s8518_s1 + $0xb8] sm:$0xff] }
  0x26   : > { %273 = vst [vmem:[#allocation2 + $0x180] sm:$0xff] %v6133_v6  ;;  %274 = vst [vmem:[#allocation2 + $0x188] sm:$0xff] %v6133_v6  ;;  %v5234_v0 = vpack.c.bf16 %v1233_v63, %v1232_v62  ;;  %v1234_v1 = vld [vmem:[%s8518_s1 + $0xc0] sm:$0xff]  ;;  %v1235_v2 = vld [vmem:[%s8518_s1 + $0xc8] sm:$0xff] }
  0x27   : > { %275 = vst [vmem:[#allocation2 + $0x190] sm:$0x3] %v6133_v6  ;;  %276 = vst [vmem:[#allocation2 + $0x198] sm:$0xff] %v6133_v6  ;;  %v5237_v4 = vpack.c.bf16 %v1235_v2, %v1234_v1  ;;  %v305_v5 = vld [vmem:[%s6340_s15 + $0xd0] sm:$0xff]  ;;  %v306_v7 = vld [vmem:[%s6340_s15 + $0xd8] sm:$0xff] }
  0x28   : > { %277 = vst [vmem:[#allocation2 + $0x1a0] sm:$0xff] %v6133_v6  ;;  %278 = vst [vmem:[#allocation2 + $0x1a8] sm:$0x3] %v6133_v6  ;;  %5220 = vmatpush1.bf16.msra.mxu0 %v5219_v36  ;;  %v1236_v8 = vld [vmem:[%s8518_s1 + $0xd0] sm:$0xff]  ;;  %v1237_v9 = vld [vmem:[%s8518_s1 + $0xd8] sm:$0xff] }
  0x29   : > { %2518 = vst [vmem:[#allocation3] sm:$0xff] %v6133_v6  ;;  %2519 = vst [vmem:[#allocation3 + $0x8] sm:$0xff] %v6133_v6  ;;  %5221 = vmatprep.subr.bf16.mxu0 %v8523_v3  ;;  %v307_v10 = vld [vmem:[%s6340_s15 + $0xe0] sm:$0xff]  ;;  %v5240_v11 = vpack.c.bf16 %v1237_v9, %v1236_v8  ;;  %v1239_v13 = vld [vmem:[%s8518_s1 + $0xe8] sm:$0xff] }
  0x2a   : > { %2520 = vst [vmem:[#allocation3 + $0x10] sm:$0x3] %v6133_v6  ;;  %2521 = vst [vmem:[#allocation3 + $0x18] sm:$0xff] %v6133_v6  ;;  %v1238_v12 = vld [vmem:[%s8518_s1 + $0xe0] sm:$0xff]  ;;  %v308_v14 = vld [vmem:[%s6340_s15 + $0xe8] sm:$0xff] }
  0x2b   : > { %2522 = vst [vmem:[#allocation3 + $0x20] sm:$0xff] %v6133_v6  ;;  %2523 = vst [vmem:[#allocation3 + $0x28] sm:$0x3] %v6133_v6  ;;  %v5243_v15 = vpack.c.bf16 %v1239_v13, %v1238_v12  ;;  %v1240_v16 = vld [vmem:[%s8518_s1 + $0xf0] sm:$0xff]  ;;  %v1245_v24 = vld [vmem:[%s8518_s1 + $0x118] sm:$0xff] }
  0x2c   : > { %2524 = vst [vmem:[#allocation3 + $0x30] sm:$0xff] %v6133_v6  ;;  %2525 = vst [vmem:[#allocation3 + $0x38] sm:$0xff] %v6133_v6  ;;  %5223 = vmatpush1.bf16.msra.mxu0 %v5222_v39  ;;  %v410_v22 = vld [vmem:[#allocation2 + $0x9] sm:$0xff]  ;;  %v1249_v33 = vld [vmem:[%s8518_s1 + $0x138] sm:$0xff] }
  0x2d   : > { %2526 = vst [vmem:[#allocation3 + $0x40] sm:$0x3] %v6133_v6  ;;  %2527 = vst [vmem:[#allocation3 + $0x48] sm:$0xff] %v6133_v6  ;;  %5224 = vmatprep.subr.bf16.mxu0 %v8523_v3  ;;  %v1250_v36 = vld [vmem:[%s8518_s1 + $0x140] sm:$0xff]  ;;  %v1251_v37 = vld [vmem:[%s8518_s1 + $0x148] sm:$0xff] }
  0x2e   : > { %2528 = vst [vmem:[#allocation3 + $0x50] sm:$0xff] %v6133_v6  ;;  %2529 = vst [vmem:[#allocation3 + $0x58] sm:$0x3] %v6133_v6  ;;  %v5261_v39 = vpack.c.bf16 %v1251_v37, %v1250_v36  ;;  %v1255_v48 = vld [vmem:[%s8518_s1 + $0x168] sm:$0xff]  ;;  %v1258_v57 = vld [vmem:[%s8518_s1 + $0x180] sm:$0xff] }
  0x2f   : > { %2530 = vst [vmem:[#allocation3 + $0x60] sm:$0xff] %v6133_v6  ;;  %2531 = vst [vmem:[#allocation3 + $0x68] sm:$0xff] %v6133_v6  ;;  %v1260_v62 = vld [vmem:[%s8518_s1 + $0x190] sm:$0xff]  ;;  %v1261_v63 = vld [vmem:[%s8518_s1 + $0x198] sm:$0xff] }
  0x30   : > { %2532 = vst [vmem:[#allocation3 + $0x70] sm:$0x3] %v6133_v6  ;;  %2533 = vst [vmem:[#allocation3 + $0x78] sm:$0xff] %v6133_v6  ;;  %5226 = vmatpush1.bf16.msra.mxu0 %v5225_v44  ;;  %v5276_v1 = vpack.c.bf16 %v1261_v63, %v1260_v62 }
  0x31   : > { %2534 = vst [vmem:[#allocation3 + $0x80] sm:$0xff] %v6133_v6  ;;  %2535 = vst [vmem:[#allocation3 + $0x88] sm:$0x3] %v6133_v6  ;;  %5227 = vmatprep.subr.bf16.mxu0 %v8523_v3 }
  0x32   : > { %2536 = vst [vmem:[#allocation3 + $0x90] sm:$0xff] %v6133_v6  ;;  %2537 = vst [vmem:[#allocation3 + $0x98] sm:$0xff] %v6133_v6 }
  0x33   : > { %2538 = vst [vmem:[#allocation3 + $0xa0] sm:$0x3] %v6133_v6  ;;  %2539 = vst [vmem:[#allocation3 + $0xa8] sm:$0xff] %v6133_v6 }
  0x34   : > { %2540 = vst [vmem:[#allocation3 + $0xb0] sm:$0xff] %v6133_v6  ;;  %2541 = vst [vmem:[#allocation3 + $0xb8] sm:$0x3] %v6133_v6  ;;  %5229 = vmatpush1.bf16.msra.mxu0 %v5228_v53  ;;  %v1257_v53 = vld [vmem:[%s8518_s1 + $0x178] sm:$0xff] }
  0x35   : > { %2542 = vst [vmem:[#allocation3 + $0xc0] sm:$0xff] %v6133_v6  ;;  %2543 = vst [vmem:[#allocation3 + $0xc8] sm:$0xff] %v6133_v6  ;;  %5230 = vmatprep.subr.bf16.mxu0 %v8523_v3 }
  0x36   : > { %2544 = vst [vmem:[#allocation3 + $0xd0] sm:$0x3] %v6133_v6  ;;  %2545 = vst [vmem:[#allocation3 + $0xd8] sm:$0xff] %v6133_v6 }
  0x37   : > { %2546 = vst [vmem:[#allocation3 + $0xe0] sm:$0xff] %v6133_v6  ;;  %2547 = vst [vmem:[#allocation3 + $0xe8] sm:$0x3] %v6133_v6 }
  0x38   : > { %2548 = vst [vmem:[#allocation3 + $0xf0] sm:$0xff] %v6133_v6  ;;  %2549 = vst [vmem:[#allocation3 + $0xf8] sm:$0xff] %v6133_v6  ;;  %5232 = vmatpush1.bf16.msra.mxu0 %v5231_v61 }
  0x39   : > { %2550 = vst [vmem:[#allocation3 + $0x100] sm:$0x3] %v6133_v6  ;;  %2551 = vst [vmem:[#allocation3 + $0x108] sm:$0xff] %v6133_v6  ;;  %5233 = vmatprep.subr.bf16.mxu0 %v8523_v3 }
  0x3a   : > { %2552 = vst [vmem:[#allocation3 + $0x110] sm:$0xff] %v6133_v6  ;;  %2553 = vst [vmem:[#allocation3 + $0x118] sm:$0x3] %v6133_v6 }
  0x3b   : > { %2554 = vst [vmem:[#allocation3 + $0x120] sm:$0xff] %v6133_v6  ;;  %2555 = vst [vmem:[#allocation3 + $0x128] sm:$0xff] %v6133_v6 }
  0x3c   : > { %2556 = vst [vmem:[#allocation3 + $0x130] sm:$0x3] %v6133_v6  ;;  %2557 = vst [vmem:[#allocation3 + $0x138] sm:$0xff] %v6133_v6  ;;  %5235 = vmatpush1.bf16.msra.mxu0 %v5234_v0 }
  0x3d   : > { %2558 = vst [vmem:[#allocation3 + $0x140] sm:$0xff] %v6133_v6  ;;  %2559 = vst [vmem:[#allocation3 + $0x148] sm:$0x3] %v6133_v6  ;;  %5236 = vmatprep.subr.bf16.mxu0 %v8523_v3 }
  0x3e   : > { %2560 = vst [vmem:[#allocation3 + $0x150] sm:$0xff] %v6133_v6  ;;  %2561 = vst [vmem:[#allocation3 + $0x158] sm:$0xff] %v6133_v6 }
  0x3f   : > { %2562 = vst [vmem:[#allocation3 + $0x160] sm:$0x3] %v6133_v6  ;;  %2563 = vst [vmem:[#allocation3 + $0x168] sm:$0xff] %v6133_v6 }
  0x40   : > { %2564 = vst [vmem:[#allocation3 + $0x170] sm:$0xff] %v6133_v6  ;;  %2565 = vst [vmem:[#allocation3 + $0x178] sm:$0x3] %v6133_v6  ;;  %5238 = vmatpush1.bf16.msra.mxu0 %v5237_v4  ;;  %v1262_v4 = vld [vmem:[%s8518_s1 + $0x1a0] sm:$0xff] }
  0x41   : > { %2566 = vst [vmem:[#allocation3 + $0x180] sm:$0xff] %v6133_v6  ;;  %2567 = vst [vmem:[#allocation3 + $0x188] sm:$0xff] %v6133_v6  ;;  %5239 = vmatprep.subr.bf16.mxu0 %v8523_v3 }
  0x42   : > { %2568 = vst [vmem:[#allocation3 + $0x190] sm:$0x3] %v6133_v6  ;;  %2569 = vst [vmem:[#allocation3 + $0x198] sm:$0xff] %v6133_v6 }
  0x43   : > { %2570 = vst [vmem:[#allocation3 + $0x1a0] sm:$0xff] %v6133_v6  ;;  %2571 = vst [vmem:[#allocation3 + $0x1a8] sm:$0x3] %v6133_v6 }
  0x44   : > { %313 = vst.msk [vmem:[#allocation2 + $0x19] sm:$0xff] %vm312_vm0, %v279_v17  ;;  %314 = vst.msk [vmem:[#allocation2 + $0x21] sm:$0xff] %vm312_vm0, %v280_v18  ;;  %5241 = vmatpush1.bf16.msra.mxu0 %v5240_v11  ;;  %v1241_v17 = vld [vmem:[%s8518_s1 + $0xf8] sm:$0xff] }
  0x45   : > { %315 = vst.msk [vmem:[#allocation2 + $0x31] sm:$0xff] %vm312_vm0, %v281_v19  ;;  %316 = vst.msk [vmem:[#allocation2 + $0x39] sm:$0xff] %vm312_vm0, %v282_v20  ;;  %5242 = vmatprep.subr.bf16.mxu0 %v8523_v3  ;;  %v5246_v18 = vpack.c.bf16 %v1241_v17, %v1240_v16  ;;  %v1242_v19 = vld [vmem:[%s8518_s1 + $0x100] sm:$0xff]  ;;  %v1243_v20 = vld [vmem:[%s8518_s1 + $0x108] sm:$0xff] }
  0x46   : > { %317 = vst.msk [vmem:[#allocation2 + $0x49] sm:$0xff] %vm312_vm0, %v283_v21  ;;  %318 = vst.msk [vmem:[#allocation2 + $0x51] sm:$0xff] %vm312_vm0, %v284_v23  ;;  %v5249_v21 = vpack.c.bf16 %v1243_v20, %v1242_v19  ;;  %v1244_v23 = vld [vmem:[%s8518_s1 + $0x110] sm:$0xff]  ;;  %v1265_v11 = vld [vmem:[%s8518_s1 + $0x1b8] sm:$0xff] }
  0x47   : > { %319 = vst.msk [vmem:[#allocation2 + $0x61] sm:$0xff] %vm312_vm0, %v285_v26  ;;  %320 = vst.msk [vmem:[#allocation2 + $0x69] sm:$0xff] %vm312_vm0, %v286_v27  ;;  %v5252_v25 = vpack.c.bf16 %v1245_v24, %v1244_v23  ;;  %v1246_v27 = vld [vmem:[%s8518_s1 + $0x120] sm:$0xff]  ;;  %v1267_v16 = vld [vmem:[%s8518_s1 + $0x1c8] sm:$0xff] }
  0x48   : > { %321 = vst.msk [vmem:[#allocation2 + $0x79] sm:$0xff] %vm312_vm0, %v287_v28  ;;  %322 = vst.msk [vmem:[#allocation2 + $0x81] sm:$0xff] %vm312_vm0, %v288_v29  ;;  %5244 = vmatpush1.bf16.msra.mxu0 %v5243_v15  ;;  %v1247_v28 = vld [vmem:[%s8518_s1 + $0x128] sm:$0xff]  ;;  %v1266_v15 = vld [vmem:[%s8518_s1 + $0x1c0] sm:$0xff] }
  0x49   : > { %323 = vst.msk [vmem:[#allocation2 + $0x91] sm:$0xff] %vm312_vm0, %v289_v30  ;;  %324 = vst.msk [vmem:[#allocation2 + $0x99] sm:$0xff] %vm312_vm0, %v290_v32  ;;  %5245 = vmatprep.subr.bf16.mxu0 %v8523_v3  ;;  %v5255_v30 = vpack.c.bf16 %v1247_v28, %v1246_v27  ;;  %v1248_v32 = vld [vmem:[%s8518_s1 + $0x130] sm:$0xff]  ;;  %v1271_v27 = vld [vmem:[%s8518_s1 + $0x1e8] sm:$0xff] }
  0x4a   : > { %325 = vst.msk [vmem:[#allocation2 + $0xa9] sm:$0xff] %vm312_vm0, %v291_v35  ;;  %326 = vst.msk [vmem:[#allocation2 + $0xb1] sm:$0xff] %vm312_vm0, %v292_v42  ;;  %v5258_v34 = vpack.c.bf16 %v1249_v33, %v1248_v32  ;;  %v1252_v42 = vld [vmem:[%s8518_s1 + $0x150] sm:$0xff] }
  0x4b   : > { %327 = vst.msk [vmem:[#allocation2 + $0xc1] sm:$0xff] %vm312_vm0, %v293_v43  ;;  %328 = vst.msk [vmem:[#allocation2 + $0xc9] sm:$0xff] %vm312_vm0, %v294_v46  ;;  %v6501_v26 = vld [vmem:[#allocation2 + $0x19] sm:$0xff]  ;;  %v6514_v31 = vld [vmem:[#allocation2 + $0x21] sm:$0xff] }
  0x4c   : > { %329 = vst.msk [vmem:[#allocation2 + $0xd9] sm:$0xff] %vm312_vm0, %v295_v47  ;;  %330 = vst.msk [vmem:[#allocation2 + $0xe1] sm:$0xff] %vm312_vm0, %v296_v49  ;;  %5247 = vmatpush1.bf16.msra.mxu0 %v5246_v18  ;;  %v6512_v29 = vld [vmem:[#allocation2 + $0x18] sm:$0xff]  ;;  %v6538_v38 = vld [vmem:[#allocation2 + $0x30] sm:$0xff]  ;;  %v5285_v18 = vpack.c.bf16 %v1267_v16, %v1266_v15 }
  0x4d   : > { %331 = vst.msk [vmem:[#allocation2 + $0xf1] sm:$0xff] %vm312_vm0, %v297_v50  ;;  %332 = vst.msk [vmem:[#allocation2 + $0xf9] sm:$0xff] %vm312_vm0, %v298_v51  ;;  %5248 = vmatprep.subr.bf16.mxu0 %v8523_v3  ;;  %v6527_v35 = vld [vmem:[#allocation2 + $0x31] sm:$0xff]  ;;  %v6542_v41 = vld [vmem:[#allocation2 + $0x39] sm:$0xff] }
  0x4e   : > { %333 = vst.msk [vmem:[#allocation2 + $0x109] sm:$0xff] %vm312_vm0, %v299_v52  ;;  %334 = vst.msk [vmem:[#allocation2 + $0x111] sm:$0xff] %vm312_vm0, %v300_v55  ;;  %v6540_v40 = vld [vmem:[#allocation2 + $0x32] sm:$0xff]  ;;  %v6556_v46 = vld [vmem:[#allocation2 + $0x49] sm:$0xff] }
  0x4f   : > { %335 = vst.msk [vmem:[#allocation2 + $0x121] sm:$0xff] %vm312_vm0, %v301_v56  ;;  %336 = vst.msk [vmem:[#allocation2 + $0x129] sm:$0xff] %vm312_vm0, %v302_v58  ;;  %1426 = vmatmul.mubr.f32.vlgmr.msra.gmra.mrb[0].mxu0 %v6133_v6  ;;  %v1253_v43 = vld [vmem:[%s8518_s1 + $0x158] sm:$0xff]  ;;  %5072 = vmatprep.mubr.f32.mxu1 %v6540_v40  ;;  %v1254_v47 = vld [vmem:[%s8518_s1 + $0x160] sm:$0xff] }
  0x50   : > { %337 = vst.msk [vmem:[#allocation2 + $0x139] sm:$0xff] %vm312_vm0, %v303_v59  ;;  %338 = vst.msk [vmem:[#allocation2 + $0x141] sm:$0xff] %vm312_vm0, %v304_v60  ;;  %5250 = vmatpush1.bf16.msra.mxu0 %v5249_v21  ;;  %1430 = vmatprep.mubr.f32.mxu0 %v410_v22  ;;  %v6554_v44 = vld [vmem:[#allocation2 + $0x38] sm:$0xff]  ;;  %v5264_v45 = vpack.c.bf16 %v1253_v43, %v1252_v42  ;;  %v6567_v49 = vld [vmem:[#allocation2 + $0x48] sm:$0xff]  ;;  %v5267_v50 = vpack.c.bf16 %v1255_v48, %v1254_v47 }
  0x51   : > { %339 = vst.msk [vmem:[#allocation2 + $0x151] sm:$0xff] %vm312_vm0, %v305_v5  ;;  %340 = vst.msk [vmem:[#allocation2 + $0x159] sm:$0xff] %vm312_vm0, %v306_v7  ;;  %5251 = vmatprep.subr.bf16.mxu0 %v8523_v3  ;;  %v6569_v51 = vld [vmem:[#allocation2 + $0x51] sm:$0xff]  ;;  %v6582_v56 = vld [vmem:[#allocation2 + $0x61] sm:$0xff] }
  0x52   : > { %341 = vst.msk [vmem:[#allocation2 + $0x169] sm:$0xff] %vm312_vm0, %v307_v10  ;;  %342 = vst.msk [vmem:[#allocation2 + $0x171] sm:$0xff] %vm312_vm0, %v308_v14  ;;  %v1256_v52 = vld [vmem:[%s8518_s1 + $0x170] sm:$0xff]  ;;  %v1259_v58 = vld [vmem:[%s8518_s1 + $0x188] sm:$0xff] }
  0x53   : > { %1431 = vmatmul.mubr.f32.gmra.mrb[2].mxu0 %v6133_v6  ;;  %v6525_v6 = vld [vmem:[#allocation2 + $0x20] sm:$0xff]  ;;  %v6580_v54 = vld [vmem:[#allocation2 + $0x50] sm:$0xff]  ;;  %v5270_v55 = vpack.c.bf16 %v1257_v53, %v1256_v52  ;;  %v5273_v60 = vpack.c.bf16 %v1259_v58, %v1258_v57  ;;  %v6606_v0 = vld [vmem:[#allocation2 + $0x68] sm:$0xff] }
  0x54   : > { %1435 = vmatprep.mubr.f32.mxu0 %v6501_v26  ;;  %5253 = vmatpush1.bf16.msra.mxu0 %v5252_v25  ;;  %v6593_v59 = vld [vmem:[#allocation2 + $0x60] sm:$0xff]  ;;  %v6595_v61 = vld [vmem:[#allocation2 + $0x69] sm:$0xff]  ;;  %v6619_v7 = vld [vmem:[#allocation2 + $0x78] sm:$0xff] }
  0x55   : > { %5254 = vmatprep.subr.bf16.mxu0 %v8523_v3  ;;  %v6608_v2 = vld [vmem:[#allocation2 + $0x79] sm:$0xff]  ;;  %v1263_v5 = vld [vmem:[%s8518_s1 + $0x1a8] sm:$0xff]  ;;  %v1264_v10 = vld [vmem:[%s8518_s1 + $0x1b0] sm:$0xff] }
  0x56   : > { %v5279_v8 = vpack.c.bf16 %v1263_v5, %v1262_v4  ;;  %v6621_v9 = vld [vmem:[#allocation2 + $0x81] sm:$0xff]  ;;  %v5282_v13 = vpack.c.bf16 %v1265_v11, %v1264_v10  ;;  %v6634_v14 = vld [vmem:[#allocation2 + $0x91] sm:$0xff]  ;;  %v6647_v19 = vld [vmem:[#allocation2 + $0x99] sm:$0xff] }
  0x57   : > { %1436 = vmatmul.mubr.f32.gmra.mrb[4].mxu0 %v6512_v29  ;;  %v6632_v12 = vld [vmem:[#allocation2 + $0x80] sm:$0xff]  ;;  %v6645_v17 = vld [vmem:[#allocation2 + $0x90] sm:$0xff]  ;;  %v1269_v21 = vld [vmem:[%s8518_s1 + $0x1d8] sm:$0xff] }
  0x58   : > { %1440 = vmatprep.mubr.f32.mxu0 %v6514_v31  ;;  %5256 = vmatpush1.bf16.msra.mxu0 %v5255_v30  ;;  %v1268_v20 = vld [vmem:[%s8518_s1 + $0x1d0] sm:$0xff]  ;;  %v6658_v22 = vld [vmem:[#allocation2 + $0x98] sm:$0xff]  ;;  %v1270_v25 = vld [vmem:[%s8518_s1 + $0x1e0] sm:$0xff] }
  0x59   : > { %5257 = vmatprep.subr.bf16.mxu0 %v8523_v3  ;;  %v5288_v23 = vpack.c.bf16 %v1269_v21, %v1268_v20  ;;  %v6660_v24 = vld [vmem:[#allocation2 + $0xa9] sm:$0xff]  ;;  %v5291_v30 = vpack.c.bf16 %v1271_v27, %v1270_v25  ;;  %v6673_v32 = vld [vmem:[#allocation2 + $0xb1] sm:$0xff]  ;;  %v6691_v42 = vld [vmem:[#allocation2 + $0xc0] sm:$0xff] }
  0x5a   : > { %v6671_v28 = vld [vmem:[#allocation2 + $0xa8] sm:$0xff]  ;;  %v1272_v33 = vld [vmem:[%s8518_s1 + $0x1f0] sm:$0xff]  ;;  %v6700_v47 = vld [vmem:[#allocation2 + $0xd9] sm:$0xff] }
  0x5b   : > { %1441 = vmatmul.mubr.f32.gmra.mrb[6].mxu0 %v6525_v6  ;;  %v6684_v36 = vld [vmem:[#allocation2 + $0xb0] sm:$0xff]  ;;  %v6704_v48 = vld [vmem:[#allocation2 + $0xd8] sm:$0xff]  ;;  %v6710_v52 = vld [vmem:[#allocation2 + $0xe0] sm:$0xff] }
  0x5c   : > { %1445 = vmatprep.mubr.f32.mxu0 %v6527_v35  ;;  %5259 = vmatpush1.bf16.msra.mxu0 %v5258_v34  ;;  %v1273_v34 = vld [vmem:[%s8518_s1 + $0x1f8] sm:$0xff]  ;;  %v6693_v43 = vld [vmem:[#allocation2 + $0xc9] sm:$0xff]  ;;  %v6736_v4 = vld [vmem:[#allocation2 + $0x121] sm:$0xff] }
  0x5d   : > { %5260 = vmatprep.subr.bf16.mxu0 %v8523_v3  ;;  %v5294_v37 = vpack.c.bf16 %v1273_v34, %v1272_v33  ;;  %v6712_v53 = vld [vmem:[#allocation2 + $0xf1] sm:$0xff]  ;;  %v6718_v57 = vld [vmem:[#allocation2 + $0xf9] sm:$0xff]  ;;  %v6728_v62 = vld [vmem:[#allocation2 + $0x108] sm:$0xff] }
  0x5e   : > { %v6722_v58 = vld [vmem:[#allocation2 + $0xf8] sm:$0xff]  ;;  %v6740_v5 = vld [vmem:[#allocation2 + $0x120] sm:$0xff]  ;;  %v6746_v10 = vld [vmem:[#allocation2 + $0x128] sm:$0xff] }
  0x5f   : > { %1446 = vmatmul.mubr.f32.gmra.mrb[8].mxu0 %v6538_v38  ;;  %v6730_v63 = vld [vmem:[#allocation2 + $0x111] sm:$0xff]  ;;  %v6748_v11 = vld [vmem:[#allocation2 + $0x139] sm:$0xff]  ;;  %v6754_v15 = vld [vmem:[#allocation2 + $0x141] sm:$0xff] }
  0x60   : > { %1450 = vmatprep.mubr.f32.mxu0 %v6542_v41  ;;  %5262 = vmatpush1.bf16.msra.mxu0 %v5261_v39  ;;  %v6686_v39 = vld [vmem:[#allocation2 + $0xc1] sm:$0xff]  ;;  %8561 = vst [vmem:[#allocation5_spill] sm:$0xff] %v6748_v11  ;;  %8562 = vst [vmem:[#allocation6_spill] sm:$0xff] %v6754_v15  ;;  %v6764_v20 = vld [vmem:[#allocation2 + $0x150] sm:$0xff] }
  0x61   : > { %5263 = vmatprep.subr.bf16.mxu0 %v8523_v3  ;;  %v6758_v16 = vld [vmem:[#allocation2 + $0x140] sm:$0xff]  ;;  %v6772_v25 = vld [vmem:[#allocation2 + $0x158] sm:$0xff]  ;;  %v6774_v27 = vld [vmem:[#allocation2 + $0x169] sm:$0xff] }
  0x62   : > { %v6766_v21 = vld [vmem:[#allocation2 + $0x159] sm:$0xff]  ;;  %8565 = vst [vmem:[#allocation9_spill] sm:$0xff] %v6774_v27  ;;  %v6780_v33 = vld [vmem:[#allocation2 + $0x168] sm:$0xff]  ;;  %v6782_v34 = vld [vmem:[#allocation2 + $0x171] sm:$0xff] }
  0x63   : > { %1451 = vmatmul.mubr.f32.gmra.mrb[10].mxu0 %v6554_v44  ;;  %8564 = vst [vmem:[#allocation8_spill] sm:$0xff] %v6766_v21  ;;  %8566 = vst [vmem:[#allocation10_spill] sm:$0xff] %v6782_v34 }
  0x64   : > { %1455 = vmatprep.mubr.f32.mxu0 %v6556_v46  ;;  %5265 = vmatpush1.bf16.msra.mxu0 %v5264_v45  ;;  %v6698_v45 = vld [vmem:[#allocation2 + $0xc8] sm:$0xff] }
  0x65   : > { %5266 = vmatprep.subr.bf16.mxu0 %v8523_v3 }
  0x67   : > { %1456 = vmatmul.mubr.f32.gmra.mrb[12].mxu0 %v6567_v49 }
  0x68   : > { %1460 = vmatprep.mubr.f32.mxu0 %v6569_v51  ;;  %5268 = vmatpush1.bf16.msra.mxu0 %v5267_v50  ;;  %v6706_v50 = vld [vmem:[#allocation2 + $0xe1] sm:$0xff] }
  0x69   : > { %5269 = vmatprep.subr.bf16.mxu0 %v8523_v3 }
  0x6b   : > { %1461 = vmatmul.mubr.f32.gmra.mrb[14].mxu0 %v6580_v54 }
  0x6c   : > { %1465 = vmatprep.mubr.f32.mxu0 %v6582_v56  ;;  %5271 = vmatpush1.bf16.msra.mxu0 %v5270_v55  ;;  %v6716_v55 = vld [vmem:[#allocation2 + $0xf0] sm:$0xff] }
  0x6d   : > { %5272 = vmatprep.subr.bf16.mxu0 %v8523_v3 }
  0x6f   : > { %1466 = vmatmul.mubr.f32.gmra.mrb[16].mxu0 %v6593_v59 }
  0x70   : > { %1470 = vmatprep.mubr.f32.mxu0 %v6595_v61  ;;  %5274 = vmatpush1.bf16.msra.mxu0 %v5273_v60  ;;  %v6724_v60 = vld [vmem:[#allocation2 + $0x109] sm:$0xff] }
  0x71   : > { %5275 = vmatprep.subr.bf16.mxu0 %v8523_v3 }
  0x73   : > { %1471 = vmatmul.mubr.f32.gmra.mrb[18].mxu0 %v6606_v0 }
  0x74   : > { %1475 = vmatprep.mubr.f32.mxu0 %v6608_v2  ;;  %5277 = vmatpush1.bf16.msra.mxu0 %v5276_v1  ;;  %v6734_v1 = vld [vmem:[#allocation2 + $0x110] sm:$0xff] }
  0x75   : > { %5278 = vmatprep.subr.bf16.mxu0 %v8523_v3 }
  0x77   : > { %1476 = vmatmul.mubr.f32.gmra.mrb[20].mxu0 %v6619_v7 }
  0x78   : > { %1480 = vmatprep.mubr.f32.mxu0 %v6621_v9  ;;  %5280 = vmatpush1.bf16.msra.mxu0 %v5279_v8  ;;  %v6742_v8 = vld [vmem:[#allocation2 + $0x129] sm:$0xff] }
  0x79   : > { %5281 = vmatprep.subr.bf16.mxu0 %v8523_v3 }
  0x7b   : > { %1481 = vmatmul.mubr.f32.gmra.mrb[22].mxu0 %v6632_v12 }
  0x7c   : > { %1485 = vmatprep.mubr.f32.mxu0 %v6634_v14  ;;  %5283 = vmatpush1.bf16.msra.mxu0 %v5282_v13  ;;  %v6752_v13 = vld [vmem:[#allocation2 + $0x138] sm:$0xff] }
  0x7d   : > { %5284 = vmatprep.subr.bf16.mxu0 %v8523_v3 }
  0x7f   : > { %1486 = vmatmul.mubr.f32.gmra.mrb[24].mxu0 %v6645_v17 }
  0x80   : > { %1490 = vmatprep.mubr.f32.mxu0 %v6647_v19  ;;  %5286 = vmatpush1.bf16.msra.mxu0 %v5285_v18  ;;  %v6760_v18 = vld [vmem:[#allocation2 + $0x151] sm:$0xff] }
  0x81   : > { %5287 = vmatprep.subr.bf16.mxu0 %v8523_v3  ;;  %8563 = vst [vmem:[#allocation7_spill] sm:$0xff] %v6760_v18 }
  0x83   : > { %1491 = vmatmul.mubr.f32.gmra.mrb[26].mxu0 %v6658_v22 }
  0x84   : > { %1495 = vmatprep.mubr.f32.mxu0 %v6660_v24  ;;  %5289 = vmatpush1.bf16.msra.mxu0 %v5288_v23  ;;  %v309_v23 = vld [vmem:[%s6340_s15 + $0xf0] sm:$0xff] }
  0x85   : > { %5290 = vmatprep.subr.bf16.mxu0 %v8523_v3  ;;  %343 = vst.msk [vmem:[#allocation2 + $0x181] sm:$0xff] %vm312_vm0, %v309_v23  ;;  %v1274_v23 = vld [vmem:[%s8518_s1 + $0x200] sm:$0xff] }
  0x87   : > { %1496 = vmatmul.mubr.f32.gmra.mrb[28].mxu0 %v6671_v28 }
  0x88   : > { %1500 = vmatprep.mubr.f32.mxu0 %v6673_v32  ;;  %5292 = vmatpush1.bf16.msra.mxu0 %v5291_v30  ;;  %v310_v30 = vld [vmem:[%s6340_s15 + $0xf8] sm:$0xff] }
  0x89   : > { %5293 = vmatprep.subr.bf16.mxu0 %v8523_v3  ;;  %344 = vst.msk [vmem:[#allocation2 + $0x189] sm:$0xff] %vm312_vm0, %v310_v30  ;;  %v1275_v30 = vld [vmem:[%s8518_s1 + $0x208] sm:$0xff] }
  0x8b   : > { %1501 = vmatmul.mubr.f32.gmra.mrb[30].mxu0 %v6684_v36 }
  0x8c   : > { %1505 = vmatprep.mubr.f32.mxu0 %v6686_v39  ;;  %5295 = vmatpush1.bf16.msra.mxu0 %v5294_v37  ;;  %v6786_v37 = vld [vmem:[#allocation2 + $0x170] sm:$0xff] }
  0x8d   : > { %5296 = vmatprep.subr.bf16.mxu0 %v8523_v3  ;;  %v473_v3 = vld [vmem:[#allocation2 + $0x2] sm:$0xff] }
  0x8f   : > { %1506 = vmatmul.mubr.f32.gmra.mrb[32].mxu0 %v6691_v42 }
  0x90   : > { %1510 = vmatprep.mubr.f32.mxu0 %v6693_v43 }
  0x93   : > { %1511 = vmatmul.mubr.f32.gmra.mrb[34].mxu0 %v6698_v45 }
  0x94   : > { %1515 = vmatprep.mubr.f32.mxu0 %v6700_v47 }
  0x97   : > { %1516 = vmatmul.mubr.f32.gmra.mrb[36].mxu0 %v6704_v48 }
  0x98   : > { %1520 = vmatprep.mubr.f32.mxu0 %v6706_v50 }
  0x9b   : > { %1521 = vmatmul.mubr.f32.gmra.mrb[38].mxu0 %v6710_v52 }
  0x9c   : > { %1525 = vmatprep.mubr.f32.mxu0 %v6712_v53 }
  0x9f   : > { %1526 = vmatmul.mubr.f32.gmra.mrb[40].mxu0 %v6716_v55 }
  0xa0   : > { %1530 = vmatprep.mubr.f32.mxu0 %v6718_v57 }
  0xa3   : > { %1531 = vmatmul.mubr.f32.gmra.mrb[42].mxu0 %v6722_v58 }
  0xa4   : > { %1535 = vmatprep.mubr.f32.mxu0 %v6724_v60 }
  0xa7   : > { %1536 = vmatmul.mubr.f32.gmra.mrb[44].mxu0 %v6728_v62 }
  0xa8   : > { %1540 = vmatprep.mubr.f32.mxu0 %v6730_v63 }
  0xab   : > { %1541 = vmatmul.mubr.f32.gmra.mrb[46].mxu0 %v6734_v1 }
  0xac   : > { %1545 = vmatprep.mubr.f32.mxu0 %v6736_v4 }
  0xaf   : > { %1546 = vmatmul.mubr.f32.gmra.mrb[48].mxu0 %v6740_v5 }
  0xb0   : > { %1550 = vmatprep.mubr.f32.mxu0 %v6742_v8 }
  0xb3   : > { %1551 = vmatmul.mubr.f32.gmra.mrb[50].mxu0 %v6746_v10 }
  0xb4   : > { %1555 = vmatprep.mubr.f32.mxu0 %v6748_v11  ;;  %v8567_v11 = vmov 0.0|0.0  }
  0xb7   : > { %1556 = vmatmul.mubr.f32.gmra.mrb[52].mxu0 %v6752_v13 }
  0xb8   : > { %1560 = vmatprep.mubr.f32.mxu0 %v6754_v15 }
  0xbb   : > { %1561 = vmatmul.mubr.f32.gmra.mrb[54].mxu0 %v6758_v16 }
  0xbc   : > { %1565 = vmatprep.mubr.f32.mxu0 %v6760_v18  ;;  %v474_v18 = vld [vmem:[#allocation2 + $0xa] sm:$0xff] }
  0xbf   : > { %1566 = vmatmul.mubr.f32.gmra.mrb[56].mxu0 %v6764_v20 }
  0xc0   : > { %1570 = vmatprep.mubr.f32.mxu0 %v6766_v21  ;;  %v1277_v21 = vld [vmem:[%s8518_s1 + $0x218] sm:$0xff] }
  0xc3   : > { %1571 = vmatmul.mubr.f32.gmra.mrb[58].mxu0 %v6772_v25 }
  0xc4   : > { %1575 = vmatprep.mubr.f32.mxu0 %v6774_v27  ;;  %v5297_v27 = vpack.c.bf16 %v1275_v30, %v1274_v23  ;;  %v1279_v23 = vld [vmem:[%s8518_s1 + $0x228] sm:$0xff]  ;;  %v6811_v30 = vld [vmem:[#allocation2 + $0x1a] sm:$0xff] }
  0xc7   : > { %1576 = vmatmul.mubr.f32.gmra.mrb[60].mxu0 %v6780_v33 }
  0xc8   : > { %1580 = vmatprep.mubr.f32.mxu0 %v6782_v34  ;;  %v1276_v34 = vld [vmem:[%s8518_s1 + $0x210] sm:$0xff] }
  0xc9   : > { %v5300_v15 = vpack.c.bf16 %v1277_v21, %v1276_v34  ;;  %v1281_v21 = vld [vmem:[%s8518_s1 + $0x238] sm:$0xff]  ;;  %v1284_v34 = vld [vmem:[%s8518_s1 + $0x250] sm:$0xff] }
  0xcb   : > { %1581 = vmatmul.mubr.f32.gmra.mrb[62].mxu0 %v6786_v37 }
  0xcc   : > { %1650 = vmatprep.mubr.f32.mxu0 %v6512_v29  ;;  %v1278_v29 = vld [vmem:[%s8518_s1 + $0x220] sm:$0xff] }
  0xcf   : > { %1651 = vmatmul.mubr.f32.vlgmr.msra.gmra.mrb[0].mxu0 %v473_v3  ;;  %v5303_v3 = vpack.c.bf16 %v1279_v23, %v1278_v29  ;;  %v1285_v29 = vld [vmem:[%s8518_s1 + $0x258] sm:$0xff] }
  0xd0   : > { %5298 = vmatpush1.bf16.msra.mxu0 %v5297_v27  ;;  %1655 = vmatprep.mubr.f32.mxu0 %v6525_v6  ;;  %v1280_v6 = vld [vmem:[%s8518_s1 + $0x230] sm:$0xff]  ;;  %v1283_v27 = vld [vmem:[%s8518_s1 + $0x248] sm:$0xff]  ;;  %v6842_v23 = vld [vmem:[#allocation2 + $0x3a] sm:$0xff] }
  0xd1   : > { %5299 = vmatprep.subr.bf16.mxu0 %v8567_v11 }
  0xd3   : > { %1656 = vmatmul.mubr.f32.gmra.mrb[2].mxu0 %v474_v18  ;;  %v6822_v18 = vld [vmem:[#allocation2 + $0x22] sm:$0xff] }
  0xd4   : > { %1660 = vmatprep.mubr.f32.mxu0 %v6538_v38  ;;  %5301 = vmatpush1.bf16.msra.mxu0 %v5300_v15  ;;  %v5306_v38 = vpack.c.bf16 %v1281_v21, %v1280_v6  ;;  %v1282_v15 = vld [vmem:[%s8518_s1 + $0x240] sm:$0xff]  ;;  %v1287_v6 = vld [vmem:[%s8518_s1 + $0x268] sm:$0xff] }
  0xd5   : > { %5302 = vmatprep.subr.bf16.mxu0 %v8567_v11  ;;  %v6853_v21 = vld [vmem:[#allocation2 + $0x4a] sm:$0xff] }
  0xd7   : > { %1661 = vmatmul.mubr.f32.gmra.mrb[4].mxu0 %v6811_v30 }
  0xd8   : > { %1665 = vmatprep.mubr.f32.mxu0 %v6554_v44  ;;  %5304 = vmatpush1.bf16.msra.mxu0 %v5303_v3  ;;  %v5309_v44 = vpack.c.bf16 %v1283_v27, %v1282_v15  ;;  %v1286_v3 = vld [vmem:[%s8518_s1 + $0x260] sm:$0xff]  ;;  %v1289_v15 = vld [vmem:[%s8518_s1 + $0x278] sm:$0xff] }
  0xd9   : > { %5305 = vmatprep.subr.bf16.mxu0 %v8567_v11  ;;  %v6864_v27 = vld [vmem:[#allocation2 + $0x52] sm:$0xff] }
  0xdb   : > { %1666 = vmatmul.mubr.f32.gmra.mrb[6].mxu0 %v6822_v18 }
  0xdc   : > { %1670 = vmatprep.mubr.f32.mxu0 %v6567_v49  ;;  %5307 = vmatpush1.bf16.msra.mxu0 %v5306_v38  ;;  %v5312_v49 = vpack.c.bf16 %v1285_v29, %v1284_v34  ;;  %v1288_v38 = vld [vmem:[%s8518_s1 + $0x270] sm:$0xff]  ;;  %v1291_v34 = vld [vmem:[%s8518_s1 + $0x288] sm:$0xff] }
  0xdd   : > { %5308 = vmatprep.subr.bf16.mxu0 %v8567_v11  ;;  %v6875_v29 = vld [vmem:[#allocation2 + $0x62] sm:$0xff] }
  0xdf   : > { %1671 = vmatmul.mubr.f32.gmra.mrb[8].mxu0 %v6540_v40 }
  0xe0   : > { %1675 = vmatprep.mubr.f32.mxu0 %v6580_v54  ;;  %5310 = vmatpush1.bf16.msra.mxu0 %v5309_v44  ;;  %v5315_v54 = vpack.c.bf16 %v1287_v6, %v1286_v3  ;;  %v1290_v44 = vld [vmem:[%s8518_s1 + $0x280] sm:$0xff]  ;;  %v1293_v3 = vld [vmem:[%s8518_s1 + $0x298] sm:$0xff]  ;;  %v6886_v6 = vld [vmem:[#allocation2 + $0x6a] sm:$0xff] }
  0xe1   : > { %5311 = vmatprep.subr.bf16.mxu0 %v8567_v11 }
  0xe3   : > { %1676 = vmatmul.mubr.f32.gmra.mrb[10].mxu0 %v6842_v23 }
  0xe4   : > { %1680 = vmatprep.mubr.f32.mxu0 %v6593_v59  ;;  %5313 = vmatpush1.bf16.msra.mxu0 %v5312_v49  ;;  %v5318_v59 = vpack.c.bf16 %v1289_v15, %v1288_v38  ;;  %v1292_v49 = vld [vmem:[%s8518_s1 + $0x290] sm:$0xff]  ;;  %v1295_v38 = vld [vmem:[%s8518_s1 + $0x2a8] sm:$0xff]  ;;  %v6897_v15 = vld [vmem:[#allocation2 + $0x7a] sm:$0xff] }
  0xe5   : > { %5314 = vmatprep.subr.bf16.mxu0 %v8567_v11 }
  0xe7   : > { %1681 = vmatmul.mubr.f32.gmra.mrb[12].mxu0 %v6853_v21 }
  0xe8   : > { %1685 = vmatprep.mubr.f32.mxu0 %v6606_v0  ;;  %5316 = vmatpush1.bf16.msra.mxu0 %v5315_v54  ;;  %v5321_v0 = vpack.c.bf16 %v1291_v34, %v1290_v44  ;;  %v1294_v54 = vld [vmem:[%s8518_s1 + $0x2a0] sm:$0xff]  ;;  %v1297_v44 = vld [vmem:[%s8518_s1 + $0x2b8] sm:$0xff] }
  0xe9   : > { %5317 = vmatprep.subr.bf16.mxu0 %v8567_v11  ;;  %v6908_v34 = vld [vmem:[#allocation2 + $0x82] sm:$0xff] }
  0xeb   : > { %1686 = vmatmul.mubr.f32.gmra.mrb[14].mxu0 %v6864_v27 }
  0xec   : > { %1690 = vmatprep.mubr.f32.mxu0 %v6619_v7  ;;  %5319 = vmatpush1.bf16.msra.mxu0 %v5318_v59  ;;  %v5324_v7 = vpack.c.bf16 %v1293_v3, %v1292_v49  ;;  %v1296_v59 = vld [vmem:[%s8518_s1 + $0x2b0] sm:$0xff]  ;;  %v1299_v49 = vld [vmem:[%s8518_s1 + $0x2c8] sm:$0xff] }
  0xed   : > { %5320 = vmatprep.subr.bf16.mxu0 %v8567_v11  ;;  %v6919_v3 = vld [vmem:[#allocation2 + $0x92] sm:$0xff] }
  0xef   : > { %1691 = vmatmul.mubr.f32.gmra.mrb[16].mxu0 %v6875_v29 }
  0xf0   : > { %1695 = vmatprep.mubr.f32.mxu0 %v6632_v12  ;;  %5322 = vmatpush1.bf16.msra.mxu0 %v5321_v0  ;;  %v5327_v12 = vpack.c.bf16 %v1295_v38, %v1294_v54  ;;  %v1298_v0 = vld [vmem:[%s8518_s1 + $0x2c0] sm:$0xff]  ;;  %v1301_v54 = vld [vmem:[%s8518_s1 + $0x2d8] sm:$0xff] }
  0xf1   : > { %5323 = vmatprep.subr.bf16.mxu0 %v8567_v11  ;;  %v6930_v38 = vld [vmem:[#allocation2 + $0x9a] sm:$0xff] }
  0xf3   : > { %1696 = vmatmul.mubr.f32.gmra.mrb[18].mxu0 %v6886_v6 }
  0xf4   : > { %1700 = vmatprep.mubr.f32.mxu0 %v6645_v17  ;;  %5325 = vmatpush1.bf16.msra.mxu0 %v5324_v7  ;;  %v5330_v17 = vpack.c.bf16 %v1297_v44, %v1296_v59  ;;  %v1300_v7 = vld [vmem:[%s8518_s1 + $0x2d0] sm:$0xff]  ;;  %v1303_v59 = vld [vmem:[%s8518_s1 + $0x2e8] sm:$0xff] }
  0xf5   : > { %5326 = vmatprep.subr.bf16.mxu0 %v8567_v11  ;;  %v6941_v44 = vld [vmem:[#allocation2 + $0xaa] sm:$0xff] }
  0xf7   : > { %1701 = vmatmul.mubr.f32.gmra.mrb[20].mxu0 %v6897_v15 }
  0xf8   : > { %1705 = vmatprep.mubr.f32.mxu0 %v6658_v22  ;;  %5328 = vmatpush1.bf16.msra.mxu0 %v5327_v12  ;;  %v5333_v22 = vpack.c.bf16 %v1299_v49, %v1298_v0  ;;  %v1302_v12 = vld [vmem:[%s8518_s1 + $0x2e0] sm:$0xff]  ;;  %v1305_v0 = vld [vmem:[%s8518_s1 + $0x2f8] sm:$0xff] }
  0xf9   : > { %5329 = vmatprep.subr.bf16.mxu0 %v8567_v11  ;;  %v6952_v49 = vld [vmem:[#allocation2 + $0xb2] sm:$0xff] }
  0xfb   : > { %1706 = vmatmul.mubr.f32.gmra.mrb[22].mxu0 %v6908_v34 }
  0xfc   : > { %1710 = vmatprep.mubr.f32.mxu0 %v6671_v28  ;;  %5331 = vmatpush1.bf16.msra.mxu0 %v5330_v17  ;;  %v5336_v28 = vpack.c.bf16 %v1301_v54, %v1300_v7  ;;  %v1304_v17 = vld [vmem:[%s8518_s1 + $0x2f0] sm:$0xff]  ;;  %v6966_v7 = vld [vmem:[#allocation2 + $0xda] sm:$0xff] }
  0xfd   : > { %5332 = vmatprep.subr.bf16.mxu0 %v8567_v11  ;;  %v6974_v54 = vld [vmem:[#allocation2 + $0xf2] sm:$0xff] }
  0xff   : > { %1711 = vmatmul.mubr.f32.gmra.mrb[24].mxu0 %v6919_v3 }
 0x100   : > { %1715 = vmatprep.mubr.f32.mxu0 %v6684_v36  ;;  %5334 = vmatpush1.bf16.msra.mxu0 %v5333_v22  ;;  %v5339_v36 = vpack.c.bf16 %v1303_v59, %v1302_v12  ;;  %v6957_v22 = vld [vmem:[#allocation2 + $0xc2] sm:$0xff]  ;;  %v1341_v12 = vld [vmem:[%s8518_s1 + $0x418] sm:$0xff] }
 0x101   : > { %5335 = vmatprep.subr.bf16.mxu0 %v8567_v11 }
 0x103   : > { %1716 = vmatmul.mubr.f32.gmra.mrb[26].mxu0 %v6930_v38 }
 0x104   : > { %1720 = vmatprep.mubr.f32.mxu0 %v6691_v42  ;;  %5337 = vmatpush1.bf16.msra.mxu0 %v5336_v28  ;;  %v5342_v42 = vpack.c.bf16 %v1305_v0, %v1304_v17  ;;  %v1343_v17 = vld [vmem:[%s8518_s1 + $0x428] sm:$0xff] }
 0x105   : > { %5338 = vmatprep.subr.bf16.mxu0 %v8567_v11 }
 0x107   : > { %1721 = vmatmul.mubr.f32.gmra.mrb[28].mxu0 %v6941_v44 }
 0x108   : > { %1725 = vmatprep.mubr.f32.mxu0 %v6698_v45  ;;  %5340 = vmatpush1.bf16.msra.mxu0 %v5339_v36  ;;  %v6962_v45 = vld [vmem:[#allocation2 + $0xca] sm:$0xff]  ;;  %v7010_v36 = vld [vmem:[#allocation2 + $0x13a] sm:$0xff] }
 0x109   : > { %5341 = vmatprep.subr.bf16.mxu0 %v8567_v11 }
 0x10b   : > { %1726 = vmatmul.mubr.f32.gmra.mrb[30].mxu0 %v6952_v49 }
 0x10c   : > { %1730 = vmatprep.mubr.f32.mxu0 %v6704_v48  ;;  %5343 = vmatpush1.bf16.msra.mxu0 %v5342_v42  ;;  %v6970_v48 = vld [vmem:[#allocation2 + $0xe2] sm:$0xff] }
 0x10d   : > { %5344 = vmatprep.subr.bf16.mxu0 %v8567_v11  ;;  %v7020_v42 = vld [vmem:[#allocation2 + $0x142] sm:$0xff] }
 0x10f   : > { %1731 = vmatmul.mubr.f32.gmra.mrb[32].mxu0 %v6957_v22 }
 0x110   : > { %1735 = vmatprep.mubr.f32.mxu0 %v6710_v52  ;;  %v6978_v52 = vld [vmem:[#allocation2 + $0xfa] sm:$0xff] }
 0x113   : > { %1736 = vmatmul.mubr.f32.gmra.mrb[34].mxu0 %v6962_v45 }
 0x114   : > { %1740 = vmatprep.mubr.f32.mxu0 %v6716_v55  ;;  %v6982_v55 = vld [vmem:[#allocation2 + $0x10a] sm:$0xff] }
 0x117   : > { %1741 = vmatmul.mubr.f32.gmra.mrb[36].mxu0 %v6966_v7 }
 0x118   : > { %1745 = vmatprep.mubr.f32.mxu0 %v6722_v58  ;;  %v6986_v58 = vld [vmem:[#allocation2 + $0x112] sm:$0xff] }
 0x11b   : > { %1746 = vmatmul.mubr.f32.gmra.mrb[38].mxu0 %v6970_v48 }
 0x11c   : > { %1750 = vmatprep.mubr.f32.mxu0 %v6728_v62  ;;  %v6990_v62 = vld [vmem:[#allocation2 + $0x122] sm:$0xff] }
 0x11f   : > { %1751 = vmatmul.mubr.f32.gmra.mrb[40].mxu0 %v6974_v54 }
 0x120   : > { %1755 = vmatprep.mubr.f32.mxu0 %v6734_v1  ;;  %v1338_v1 = vld [vmem:[%s8518_s1 + $0x400] sm:$0xff] }
 0x123   : > { %1756 = vmatmul.mubr.f32.gmra.mrb[42].mxu0 %v6978_v52 }
 0x124   : > { %1760 = vmatprep.mubr.f32.mxu0 %v6740_v5  ;;  %v1339_v5 = vld [vmem:[%s8518_s1 + $0x408] sm:$0xff] }
 0x125   : > { %v5392_v28 = vpack.c.bf16 %v1339_v5, %v1338_v1  ;;  %v1345_v1 = vld [vmem:[%s8518_s1 + $0x438] sm:$0xff] }
 0x127   : > { %1761 = vmatmul.mubr.f32.gmra.mrb[44].mxu0 %v6982_v55  ;;  %5393 = vmatprep.subr.bf16.mxu1 %v5392_v28 }
 0x128   : > { %1765 = vmatprep.mubr.f32.mxu0 %v6746_v10  ;;  %v7000_v10 = vld [vmem:[#allocation2 + $0x12a] sm:$0xff]  ;;  %5395 = vmatpush3.bf16.msra.mxu1 %v5392_v28  ;;  %v7030_v28 = vld [vmem:[#allocation2 + $0x152] sm:$0xff] }
 0x12b   : > { %1766 = vmatmul.mubr.f32.gmra.mrb[46].mxu0 %v6986_v58 }
 0x12c   : > { %1770 = vmatprep.mubr.f32.mxu0 %v6752_v13  ;;  %v1340_v13 = vld [vmem:[%s8518_s1 + $0x410] sm:$0xff] }
 0x12d   : > { %v5396_v59 = vpack.c.bf16 %v1341_v12, %v1340_v13  ;;  %v1347_v13 = vld [vmem:[%s8518_s1 + $0x448] sm:$0xff] }
 0x12f   : > { %1771 = vmatmul.mubr.f32.gmra.mrb[48].mxu0 %v6990_v62  ;;  %5397 = vmatprep.subr.bf16.mxu1 %v5396_v59 }
 0x130   : > { %1775 = vmatprep.mubr.f32.mxu0 %v6758_v16  ;;  %5399 = vmatpush3.bf16.msra.mxu1 %v5396_v59  ;;  %v1342_v16 = vld [vmem:[%s8518_s1 + $0x420] sm:$0xff] }
 0x131   : > { %v5400_v0 = vpack.c.bf16 %v1343_v17, %v1342_v16  ;;  %v7040_v59 = vld [vmem:[#allocation2 + $0x15a] sm:$0xff] }
 0x132   : > { %v1349_v16 = vld [vmem:[%s8518_s1 + $0x458] sm:$0xff]  ;;  %v7048_v17 = vld [vmem:[#allocation2 + $0x180] sm:$0xff] }
 0x133   : > { %1776 = vmatmul.mubr.f32.gmra.mrb[50].mxu0 %v7000_v10  ;;  %5401 = vmatprep.subr.bf16.mxu1 %v5400_v0 }
 0x134   : > { %1780 = vmatprep.mubr.f32.mxu0 %v6764_v20  ;;  %5403 = vmatpush3.bf16.msra.mxu1 %v5400_v0  ;;  %v1344_v20 = vld [vmem:[%s8518_s1 + $0x430] sm:$0xff] }
 0x135   : > { %v5404_v5 = vpack.c.bf16 %v1345_v1, %v1344_v20  ;;  %v1350_v20 = vld [vmem:[%s8518_s1 + $0x460] sm:$0xff]  ;;  %v1351_v1 = vld [vmem:[%s8518_s1 + $0x468] sm:$0xff] }
 0x137   : > { %1781 = vmatmul.mubr.f32.gmra.mrb[52].mxu0 %v7010_v36  ;;  %5405 = vmatprep.subr.bf16.mxu1 %v5404_v5 }
 0x138   : > { %1785 = vmatprep.mubr.f32.mxu0 %v6772_v25  ;;  %5407 = vmatpush3.bf16.msra.mxu1 %v5404_v5  ;;  %v1346_v25 = vld [vmem:[%s8518_s1 + $0x440] sm:$0xff]  ;;  %v7060_v5 = vld [vmem:[#allocation2 + $0x188] sm:$0xff] }
 0x139   : > { %v5408_v12 = vpack.c.bf16 %v1347_v13, %v1346_v25  ;;  %8568 = vst [vmem:[#allocation11_spill] sm:$0xff] %v7060_v5  ;;  %v5416_v25 = vpack.c.bf16 %v1351_v1, %v1350_v20  ;;  %v7064_v13 = vld [vmem:[#allocation2 + $0x172] sm:$0xff] }
 0x13b   : > { %1786 = vmatmul.mubr.f32.gmra.mrb[54].mxu0 %v7020_v42  ;;  %5409 = vmatprep.subr.bf16.mxu1 %v5408_v12 }
 0x13c   : > { %1790 = vmatprep.mubr.f32.mxu0 %v6780_v33  ;;  %5411 = vmatpush3.bf16.msra.mxu1 %v5408_v12  ;;  %v1348_v33 = vld [vmem:[%s8518_s1 + $0x450] sm:$0xff] }
 0x13d   : > { %v5412_v0 = vpack.c.bf16 %v1349_v16, %v1348_v33  ;;  %v1352_v12 = vld [vmem:[%s8518_s1 + $0x470] sm:$0xff]  ;;  %v1353_v33 = vld [vmem:[%s8518_s1 + $0x478] sm:$0xff]  ;;  %v1306_v16 = vld [vmem:[%s8518_s1 + $0x300] sm:$0xff] }
 0x13e   : > { %v5420_v20 = vpack.c.bf16 %v1353_v33, %v1352_v12  ;;  %v1310_v12 = vld [vmem:[%s8518_s1 + $0x320] sm:$0xff]  ;;  %v1311_v33 = vld [vmem:[%s8518_s1 + $0x328] sm:$0xff] }
 0x13f   : > { %1791 = vmatmul.mubr.f32.gmra.mrb[56].mxu0 %v7030_v28  ;;  %5413 = vmatprep.subr.bf16.mxu1 %v5412_v0 }
 0x140   : > { %1795 = vmatprep.mubr.f32.mxu0 %v6786_v37  ;;  %v7052_v37 = vld [vmem:[#allocation2 + $0x16a] sm:$0xff]  ;;  %5415 = vmatpush3.bf16.msra.mxu1 %v5412_v0 }
 0x141   : > { %5417 = vmatprep.subr.bf16.mxu1 %v5416_v25  ;;  %v1307_v0 = vld [vmem:[%s8518_s1 + $0x308] sm:$0xff] }
 0x142   : > { %v5345_v1 = vpack.c.bf16 %v1307_v0, %v1306_v16  ;;  %v1315_v16 = vld [vmem:[%s8518_s1 + $0x348] sm:$0xff]  ;;  %v1317_v0 = vld [vmem:[%s8518_s1 + $0x358] sm:$0xff] }
 0x143   : > { %1796 = vmatmul.mubr.f32.gmra.mrb[58].mxu0 %v7040_v59 }
 0x144   : > { %1800 = vmatprep.mubr.f32.mxu0 %v7048_v17  ;;  %5419 = vmatpush3.bf16.msra.mxu1 %v5416_v25  ;;  %v1308_v25 = vld [vmem:[%s8518_s1 + $0x310] sm:$0xff] }
 0x145   : > { %5421 = vmatprep.subr.bf16.mxu1 %v5420_v20 }
 0x147   : > { %1801 = vmatmul.mubr.f32.gmra.mrb[60].mxu0 %v7052_v37 }
 0x148   : > { %1805 = vmatprep.mubr.f32.mxu0 %v7060_v5  ;;  %5423 = vmatpush3.bf16.msra.mxu1 %v5420_v20  ;;  %v1309_v5 = vld [vmem:[%s8518_s1 + $0x318] sm:$0xff]  ;;  %v1319_v20 = vld [vmem:[%s8518_s1 + $0x368] sm:$0xff] }
 0x149   : > { %5424 = vmatprep.subr.bf16.mxu1 %v8567_v11 }
 0x14b   : > { %1806 = vmatmul.mubr.f32.gmra.mrb[62].mxu0 %v7064_v13  ;;  %5073 = vmatmul.mubr.f32.vlgmr.msra.gmra.mrb[0].mxu1 %v6842_v23 }
 0x14c   : > { %1875 = vmatprep.mubr.f32.mxu0 %v6811_v30  ;;  %v5348_v30 = vpack.c.bf16 %v1309_v5, %v1308_v25  ;;  %5075 = vmatprep.mubr.f32.mxu1 %v6853_v21  ;;  %v1313_v5 = vld [vmem:[%s8518_s1 + $0x338] sm:$0xff]  ;;  %v1323_v25 = vld [vmem:[%s8518_s1 + $0x388] sm:$0xff] }
 0x14f   : > { %1876 = vmatmul.mubr.f32.vlgmr.msra.gmra.mrb[0].mxu0 %v6501_v26  ;;  %5076 = vmatmul.mubr.f32.gmra.mrb[2].mxu1 %v6864_v27  ;;  %v5351_v26 = vpack.c.bf16 %v1311_v33, %v1310_v12  ;;  %v1327_v12 = vld [vmem:[%s8518_s1 + $0x3a8] sm:$0xff]  ;;  %v1329_v33 = vld [vmem:[%s8518_s1 + $0x3b8] sm:$0xff] }
 0x150   : > { %5346 = vmatpush1.bf16.msra.mxu0 %v5345_v1  ;;  %1880 = vmatprep.mubr.f32.mxu0 %v6822_v18  ;;  %v1312_v18 = vld [vmem:[%s8518_s1 + $0x330] sm:$0xff]  ;;  %v1321_v1 = vld [vmem:[%s8518_s1 + $0x378] sm:$0xff] }
 0x151   : > { %5347 = vmatprep.subr.bf16.mxu0 %v8567_v11  ;;  %5078 = vmatprep.mubr.f32.mxu1 %v6875_v29 }
 0x153   : > { %1881 = vmatmul.mubr.f32.gmra.mrb[2].mxu0 %v6514_v31  ;;  %5079 = vmatmul.mubr.f32.gmra.mrb[4].mxu1 %v6886_v6  ;;  %v5354_v31 = vpack.c.bf16 %v1313_v5, %v1312_v18  ;;  %v1333_v18 = vld [vmem:[%s8518_s1 + $0x3d8] sm:$0xff]  ;;  %v1335_v5 = vld [vmem:[%s8518_s1 + $0x3e8] sm:$0xff] }
 0x154   : > { %1885 = vmatprep.mubr.f32.mxu0 %v6540_v40  ;;  %5349 = vmatpush1.bf16.msra.mxu0 %v5348_v30  ;;  %v1314_v40 = vld [vmem:[%s8518_s1 + $0x340] sm:$0xff]  ;;  %v1325_v30 = vld [vmem:[%s8518_s1 + $0x398] sm:$0xff] }
 0x155   : > { %5350 = vmatprep.subr.bf16.mxu0 %v8567_v11  ;;  %5081 = vmatprep.mubr.f32.mxu1 %v6897_v15 }
 0x157   : > { %1886 = vmatmul.mubr.f32.gmra.mrb[4].mxu0 %v6527_v35  ;;  %5082 = vmatmul.mubr.f32.gmra.mrb[6].mxu1 %v6908_v34  ;;  %v5357_v35 = vpack.c.bf16 %v1315_v16, %v1314_v40  ;;  %v1337_v40 = vld [vmem:[%s8518_s1 + $0x3f8] sm:$0xff]  ;;  %v696_v16 = vld [vmem:[#allocation2 + $0x18a] sm:$0xff] }
 0x158   : > { %1890 = vmatprep.mubr.f32.mxu0 %v6842_v23  ;;  %5352 = vmatpush1.bf16.msra.mxu0 %v5351_v26  ;;  %v1316_v23 = vld [vmem:[%s8518_s1 + $0x350] sm:$0xff]  ;;  %v1331_v26 = vld [vmem:[%s8518_s1 + $0x3c8] sm:$0xff] }
 0x159   : > { %5353 = vmatprep.subr.bf16.mxu0 %v8567_v11  ;;  %5084 = vmatprep.mubr.f32.mxu1 %v6919_v3 }
 0x15b   : > { %1891 = vmatmul.mubr.f32.gmra.mrb[6].mxu0 %v6542_v41  ;;  %5085 = vmatmul.mubr.f32.gmra.mrb[8].mxu1 %v6930_v38  ;;  %v5360_v41 = vpack.c.bf16 %v1317_v0, %v1316_v23  ;;  %v732_v23 = vld [vmem:[#allocation2 + $0x48] sm:$0xff] }
 0x15c   : > { %1895 = vmatprep.mubr.f32.mxu0 %v6853_v21  ;;  %5355 = vmatpush1.bf16.msra.mxu0 %v5354_v31  ;;  %v1318_v21 = vld [vmem:[%s8518_s1 + $0x360] sm:$0xff]  ;;  %v1336_v31 = vld [vmem:[%s8518_s1 + $0x3f0] sm:$0xff]  ;;  %v3599_v0 = vld [vmem:[%s8520_s3 + $0x408] sm:$0xff] }
 0x15d   : > { %5356 = vmatprep.subr.bf16.mxu0 %v8567_v11  ;;  %5087 = vmatprep.mubr.f32.mxu1 %v6941_v44 }
 0x15f   : > { %1896 = vmatmul.mubr.f32.gmra.mrb[8].mxu0 %v6556_v46  ;;  %5088 = vmatmul.mubr.f32.gmra.mrb[10].mxu1 %v6952_v49  ;;  %v5363_v46 = vpack.c.bf16 %v1319_v20, %v1318_v21 }
 0x160   : > { %1900 = vmatprep.mubr.f32.mxu0 %v6864_v27  ;;  %5358 = vmatpush1.bf16.msra.mxu0 %v5357_v35  ;;  %v1320_v27 = vld [vmem:[%s8518_s1 + $0x370] sm:$0xff]  ;;  %v3598_v35 = vld [vmem:[%s8520_s3 + $0x400] sm:$0xff] }
 0x161   : > { %5359 = vmatprep.subr.bf16.mxu0 %v8567_v11  ;;  %5090 = vmatprep.mubr.f32.mxu1 %v6957_v22  ;;  %v7310_v21 = vpack.c.bf16 %v3599_v0, %v3598_v35  ;;  %v745_v35 = vld [vmem:[#allocation2 + $0xe0] sm:$0xff]  ;;  %v746_v0 = vld [vmem:[#allocation2 + $0xf0] sm:$0xff] }
 0x163   : > { %1901 = vmatmul.mubr.f32.gmra.mrb[10].mxu0 %v6569_v51  ;;  %5091 = vmatmul.mubr.f32.gmra.mrb[12].mxu1 %v6962_v45  ;;  %v5366_v51 = vpack.c.bf16 %v1321_v1, %v1320_v27  ;;  %v3479_v27 = vld [vmem:[%s8520_s3 + $0x48] sm:$0xff]  ;;  %v733_v1 = vld [vmem:[#allocation2 + $0x50] sm:$0xff] }
 0x164   : > { %1905 = vmatprep.mubr.f32.mxu0 %v6875_v29  ;;  %5361 = vmatpush1.bf16.msra.mxu0 %v5360_v41  ;;  %v1322_v29 = vld [vmem:[%s8518_s1 + $0x380] sm:$0xff]  ;;  %v797_v41 = vld [vmem:[#allocation2 + $0x51] sm:$0xff] }
 0x165   : > { %5362 = vmatprep.subr.bf16.mxu0 %v8567_v11  ;;  %5093 = vmatprep.mubr.f32.mxu1 %v6966_v7 }
 0x167   : > { %1906 = vmatmul.mubr.f32.gmra.mrb[12].mxu0 %v6582_v56  ;;  %5094 = vmatmul.mubr.f32.gmra.mrb[14].mxu1 %v6970_v48  ;;  %v5369_v56 = vpack.c.bf16 %v1323_v25, %v1322_v29  ;;  %v3480_v25 = vld [vmem:[%s8520_s3 + $0x50] sm:$0xff] }
 0x168   : > { %1910 = vmatprep.mubr.f32.mxu0 %v6886_v6  ;;  %5364 = vmatpush1.bf16.msra.mxu0 %v5363_v46  ;;  %v1324_v6 = vld [vmem:[%s8518_s1 + $0x390] sm:$0xff]  ;;  %v3478_v46 = vld [vmem:[%s8520_s3 + $0x40] sm:$0xff] }
 0x169   : > { %5365 = vmatprep.subr.bf16.mxu0 %v8567_v11  ;;  %5096 = vmatprep.mubr.f32.mxu1 %v6974_v54  ;;  %v5437_v29 = vpack.c.bf16 %v3479_v27, %v3478_v46  ;;  %v812_v46 = vld [vmem:[#allocation2 + $0x109] sm:$0xff] }
 0x16a   : > { %v748_v27 = vld [vmem:[#allocation2 + $0x108] sm:$0xff] }
 0x16b   : > { %1911 = vmatmul.mubr.f32.gmra.mrb[14].mxu0 %v6595_v61  ;;  %5097 = vmatmul.mubr.f32.gmra.mrb[16].mxu1 %v6978_v52  ;;  %v5372_v61 = vpack.c.bf16 %v1325_v30, %v1324_v6  ;;  %v734_v6 = vld [vmem:[#allocation2 + $0x60] sm:$0xff]  ;;  %v799_v30 = vld [vmem:[#allocation2 + $0x69] sm:$0xff] }
 0x16c   : > { %1915 = vmatprep.mubr.f32.mxu0 %v6897_v15  ;;  %5367 = vmatpush1.bf16.msra.mxu0 %v5366_v51  ;;  %v1326_v15 = vld [vmem:[%s8518_s1 + $0x3a0] sm:$0xff] }
 0x16d   : > { %5368 = vmatprep.subr.bf16.mxu0 %v8567_v11  ;;  %5099 = vmatprep.mubr.f32.mxu1 %v6982_v55  ;;  %v798_v51 = vld [vmem:[#allocation2 + $0x61] sm:$0xff] }
 0x16f   : > { %1916 = vmatmul.mubr.f32.gmra.mrb[16].mxu0 %v6608_v2  ;;  %5100 = vmatmul.mubr.f32.gmra.mrb[18].mxu1 %v6986_v58  ;;  %v5375_v2 = vpack.c.bf16 %v1327_v12, %v1326_v15  ;;  %v3482_v15 = vld [vmem:[%s8520_s3 + $0x60] sm:$0xff]  ;;  %v3483_v12 = vld [vmem:[%s8520_s3 + $0x68] sm:$0xff] }
 0x170   : > { %1920 = vmatprep.mubr.f32.mxu0 %v6908_v34  ;;  %5370 = vmatpush1.bf16.msra.mxu0 %v5369_v56  ;;  %v1328_v34 = vld [vmem:[%s8518_s1 + $0x3b0] sm:$0xff]  ;;  %v3481_v56 = vld [vmem:[%s8520_s3 + $0x58] sm:$0xff] }
 0x171   : > { %5371 = vmatprep.subr.bf16.mxu0 %v8567_v11  ;;  %5102 = vmatprep.mubr.f32.mxu1 %v6990_v62 }
 0x173   : > { %1921 = vmatmul.mubr.f32.gmra.mrb[18].mxu0 %v6621_v9  ;;  %5103 = vmatmul.mubr.f32.gmra.mrb[20].mxu1 %v7000_v10  ;;  %v5378_v9 = vpack.c.bf16 %v1329_v33, %v1328_v34  ;;  %v800_v34 = vld [vmem:[#allocation2 + $0x79] sm:$0xff]  ;;  %v5443_v33 = vpack.c.bf16 %v3483_v12, %v3482_v15  ;;  %v3500_v15 = vld [vmem:[%s8520_s3 + $0xf0] sm:$0xff] }
 0x174   : > { %1925 = vmatprep.mubr.f32.mxu0 %v6919_v3  ;;  %5373 = vmatpush1.bf16.msra.mxu0 %v5372_v61  ;;  %v1330_v3 = vld [vmem:[%s8518_s1 + $0x3c0] sm:$0xff]  ;;  %v5440_v61 = vpack.c.bf16 %v3481_v56, %v3480_v25  ;;  %v3499_v56 = vld [vmem:[%s8520_s3 + $0xe8] sm:$0xff]  ;;  %v3501_v12 = vld [vmem:[%s8520_s3 + $0xf8] sm:$0xff] }
 0x175   : > { %5374 = vmatprep.subr.bf16.mxu0 %v8567_v11  ;;  %5105 = vmatprep.mubr.f32.mxu1 %v7010_v36  ;;  %v3498_v25 = vld [vmem:[%s8520_s3 + $0xe0] sm:$0xff] }
 0x177   : > { %1926 = vmatmul.mubr.f32.gmra.mrb[20].mxu0 %v6634_v14  ;;  %5106 = vmatmul.mubr.f32.gmra.mrb[22].mxu1 %v7020_v42  ;;  %v5381_v14 = vpack.c.bf16 %v1331_v26, %v1330_v3  ;;  %v3485_v3 = vld [vmem:[%s8520_s3 + $0x78] sm:$0xff] }
 0x178   : > { %1930 = vmatprep.mubr.f32.mxu0 %v6930_v38  ;;  %5376 = vmatpush1.bf16.msra.mxu0 %v5375_v2  ;;  %v1332_v38 = vld [vmem:[%s8518_s1 + $0x3d0] sm:$0xff]  ;;  %v735_v2 = vld [vmem:[#allocation2 + $0x68] sm:$0xff]  ;;  %v736_v26 = vld [vmem:[#allocation2 + $0x78] sm:$0xff] }
 0x179   : > { %5377 = vmatprep.subr.bf16.mxu0 %v8567_v11  ;;  %5108 = vmatprep.mubr.f32.mxu1 %v7030_v28 }
 0x17b   : > { %1931 = vmatmul.mubr.f32.gmra.mrb[22].mxu0 %v6647_v19  ;;  %5109 = vmatmul.mubr.f32.gmra.mrb[24].mxu1 %v7040_v59  ;;  %v5384_v19 = vpack.c.bf16 %v1333_v18, %v1332_v38  ;;  %v3486_v18 = vld [vmem:[%s8520_s3 + $0x80] sm:$0xff] }
 0x17c   : > { %1935 = vmatprep.mubr.f32.mxu0 %v6941_v44  ;;  %5379 = vmatpush1.bf16.msra.mxu0 %v5378_v9  ;;  %v1334_v44 = vld [vmem:[%s8518_s1 + $0x3e0] sm:$0xff]  ;;  %v3484_v9 = vld [vmem:[%s8520_s3 + $0x70] sm:$0xff] }
 0x17d   : > { %5380 = vmatprep.subr.bf16.mxu0 %v8567_v11  ;;  %5111 = vmatprep.mubr.f32.mxu1 %v7052_v37  ;;  %v5446_v38 = vpack.c.bf16 %v3485_v3, %v3484_v9  ;;  %v751_v9 = vld [vmem:[#allocation2 + $0x128] sm:$0xff] }
 0x17f   : > { %1936 = vmatmul.mubr.f32.gmra.mrb[24].mxu0 %v6660_v24  ;;  %5112 = vmatmul.mubr.f32.gmra.mrb[26].mxu1 %v7064_v13  ;;  %v5387_v24 = vpack.c.bf16 %v1335_v5, %v1334_v44  ;;  %v737_v44 = vld [vmem:[#allocation2 + $0x80] sm:$0xff]  ;;  %v802_v5 = vld [vmem:[#allocation2 + $0x91] sm:$0xff] }
 0x180   : > { %1940 = vmatprep.mubr.f32.mxu0 %v6952_v49  ;;  %5382 = vmatpush1.bf16.msra.mxu0 %v5381_v14  ;;  %v695_v49 = vld [vmem:[#allocation2 + $0x182] sm:$0xff] }
 0x181   : > { %5383 = vmatprep.subr.bf16.mxu0 %v8567_v11  ;;  %5114 = vmatprep.mubr.f32.mxu1 %v695_v49  ;;  %v801_v14 = vld [vmem:[#allocation2 + $0x81] sm:$0xff] }
 0x183   : > { %1941 = vmatmul.mubr.f32.gmra.mrb[26].mxu0 %v6673_v32  ;;  %5115 = vmatmul.mubr.f32.gmra.mrb[28].mxu1 %v696_v16  ;;  %v5390_v32 = vpack.c.bf16 %v1337_v40, %v1336_v31  ;;  %v3489_v31 = vld [vmem:[%s8520_s3 + $0x98] sm:$0xff]  ;;  %v738_v40 = vld [vmem:[#allocation2 + $0x90] sm:$0xff] }
 0x184   : > { %1945 = vmatprep.mubr.f32.mxu0 %v6957_v22  ;;  %5385 = vmatpush1.bf16.msra.mxu0 %v5384_v19  ;;  %v794_v22 = vld [vmem:[#allocation2 + $0x31] sm:$0xff]  ;;  %v3487_v19 = vld [vmem:[%s8520_s3 + $0x88] sm:$0xff] }
 0x185   : > { %5386 = vmatprep.subr.bf16.mxu0 %v8567_v11 }
 0x187   : > { %1946 = vmatmul.mubr.f32.gmra.mrb[28].mxu0 %v6686_v39  ;;  %v8569_v39 = vld [vmem:[#allocation5_spill] sm:$0xff] }
 0x188   : > { %1950 = vmatprep.mubr.f32.mxu0 %v6962_v45  ;;  %5388 = vmatpush1.bf16.msra.mxu0 %v5387_v24  ;;  %v3470_v45 = vld [vmem:[%s8520_s3] sm:$0xff]  ;;  %8575 = vst [vmem:[#allocation5_spill] sm:$0xff] %v7310_v21  ;;  %v5449_v24 = vpack.c.bf16 %v3487_v19, %v3486_v18 }
 0x189   : > { %5389 = vmatprep.subr.bf16.mxu0 %v8567_v11  ;;  %v3602_v19 = vld [vmem:[%s8520_s3 + $0x420] sm:$0xff] }
 0x18b   : > { %1951 = vmatmul.mubr.f32.gmra.mrb[30].mxu0 %v6693_v43  ;;  %v8570_v43 = vld [vmem:[#allocation6_spill] sm:$0xff] }
 0x18c   : > { %1955 = vmatprep.mubr.f32.mxu0 %v6966_v7  ;;  %5391 = vmatpush1.bf16.msra.mxu0 %v5390_v32  ;;  %v3471_v7 = vld [vmem:[%s8520_s3 + $0x8] sm:$0xff] }
 0x18d   : > { %5617 = vmatprep.subr.bf16.mxu0 %v7310_v21 }
 0x18f   : > { %1956 = vmatmul.mubr.f32.gmra.mrb[32].mxu0 %v6700_v47  ;;  %v8571_v47 = vld [vmem:[#allocation7_spill] sm:$0xff] }
 0x190   : > { %1960 = vmatprep.mubr.f32.mxu0 %v6970_v48  ;;  %v3472_v48 = vld [vmem:[%s8520_s3 + $0x10] sm:$0xff] }
 0x193   : > { %1961 = vmatmul.mubr.f32.gmra.mrb[34].mxu0 %v6706_v50  ;;  %v8572_v50 = vld [vmem:[#allocation8_spill] sm:$0xff] }
 0x194   : > { %1965 = vmatprep.mubr.f32.mxu0 %v6974_v54  ;;  %v730_v54 = vld [vmem:[#allocation2 + $0x30] sm:$0xff] }
 0x197   : > { %1966 = vmatmul.mubr.f32.gmra.mrb[36].mxu0 %v6712_v53  ;;  %v8573_v53 = vld [vmem:[#allocation9_spill] sm:$0xff] }
 0x198   : > { %1970 = vmatprep.mubr.f32.mxu0 %v6978_v52  ;;  %v5425_v52 = vpack.c.bf16 %v3471_v7, %v3470_v45  ;;  %v3494_v7 = vld [vmem:[%s8520_s3 + $0xc0] sm:$0xff] }
 0x19a   : > { %5426 = vmatpush1.bf16.msra.mxu1 %v5425_v52  ;;  %v806_v52 = vld [vmem:[#allocation2 + $0xc1] sm:$0xff] }
 0x19b   : > { %1971 = vmatmul.mubr.f32.gmra.mrb[38].mxu0 %v6718_v57  ;;  %v8574_v57 = vld [vmem:[#allocation10_spill] sm:$0xff]  ;;  %5427 = vmatprep.subr.bf16.mxu1 %v8567_v11 }
 0x19c   : > { %1975 = vmatprep.mubr.f32.mxu0 %v6982_v55  ;;  %v3473_v55 = vld [vmem:[%s8520_s3 + $0x18] sm:$0xff] }
 0x19f   : > { %1976 = vmatmul.mubr.f32.gmra.mrb[40].mxu0 %v6724_v60  ;;  %v7272_v60 = vld [vmem:[#allocation2 + $0x181] sm:$0xff] }
 0x1a0   : > { %1980 = vmatprep.mubr.f32.mxu0 %v6986_v58  ;;  %v795_v58 = vld [vmem:[#allocation2 + $0x39] sm:$0xff] }
 0x1a3   : > { %1981 = vmatmul.mubr.f32.gmra.mrb[42].mxu0 %v6730_v63  ;;  %v888_v63 = vld [vmem:[#allocation2 + $0x19a] sm:$0xff] }
 0x1a4   : > { %1985 = vmatprep.mubr.f32.mxu0 %v6990_v62  ;;  %5117 = vmatprep.mubr.f32.mxu1 %v888_v63  ;;  %v5428_v62 = vpack.c.bf16 %v3473_v55, %v3472_v48  ;;  %v3493_v63 = vld [vmem:[%s8520_s3 + $0xb8] sm:$0xff]  ;;  %v3495_v48 = vld [vmem:[%s8520_s3 + $0xc8] sm:$0xff] }
 0x1a5   : > { %v5461_v55 = vpack.c.bf16 %v3495_v48, %v3494_v7  ;;  %v3502_v7 = vld [vmem:[%s8520_s3 + $0x100] sm:$0xff]  ;;  %v3503_v48 = vld [vmem:[%s8520_s3 + $0x108] sm:$0xff] }
 0x1a6   : > { %5429 = vmatpush1.bf16.msra.mxu1 %v5428_v62  ;;  %v3497_v62 = vld [vmem:[%s8520_s3 + $0xd8] sm:$0xff] }
 0x1a7   : > { %1986 = vmatmul.mubr.f32.gmra.mrb[44].mxu0 %v6736_v4  ;;  %v889_v4 = vld [vmem:[#allocation2 + $0x1a2] sm:$0xff]  ;;  %5430 = vmatprep.subr.bf16.mxu1 %v8567_v11 }
 0x1a8   : > { %1990 = vmatprep.mubr.f32.mxu0 %v7000_v10  ;;  %5118 = vmatmul.mubr.f32.gmra.mrb[30].mxu1 %v889_v4  ;;  %v3474_v10 = vld [vmem:[%s8520_s3 + $0x20] sm:$0xff]  ;;  %v740_v4 = vld [vmem:[#allocation2 + $0xa8] sm:$0xff] }
 0x1ab   : > { %1991 = vmatmul.mubr.f32.gmra.mrb[46].mxu0 %v6742_v8  ;;  %v7275_v8 = vld [vmem:[#allocation2 + $0x189] sm:$0xff] }
 0x1ac   : > { %1995 = vmatprep.mubr.f32.mxu0 %v7010_v36  ;;  %v3475_v36 = vld [vmem:[%s8520_s3 + $0x28] sm:$0xff] }
 0x1af   : > { %1996 = vmatmul.mubr.f32.gmra.mrb[48].mxu0 %v8569_v39  ;;  %v3490_v39 = vld [vmem:[%s8520_s3 + $0xa0] sm:$0xff] }
 0x1b0   : > { %2000 = vmatprep.mubr.f32.mxu0 %v7020_v42  ;;  %v731_v42 = vld [vmem:[#allocation2 + $0x38] sm:$0xff] }
 0x1b3   : > { %2001 = vmatmul.mubr.f32.gmra.mrb[50].mxu0 %v8570_v43  ;;  %v3491_v43 = vld [vmem:[%s8520_s3 + $0xa8] sm:$0xff] }
 0x1b4   : > { %2005 = vmatprep.mubr.f32.mxu0 %v7030_v28  ;;  %v796_v28 = vld [vmem:[#allocation2 + $0x49] sm:$0xff] }
 0x1b7   : > { %2006 = vmatmul.mubr.f32.gmra.mrb[52].mxu0 %v8571_v47  ;;  %v739_v47 = vld [vmem:[#allocation2 + $0x98] sm:$0xff] }
 0x1b8   : > { %2010 = vmatprep.mubr.f32.mxu0 %v7040_v59  ;;  %v5431_v59 = vpack.c.bf16 %v3475_v36, %v3474_v10  ;;  %v742_v10 = vld [vmem:[#allocation2 + $0xc0] sm:$0xff]  ;;  %v807_v36 = vld [vmem:[#allocation2 + $0xc9] sm:$0xff] }
 0x1ba   : > { %5432 = vmatpush1.bf16.msra.mxu1 %v5431_v59  ;;  %v808_v59 = vld [vmem:[#allocation2 + $0xd9] sm:$0xff] }
 0x1bb   : > { %2011 = vmatmul.mubr.f32.gmra.mrb[54].mxu0 %v8572_v50  ;;  %5433 = vmatprep.subr.bf16.mxu1 %v8567_v11  ;;  %v804_v50 = vld [vmem:[#allocation2 + $0xa9] sm:$0xff] }
 0x1bc   : > { %2015 = vmatprep.mubr.f32.mxu0 %v7052_v37  ;;  %v3476_v37 = vld [vmem:[%s8520_s3 + $0x30] sm:$0xff] }
 0x1bf   : > { %2016 = vmatmul.mubr.f32.gmra.mrb[56].mxu0 %v8573_v53  ;;  %v5455_v53 = vpack.c.bf16 %v3491_v43, %v3490_v39  ;;  %v753_v39 = vld [vmem:[#allocation2 + $0x140] sm:$0xff] }
 0x1c0   : > { %2020 = vmatprep.mubr.f32.mxu0 %v7064_v13  ;;  %v3477_v13 = vld [vmem:[%s8520_s3 + $0x38] sm:$0xff] }
 0x1c1   : > { %v5434_v20 = vpack.c.bf16 %v3477_v13, %v3476_v37  ;;  %v744_v37 = vld [vmem:[#allocation2 + $0xd8] sm:$0xff]  ;;  %v809_v13 = vld [vmem:[#allocation2 + $0xe1] sm:$0xff] }
 0x1c3   : > { %2021 = vmatmul.mubr.f32.gmra.mrb[58].mxu0 %v8574_v57  ;;  %5435 = vmatpush1.bf16.msra.mxu1 %v5434_v20  ;;  %v3492_v57 = vld [vmem:[%s8520_s3 + $0xb0] sm:$0xff]  ;;  %v747_v20 = vld [vmem:[#allocation2 + $0xf8] sm:$0xff] }
 0x1c4   : > { %2025 = vmatprep.mubr.f32.mxu0 %v695_v49  ;;  %5436 = vmatprep.subr.bf16.mxu1 %v8567_v11  ;;  %v3488_v49 = vld [vmem:[%s8520_s3 + $0x90] sm:$0xff]  ;;  %v5458_v45 = vpack.c.bf16 %v3493_v63, %v3492_v57  ;;  %v3606_v57 = vld [vmem:[%s8520_s3 + $0x440] sm:$0xff]  ;;  %v3607_v63 = vld [vmem:[%s8520_s3 + $0x448] sm:$0xff] }
 0x1c5   : > { %v5452_v32 = vpack.c.bf16 %v3489_v31, %v3488_v49  ;;  %v817_v49 = vld [vmem:[#allocation2 + $0x141] sm:$0xff] }
 0x1c6   : > { %v7422_v31 = vld [vmem:[#allocation2] sm:$0xff] }
 0x1c7   : > { %2026 = vmatmul.mubr.f32.gmra.mrb[60].mxu0 %v7272_v60  ;;  %5438 = vmatpush1.bf16.msra.mxu1 %v5437_v29  ;;  %v814_v29 = vld [vmem:[#allocation2 + $0x121] sm:$0xff] }
 0x1c8   : > { %2030 = vmatprep.mubr.f32.mxu0 %v696_v16  ;;  %5439 = vmatprep.subr.bf16.mxu1 %v8567_v11  ;;  %v803_v16 = vld [vmem:[#allocation2 + $0x99] sm:$0xff] }
 0x1cb   : > { %2031 = vmatmul.mubr.f32.gmra.mrb[62].mxu0 %v7275_v8  ;;  %5441 = vmatpush1.bf16.msra.mxu1 %v5440_v61  ;;  %v815_v61 = vld [vmem:[#allocation2 + $0x129] sm:$0xff] }
 0x1cc   : > { %2100 = vmatprep.mubr.f32.mxu0 %v794_v22  ;;  %5442 = vmatprep.subr.bf16.mxu1 %v8567_v11  ;;  %v805_v22 = vld [vmem:[#allocation2 + $0xb1] sm:$0xff] }
 0x1cf   : > { %2101 = vmatmul.mubr.f32.vlgmr.msra.gmra.mrb[0].mxu0 %v730_v54  ;;  %5444 = vmatpush1.bf16.msra.mxu1 %v5443_v33  ;;  %v741_v54 = vld [vmem:[#allocation2 + $0xb0] sm:$0xff]  ;;  %v5470_v33 = vpack.c.bf16 %v3501_v12, %v3500_v15  ;;  %v825_v12 = vld [vmem:[#allocation2 + $0x1a1] sm:$0xff] }
 0x1d0   : > { %2105 = vmatprep.mubr.f32.mxu0 %v795_v58  ;;  %5619 = vmatpush3.bf16.msra.mxu0 %v7310_v21  ;;  %v3496_v58 = vld [vmem:[%s8520_s3 + $0xd0] sm:$0xff] }
 0x1d1   : > { %5445 = vmatprep.subr.bf16.mxu1 %v8567_v11 }
 0x1d3   : > { %2106 = vmatmul.mubr.f32.gmra.mrb[2].mxu0 %v731_v42  ;;  %5447 = vmatpush1.bf16.msra.mxu1 %v5446_v38  ;;  %v5464_v42 = vpack.c.bf16 %v3497_v62, %v3496_v58  ;;  %v2669_v38 = vld [vmem:[#allocation3 + $0x1] sm:$0xff] }
 0x1d4   : > { %2110 = vmatprep.mubr.f32.mxu0 %v796_v28  ;;  %5448 = vmatprep.subr.bf16.mxu1 %v8567_v11  ;;  %v743_v28 = vld [vmem:[#allocation2 + $0xc8] sm:$0xff]  ;;  %v755_v58 = vld [vmem:[#allocation2 + $0x158] sm:$0xff] }
 0x1d5   : > { %3685 = vmatprep.mubr.f32.mxu1 %v2669_v38 }
 0x1d7   : > { %2111 = vmatmul.mubr.f32.gmra.mrb[4].mxu0 %v732_v23  ;;  %5450 = vmatpush1.bf16.msra.mxu1 %v5449_v24  ;;  %v810_v23 = vld [vmem:[#allocation2 + $0xf1] sm:$0xff] }
 0x1d8   : > { %2115 = vmatprep.mubr.f32.mxu0 %v797_v41  ;;  %5451 = vmatprep.subr.bf16.mxu1 %v8567_v11  ;;  %v811_v41 = vld [vmem:[#allocation2 + $0xf9] sm:$0xff] }
 0x1db   : > { %2116 = vmatmul.mubr.f32.gmra.mrb[6].mxu0 %v733_v1  ;;  %5453 = vmatpush1.bf16.msra.mxu1 %v5452_v32  ;;  %v813_v1 = vld [vmem:[#allocation2 + $0x111] sm:$0xff] }
 0x1dc   : > { %2120 = vmatprep.mubr.f32.mxu0 %v798_v51  ;;  %5454 = vmatprep.subr.bf16.mxu1 %v8567_v11  ;;  %v749_v51 = vld [vmem:[#allocation2 + $0x110] sm:$0xff]  ;;  %v3605_v32 = vld [vmem:[%s8520_s3 + $0x438] sm:$0xff] }
 0x1df   : > { %2121 = vmatmul.mubr.f32.gmra.mrb[8].mxu0 %v734_v6  ;;  %5456 = vmatpush1.bf16.msra.mxu1 %v5455_v53  ;;  %v5467_v6 = vpack.c.bf16 %v3499_v56, %v3498_v25  ;;  %v3506_v25 = vld [vmem:[%s8520_s3 + $0x120] sm:$0xff]  ;;  %v3507_v56 = vld [vmem:[%s8520_s3 + $0x128] sm:$0xff] }
 0x1e0   : > { %2125 = vmatprep.mubr.f32.mxu0 %v799_v30  ;;  %5457 = vmatprep.subr.bf16.mxu1 %v8567_v11  ;;  %v750_v30 = vld [vmem:[#allocation2 + $0x120] sm:$0xff] }
 0x1e3   : > { %2126 = vmatmul.mubr.f32.gmra.mrb[10].mxu0 %v735_v2  ;;  %5459 = vmatpush1.bf16.msra.mxu1 %v5458_v45  ;;  %v3600_v2 = vld [vmem:[%s8520_s3 + $0x410] sm:$0xff]  ;;  %v819_v45 = vld [vmem:[#allocation2 + $0x159] sm:$0xff] }
 0x1e4   : > { %2130 = vmatprep.mubr.f32.mxu0 %v800_v34  ;;  %5460 = vmatprep.subr.bf16.mxu1 %v8567_v11  ;;  %v3601_v34 = vld [vmem:[%s8520_s3 + $0x418] sm:$0xff] }
 0x1e5   : > { %v7405_v3 = vpack.c.bf16 %v3601_v34, %v3600_v2  ;;  %v3508_v2 = vld [vmem:[%s8520_s3 + $0x130] sm:$0xff] }
 0x1e7   : > { %2131 = vmatmul.mubr.f32.gmra.mrb[12].mxu0 %v736_v26  ;;  %5462 = vmatpush1.bf16.msra.mxu1 %v5461_v55  ;;  %8576 = vst [vmem:[#allocation6_spill] sm:$0xff] %v7405_v3  ;;  %v816_v26 = vld [vmem:[#allocation2 + $0x139] sm:$0xff] }
 0x1e8   : > { %2135 = vmatprep.mubr.f32.mxu0 %v801_v14  ;;  %5463 = vmatprep.subr.bf16.mxu1 %v8567_v11  ;;  %v3609_v55 = vld [vmem:[%s8520_s3 + $0x458] sm:$0xff] }
 0x1e9   : > { %5621 = vmatprep.subr.bf16.mxu0 %v7405_v3 }
 0x1ea   : > { %5623 = vmatpush3.bf16.msra.mxu0 %v7405_v3 }
 0x1eb   : > { %2136 = vmatmul.mubr.f32.gmra.mrb[14].mxu0 %v737_v44  ;;  %5465 = vmatpush1.bf16.msra.mxu1 %v5464_v42  ;;  %v3603_v44 = vld [vmem:[%s8520_s3 + $0x428] sm:$0xff] }
 0x1ec   : > { %2140 = vmatprep.mubr.f32.mxu0 %v802_v5  ;;  %5466 = vmatprep.subr.bf16.mxu1 %v8567_v11  ;;  %v752_v5 = vld [vmem:[#allocation2 + $0x138] sm:$0xff]  ;;  %v7420_v24 = vpack.c.bf16 %v3603_v44, %v3602_v19 }
 0x1ee   : > { %8577 = vst [vmem:[#allocation7_spill] sm:$0xff] %v7420_v24  ;;  %5625 = vmatprep.subr.bf16.mxu0 %v7420_v24 }
 0x1ef   : > { %2141 = vmatmul.mubr.f32.gmra.mrb[16].mxu0 %v738_v40  ;;  %5468 = vmatpush1.bf16.msra.mxu1 %v5467_v6  ;;  %v2670_v40 = vld [vmem:[#allocation3 + $0x9] sm:$0xff]  ;;  %v5479_v6 = vpack.c.bf16 %v3507_v56, %v3506_v25  ;;  %v3524_v56 = vld [vmem:[%s8520_s3 + $0x1b0] sm:$0xff] }
 0x1f0   : > { %2145 = vmatprep.mubr.f32.mxu0 %v803_v16  ;;  %5469 = vmatprep.subr.bf16.mxu1 %v8567_v11  ;;  %v3604_v16 = vld [vmem:[%s8520_s3 + $0x430] sm:$0xff] }
 0x1f1   : > { %5627 = vmatpush3.bf16.msra.mxu0 %v7420_v24  ;;  %v7433_v43 = vpack.c.bf16 %v3605_v32, %v3604_v16  ;;  %v3514_v32 = vld [vmem:[%s8520_s3 + $0x160] sm:$0xff] }
 0x1f3   : > { %2146 = vmatmul.mubr.f32.gmra.mrb[18].mxu0 %v739_v47  ;;  %5471 = vmatpush1.bf16.msra.mxu1 %v5470_v33  ;;  %8578 = vst [vmem:[#allocation8_spill] sm:$0xff] %v7433_v43  ;;  %v818_v47 = vld [vmem:[#allocation2 + $0x151] sm:$0xff] }
 0x1f4   : > { %2150 = vmatprep.mubr.f32.mxu0 %v804_v50  ;;  %5472 = vmatprep.subr.bf16.mxu1 %v8567_v11 }
 0x1f5   : > { %5629 = vmatprep.subr.bf16.mxu0 %v7433_v43 }
 0x1f6   : > { %3686 = vmatmul.mubr.f32.vlgmr.msra.gmra.mrb[32].mxu1 %v7422_v31  ;;  %5631 = vmatpush3.bf16.msra.mxu0 %v7433_v43 }
 0x1f7   : > { %2151 = vmatmul.mubr.f32.gmra.mrb[20].mxu0 %v740_v4  ;;  %3690 = vmatprep.mubr.f32.mxu1 %v2670_v40  ;;  %v754_v4 = vld [vmem:[#allocation2 + $0x150] sm:$0xff] }
 0x1f8   : > { %2155 = vmatprep.mubr.f32.mxu0 %v805_v22  ;;  %v7448_v22 = vpack.c.bf16 %v3607_v63, %v3606_v57 }
 0x1fa   : > { %3691 = vmatmul.mubr.f32.gmra.mrb[34].mxu1 %v7422_v31  ;;  %8579 = vst [vmem:[#allocation9_spill] sm:$0xff] %v7448_v22  ;;  %5633 = vmatprep.subr.bf16.mxu0 %v7448_v22 }
 0x1fb   : > { %2156 = vmatmul.mubr.f32.gmra.mrb[22].mxu0 %v741_v54  ;;  %v5473_v54 = vpack.c.bf16 %v3503_v48, %v3502_v7 }
 0x1fc   : > { %2160 = vmatprep.mubr.f32.mxu0 %v806_v52  ;;  %v3608_v52 = vld [vmem:[%s8520_s3 + $0x450] sm:$0xff]  ;;  %5635 = vmatpush3.bf16.msra.mxu0 %v7448_v22 }
 0x1fd   : > { %5474 = vmatpush1.bf16.msra.mxu1 %v5473_v54  ;;  %v7463_v62 = vpack.c.bf16 %v3609_v55, %v3608_v52  ;;  %v3518_v52 = vld [vmem:[%s8520_s3 + $0x180] sm:$0xff]  ;;  %v3519_v55 = vld [vmem:[%s8520_s3 + $0x188] sm:$0xff] }
 0x1fe   : > { %5475 = vmatprep.subr.bf16.mxu1 %v8567_v11 }
 0x1ff   : > { %2161 = vmatmul.mubr.f32.gmra.mrb[24].mxu0 %v742_v10  ;;  %8580 = vst [vmem:[#allocation10_spill] sm:$0xff] %v7463_v62  ;;  %v820_v10 = vld [vmem:[#allocation2 + $0x169] sm:$0xff]  ;;  %5637 = vmatprep.subr.bf16.mxu0 %v7463_v62 }
 0x200   : > { %2165 = vmatprep.mubr.f32.mxu0 %v807_v36  ;;  %5639 = vmatpush3.bf16.msra.mxu0 %v7463_v62 }
 0x203   : > { %2166 = vmatmul.mubr.f32.gmra.mrb[26].mxu0 %v743_v28  ;;  %v3610_v28 = vld [vmem:[%s8520_s3 + $0x460] sm:$0xff] }
 0x204   : > { %2170 = vmatprep.mubr.f32.mxu0 %v808_v59  ;;  %v3611_v59 = vld [vmem:[%s8520_s3 + $0x468] sm:$0xff] }
 0x207   : > { %2171 = vmatmul.mubr.f32.gmra.mrb[28].mxu0 %v744_v37  ;;  %v756_v37 = vld [vmem:[#allocation2 + $0x168] sm:$0xff] }
 0x208   : > { %2175 = vmatprep.mubr.f32.mxu0 %v809_v13  ;;  %v7478_v13 = vpack.c.bf16 %v3611_v59, %v3610_v28  ;;  %v3520_v59 = vld [vmem:[%s8520_s3 + $0x190] sm:$0xff] }
 0x20a   : > { %8581 = vst [vmem:[#allocation12_spill] sm:$0xff] %v7478_v13  ;;  %5641 = vmatprep.subr.bf16.mxu0 %v7478_v13 }
 0x20b   : > { %2176 = vmatmul.mubr.f32.gmra.mrb[30].mxu0 %v745_v35  ;;  %v821_v35 = vld [vmem:[#allocation2 + $0x171] sm:$0xff] }
 0x20c   : > { %2180 = vmatprep.mubr.f32.mxu0 %v810_v23  ;;  %v3504_v23 = vld [vmem:[%s8520_s3 + $0x110] sm:$0xff]  ;;  %5643 = vmatpush3.bf16.msra.mxu0 %v7478_v13 }
 0x20f   : > { %2181 = vmatmul.mubr.f32.gmra.mrb[32].mxu0 %v746_v0  ;;  %v3505_v0 = vld [vmem:[%s8520_s3 + $0x118] sm:$0xff] }
 0x210   : > { %2185 = vmatprep.mubr.f32.mxu0 %v811_v41  ;;  %v5476_v41 = vpack.c.bf16 %v3505_v0, %v3504_v23 }
 0x212   : > { %5477 = vmatpush1.bf16.msra.mxu1 %v5476_v41  ;;  %v3522_v41 = vld [vmem:[%s8520_s3 + $0x1a0] sm:$0xff] }
 0x213   : > { %2186 = vmatmul.mubr.f32.gmra.mrb[34].mxu0 %v747_v20  ;;  %v3612_v20 = vld [vmem:[%s8520_s3 + $0x470] sm:$0xff]  ;;  %5478 = vmatprep.subr.bf16.mxu1 %v8567_v11 }
 0x214   : > { %2190 = vmatprep.mubr.f32.mxu0 %v812_v46  ;;  %v3613_v46 = vld [vmem:[%s8520_s3 + $0x478] sm:$0xff] }
 0x216   : > { %5480 = vmatpush1.bf16.msra.mxu1 %v5479_v6  ;;  %v3525_v6 = vld [vmem:[%s8520_s3 + $0x1b8] sm:$0xff] }
 0x217   : > { %2191 = vmatmul.mubr.f32.gmra.mrb[36].mxu0 %v748_v27  ;;  %v757_v27 = vld [vmem:[#allocation2 + $0x170] sm:$0xff]  ;;  %5481 = vmatprep.subr.bf16.mxu1 %v8567_v11 }
 0x218   : > { %2195 = vmatprep.mubr.f32.mxu0 %v813_v1  ;;  %v7494_v1 = vpack.c.bf16 %v3613_v46, %v3612_v20  ;;  %v3523_v20 = vld [vmem:[%s8520_s3 + $0x1a8] sm:$0xff] }
 0x219   : > { %v5503_v46 = vpack.c.bf16 %v3523_v20, %v3522_v41 }
 0x21a   : > { %8582 = vst [vmem:[#allocation13_spill] sm:$0xff] %v7494_v1  ;;  %5645 = vmatprep.subr.bf16.mxu0 %v7494_v1 }
 0x21b   : > { %2196 = vmatmul.mubr.f32.gmra.mrb[38].mxu0 %v749_v51 }
 0x21c   : > { %2200 = vmatprep.mubr.f32.mxu0 %v814_v29  ;;  %5647 = vmatpush3.bf16.msra.mxu0 %v7494_v1 }
 0x21e   : > { %v7408_v14 = vpop.f32.mrb[0].mxu1 }
 0x21f   : > { %2201 = vmatmul.mubr.f32.gmra.mrb[40].mxu0 %v750_v30  ;;  %v7411_v18 = vpop.f32.mrb[1].mxu1  ;;  %v824_v30 = vld [vmem:[#allocation2 + $0x199] sm:$0xff] }
 0x220   : > { %2205 = vmatprep.mubr.f32.mxu0 %v815_v61  ;;  %v8583_v61 = vld [vmem:[#allocation11_spill] sm:$0xff] }
 0x222   : > { %v7437_v50 = vpop.f32.mrb[2].mxu1 }
 0x223   : > { %2206 = vmatmul.mubr.f32.gmra.mrb[42].mxu0 %v751_v9  ;;  %v7439_v53 = vpop.f32.mrb[3].mxu1  ;;  %v3510_v9 = vld [vmem:[%s8520_s3 + $0x140] sm:$0xff] }
 0x224   : > { %2210 = vmatprep.mubr.f32.mxu0 %v816_v26  ;;  %v3511_v26 = vld [vmem:[%s8520_s3 + $0x148] sm:$0xff] }
 0x225   : > { %v5485_v38 = vpack.c.bf16 %v3511_v26, %v3510_v9 }
 0x226   : > { %v7468_v36 = vpop.f32.mrb[4].mxu1 }
 0x227   : > { %2211 = vmatmul.mubr.f32.gmra.mrb[44].mxu0 %v752_v5  ;;  %v7470_v42 = vpop.f32.mrb[5].mxu1  ;;  %v3512_v5 = vld [vmem:[%s8520_s3 + $0x150] sm:$0xff] }
 0x228   : > { %2215 = vmatprep.mubr.f32.mxu0 %v817_v49  ;;  %v3513_v49 = vld [vmem:[%s8520_s3 + $0x158] sm:$0xff] }
 0x22a   : > { %v7499_v51 = vpop.f32.mrb[6].mxu1 }
 0x22b   : > { %2216 = vmatmul.mubr.f32.gmra.mrb[46].mxu0 %v753_v39  ;;  %v7501_v29 = vpop.f32.mrb[7].mxu1  ;;  %v3515_v39 = vld [vmem:[%s8520_s3 + $0x168] sm:$0xff] }
 0x22c   : > { %2220 = vmatprep.mubr.f32.mxu0 %v818_v47  ;;  %v5491_v47 = vpack.c.bf16 %v3515_v39, %v3514_v32  ;;  %v3530_v39 = vld [vmem:[%s8520_s3 + $0x1e0] sm:$0xff] }
 0x22f   : > { %2221 = vmatmul.mubr.f32.gmra.mrb[48].mxu0 %v754_v4  ;;  %v3516_v4 = vld [vmem:[%s8520_s3 + $0x170] sm:$0xff] }
 0x230   : > { %2225 = vmatprep.mubr.f32.mxu0 %v819_v45  ;;  %v3517_v45 = vld [vmem:[%s8520_s3 + $0x178] sm:$0xff] }
 0x231   : > { %v5494_v7 = vpack.c.bf16 %v3517_v45, %v3516_v4  ;;  %v7651_v45 = vld [vmem:[%s8519_s2] ss:$0 sm:$0xff] }
 0x233   : > { %2226 = vmatmul.mubr.f32.gmra.mrb[50].mxu0 %v755_v58  ;;  %v5497_v58 = vpack.c.bf16 %v3519_v55, %v3518_v52 }
 0x234   : > { %2230 = vmatprep.mubr.f32.mxu0 %v820_v10 }
 0x237   : > { %2231 = vmatmul.mubr.f32.gmra.mrb[52].mxu0 %v756_v37  ;;  %v3521_v37 = vld [vmem:[%s8520_s3 + $0x198] sm:$0xff] }
 0x238   : > { %2235 = vmatprep.mubr.f32.mxu0 %v821_v35  ;;  %v5500_v35 = vpack.c.bf16 %v3521_v37, %v3520_v59  ;;  %v3533_v59 = vld [vmem:[%s8520_s3 + $0x1f8] sm:$0xff] }
 0x23b   : > { %2236 = vmatmul.mubr.f32.gmra.mrb[54].mxu0 %v757_v27 }
 0x23c   : > { %2240 = vmatprep.mubr.f32.mxu0 %v7272_v60  ;;  %v7514_v60 = vpop.f32.mrb[8].mxu1 }
 0x23d   : > { %v7517_v15 = vpop.f32.mrb[9].mxu1 }
 0x23e   : > { %v7527_v34 = vpop.f32.mrb[10].mxu1 }
 0x23f   : > { %2241 = vmatmul.mubr.f32.gmra.mrb[56].mxu0 %v7048_v17  ;;  %v3509_v17 = vld [vmem:[%s8520_s3 + $0x138] sm:$0xff]  ;;  %v7530_v33 = vpop.f32.mrb[11].mxu1 }
 0x240   : > { %2245 = vmatprep.mubr.f32.mxu0 %v7275_v8  ;;  %v5482_v8 = vpack.c.bf16 %v3509_v17, %v3508_v2  ;;  %v7539_v19 = vpop.f32.mrb[12].mxu1  ;;  %v3526_v2 = vld [vmem:[%s8520_s3 + $0x1c0] sm:$0xff]  ;;  %v3527_v17 = vld [vmem:[%s8520_s3 + $0x1c8] sm:$0xff] }
 0x241   : > { %v7541_v44 = vpop.f32.mrb[13].mxu1 }
 0x242   : > { %5483 = vmatpush1.bf16.msra.mxu1 %v5482_v8  ;;  %v7550_v40 = vpop.f32.mrb[14].mxu1  ;;  %v5509_v8 = vpack.c.bf16 %v3527_v17, %v3526_v2 }
 0x243   : > { %2246 = vmatmul.mubr.f32.gmra.mrb[58].mxu0 %v8583_v61  ;;  %5484 = vmatprep.subr.bf16.mxu1 %v8567_v11  ;;  %v7552_v16 = vpop.f32.mrb[15].mxu1 }
 0x244   : > { %2250 = vmatprep.mubr.f32.mxu0 %v824_v30  ;;  %v7561_v57 = vpop.f32.mrb[16].mxu1  ;;  %v5506_v30 = vpack.c.bf16 %v3525_v6, %v3524_v56 }
 0x245   : > { %v7563_v63 = vpop.f32.mrb[17].mxu1 }
 0x246   : > { %5486 = vmatpush1.bf16.msra.mxu1 %v5485_v38  ;;  %v7572_v48 = vpop.f32.mrb[18].mxu1  ;;  %v3528_v38 = vld [vmem:[%s8520_s3 + $0x1d0] sm:$0xff] }
 0x247   : > { %2251 = vmatmul.mubr.f32.gmra.mrb[60].mxu0 %v7422_v31  ;;  %5487 = vmatprep.subr.bf16.mxu1 %v8567_v11  ;;  %v7574_v54 = vpop.f32.mrb[19].mxu1 }
 0x248   : > { %2255 = vmatprep.mubr.f32.mxu0 %v825_v12  ;;  %v7583_v10 = vpop.f32.mrb[20].mxu1 }
 0x249   : > { %v7585_v28 = vpop.f32.mrb[21].mxu1 }
 0x24a   : > { %v7594_v23 = vpop.f32.mrb[22].mxu1 }
 0x24b   : > { %2256 = vmatmul.mubr.f32.gmra.mrb[62].mxu0 %v7422_v31  ;;  %v5488_v31 = vpack.c.bf16 %v3513_v49, %v3512_v5  ;;  %v7596_v0 = vpop.f32.mrb[23].mxu1  ;;  %v3529_v5 = vld [vmem:[%s8520_s3 + $0x1d8] sm:$0xff] }
 0x24c   : > { %v5512_v49 = vpack.c.bf16 %v3529_v5, %v3528_v38 }
 0x24d   : > { %5489 = vmatpush1.bf16.msra.mxu1 %v5488_v31 }
 0x24e   : > { %5490 = vmatprep.subr.bf16.mxu1 %v8567_v11  ;;  %v7605_v27 = vpop.f32.mrb[24].mxu1 }
 0x24f   : > { %v7607_v25 = vpop.f32.mrb[25].mxu1 }
 0x251   : > { %5492 = vmatpush1.bf16.msra.mxu1 %v5491_v47  ;;  %v3531_v47 = vld [vmem:[%s8520_s3 + $0x1e8] sm:$0xff] }
 0x252   : > { %5493 = vmatprep.subr.bf16.mxu1 %v8567_v11  ;;  %v7616_v61 = vpop.f32.mrb[26].mxu1  ;;  %v5515_v4 = vpack.c.bf16 %v3531_v47, %v3530_v39 }
 0x253   : > { %v7618_v12 = vpop.f32.mrb[27].mxu1 }
 0x255   : > { %5495 = vmatpush1.bf16.msra.mxu1 %v5494_v7 }
 0x256   : > { %5496 = vmatprep.subr.bf16.mxu1 %v8567_v11  ;;  %v7627_v9 = vpop.f32.mrb[28].mxu1 }
 0x257   : > { %v7629_v26 = vpop.f32.mrb[29].mxu1 }
 0x259   : > { %5498 = vmatpush1.bf16.msra.mxu1 %v5497_v58  ;;  %v3532_v58 = vld [vmem:[%s8520_s3 + $0x1f0] sm:$0xff] }
 0x25a   : > { %5499 = vmatprep.subr.bf16.mxu1 %v8567_v11  ;;  %v5518_v37 = vpack.c.bf16 %v3533_v59, %v3532_v58 }
 0x25d   : > { %5501 = vmatpush1.bf16.msra.mxu1 %v5500_v35 }
 0x25e   : > { %5502 = vmatprep.subr.bf16.mxu1 %v8567_v11 }
 0x261   : > { %5504 = vmatpush1.bf16.msra.mxu1 %v5503_v46 }
 0x262   : > { %5505 = vmatprep.subr.bf16.mxu1 %v8567_v11 }
 0x265   : > { %5507 = vmatpush1.bf16.msra.mxu1 %v5506_v30 }
 0x266   : > { %5508 = vmatprep.subr.bf16.mxu1 %v8567_v11 }
 0x269   : > { %5510 = vmatpush1.bf16.msra.mxu1 %v5509_v8 }
 0x26a   : > { %5511 = vmatprep.subr.bf16.mxu1 %v8567_v11 }
 0x26d   : > { %5513 = vmatpush1.bf16.msra.mxu1 %v5512_v49 }
 0x26e   : > { %5514 = vmatprep.subr.bf16.mxu1 %v8567_v11 }
 0x271   : > { %5516 = vmatpush1.bf16.msra.mxu1 %v5515_v4 }
 0x272   : > { %5517 = vmatprep.subr.bf16.mxu1 %v8567_v11 }
 0x275   : > { %5519 = vmatpush1.bf16.msra.mxu1 %v5518_v37 }
 0x276   : > { %5520 = vmatprep.subr.bf16.mxu1 %v8567_v11 }
 0x27b   : > { %v7638_v31 = vpop.f32.mrb[30].mxu1 }
 0x27c   : > { %v7640_v32 = vpop.f32.mrb[31].mxu1 }
 0x2a2   : > { %v2102_v7 = vpop.f32.mrb[0].mxu0 }
 0x2a3   : > { %v5664_v52 = vadd.f32 %v7651_v45, %v2102_v7  ;;  %v2104_v55 = vpop.f32.mrb[1].mxu0 }
 0x2a5   : > { %v2328_v35 = vadd.f32 %v5664_v52, %v7411_v18 }
 0x2a6   : > { %v2107_v41 = vpop.f32.mrb[2].mxu0 }
 0x2a7   : > { %v2486_v20 = vmax.f32 %v2328_v35, 0.0  ;;  %v5665_v46 = vadd.f32 %v7651_v45, %v2107_v41  ;;  %v2109_v56 = vpop.f32.mrb[3].mxu0 }
 0x2a9   : > { %2573 = vst [vmem:[#allocation3 + $0x19] sm:$0xff] %v2486_v20  ;;  %v2333_v6 = vadd.f32 %v5665_v46, %v7408_v14  ;;  %3695 = vmatprep.mubr.f32.mxu1 %v2486_v20 }
 0x2aa   : > { %v2112_v30 = vpop.f32.mrb[4].mxu0 }
 0x2ab   : > { %v2487_v2 = vmax.f32 %v2333_v6, 0.0  ;;  %v5666_v17 = vadd.f32 %v7651_v45, %v2112_v30  ;;  %v2114_v8 = vpop.f32.mrb[5].mxu0 }
 0x2ad   : > { %2574 = vst [vmem:[#allocation3 + $0x21] sm:$0xff] %v2487_v2  ;;  %v2338_v18 = vadd.f32 %v5666_v17, %v7439_v53 }
 0x2ae   : > { %v2117_v38 = vpop.f32.mrb[6].mxu0 }
 0x2af   : > { %v2488_v5 = vmax.f32 %v2338_v18, 0.0  ;;  %v5667_v49 = vadd.f32 %v7651_v45, %v2117_v38  ;;  %v2119_v39 = vpop.f32.mrb[7].mxu0 }
 0x2b0   : > { %v7668_v47 = vld [vmem:[#allocation3 + $0x18] sm:$0xff] }
 0x2b1   : > { %2575 = vst [vmem:[#allocation3 + $0x31] sm:$0xff] %v2488_v5  ;;  %v2343_v4 = vadd.f32 %v5667_v49, %v7437_v50  ;;  %3696 = vmatmul.mubr.f32.gmra.mrb[36].mxu1 %v7668_v47 }
 0x2b2   : > { %v2122_v14 = vpop.f32.mrb[8].mxu0  ;;  %3700 = vmatprep.mubr.f32.mxu1 %v2487_v2 }
 0x2b3   : > { %v2489_v7 = vmax.f32 %v2343_v4, 0.0  ;;  %v5668_v52 = vadd.f32 %v7651_v45, %v2122_v14  ;;  %v2124_v55 = vpop.f32.mrb[9].mxu0 }
 0x2b4   : > { %v7673_v58 = vld [vmem:[#allocation3 + $0x20] sm:$0xff] }
 0x2b5   : > { %2576 = vst [vmem:[#allocation3 + $0x39] sm:$0xff] %v2489_v7  ;;  %v2348_v53 = vadd.f32 %v5668_v52, %v7470_v42  ;;  %3701 = vmatmul.mubr.f32.gmra.mrb[38].mxu1 %v7673_v58 }
 0x2b6   : > { %v2127_v59 = vpop.f32.mrb[10].mxu0  ;;  %3705 = vmatprep.mubr.f32.mxu1 %v2488_v5 }
 0x2b7   : > { %v2490_v37 = vmax.f32 %v2348_v53, 0.0  ;;  %v5669_v50 = vadd.f32 %v7651_v45, %v2127_v59  ;;  %v2129_v35 = vpop.f32.mrb[11].mxu0 }
 0x2b8   : > { %v7678_v41 = vld [vmem:[#allocation3 + $0x30] sm:$0xff] }
 0x2b9   : > { %2577 = vst [vmem:[#allocation3 + $0x49] sm:$0xff] %v2490_v37  ;;  %v2353_v20 = vadd.f32 %v5669_v50, %v7468_v36  ;;  %3706 = vmatmul.mubr.f32.gmra.mrb[40].mxu1 %v7678_v41 }
 0x2ba   : > { %v2132_v46 = vpop.f32.mrb[12].mxu0  ;;  %3710 = vmatprep.mubr.f32.mxu1 %v2489_v7 }
 0x2bb   : > { %v2491_v56 = vmax.f32 %v2353_v20, 0.0  ;;  %v5670_v42 = vadd.f32 %v7651_v45, %v2132_v46  ;;  %v2134_v6 = vpop.f32.mrb[13].mxu0 }
 0x2bc   : > { %v7683_v30 = vld [vmem:[#allocation3 + $0x32] sm:$0xff]  ;;  %v7687_v17 = vld [vmem:[#allocation3 + $0x3a] sm:$0xff] }
 0x2bd   : > { %v7685_v2 = vld [vmem:[#allocation3 + $0x38] sm:$0xff]  ;;  %2578 = vst [vmem:[#allocation3 + $0x51] sm:$0xff] %v2491_v56  ;;  %v2358_v8 = vadd.f32 %v5670_v42, %v7501_v29  ;;  %5152 = vmatprep.mubr.f32.mxu0 %v7683_v30 }
 0x2be   : > { %3711 = vmatmul.mubr.f32.gmra.mrb[42].mxu1 %v7685_v2  ;;  %v2137_v36 = vpop.f32.mrb[14].mxu0  ;;  %5153 = vmatmul.mubr.f32.vlgmr.msra.gmra.mrb[64].mxu0 %v7687_v17 }
 0x2bf   : > { %3715 = vmatprep.mubr.f32.mxu1 %v2490_v37  ;;  %v2492_v18 = vmax.f32 %v2358_v8, 0.0  ;;  %v5671_v38 = vadd.f32 %v7651_v45, %v2137_v36  ;;  %v2139_v5 = vpop.f32.mrb[15].mxu0 }
 0x2c0   : > { %v7694_v49 = vld [vmem:[#allocation3 + $0x48] sm:$0xff] }
 0x2c1   : > { %2579 = vst [vmem:[#allocation3 + $0x61] sm:$0xff] %v2492_v18  ;;  %v2363_v39 = vadd.f32 %v5671_v38, %v7499_v51 }
 0x2c2   : > { %3716 = vmatmul.mubr.f32.gmra.mrb[44].mxu1 %v7694_v49  ;;  %v2142_v29 = vpop.f32.mrb[16].mxu0 }
 0x2c3   : > { %3720 = vmatprep.mubr.f32.mxu1 %v2491_v56  ;;  %v2493_v4 = vmax.f32 %v2363_v39, 0.0  ;;  %v5672_v14 = vadd.f32 %v7651_v45, %v2142_v29  ;;  %v2144_v7 = vpop.f32.mrb[17].mxu0 }
 0x2c4   : > { %v7699_v52 = vld [vmem:[#allocation3 + $0x4a] sm:$0xff]  ;;  %v7703_v53 = vld [vmem:[#allocation3 + $0x52] sm:$0xff] }
 0x2c5   : > { %v7701_v55 = vld [vmem:[#allocation3 + $0x50] sm:$0xff]  ;;  %2580 = vst [vmem:[#allocation3 + $0x69] sm:$0xff] %v2493_v4  ;;  %v2368_v59 = vadd.f32 %v5672_v14, %v7517_v15  ;;  %5155 = vmatprep.mubr.f32.mxu0 %v7699_v52 }
 0x2c6   : > { %3721 = vmatmul.mubr.f32.gmra.mrb[46].mxu1 %v7701_v55  ;;  %v2147_v51 = vpop.f32.mrb[18].mxu0  ;;  %5156 = vmatmul.mubr.f32.gmra.mrb[66].mxu0 %v7703_v53 }
 0x2c7   : > { %3725 = vmatprep.mubr.f32.mxu1 %v2492_v18  ;;  %v2494_v37 = vmax.f32 %v2368_v59, 0.0  ;;  %v5673_v50 = vadd.f32 %v7651_v45, %v2147_v51  ;;  %v2149_v35 = vpop.f32.mrb[19].mxu0 }
 0x2c8   : > { %v7710_v20 = vld [vmem:[#allocation3 + $0x60] sm:$0xff] }
 0x2c9   : > { %2581 = vst [vmem:[#allocation3 + $0x79] sm:$0xff] %v2494_v37  ;;  %v2373_v46 = vadd.f32 %v5673_v50, %v7514_v60 }
 0x2ca   : > { %3726 = vmatmul.mubr.f32.gmra.mrb[48].mxu1 %v7710_v20  ;;  %v2152_v15 = vpop.f32.mrb[20].mxu0 }
 0x2cb   : > { %3730 = vmatprep.mubr.f32.mxu1 %v2493_v4  ;;  %v2495_v56 = vmax.f32 %v2373_v46, 0.0  ;;  %v5674_v42 = vadd.f32 %v7651_v45, %v2152_v15  ;;  %v2154_v6 = vpop.f32.mrb[21].mxu0 }
 0x2cc   : > { %v7715_v8 = vld [vmem:[#allocation3 + $0x62] sm:$0xff]  ;;  %v7719_v18 = vld [vmem:[#allocation3 + $0x6a] sm:$0xff] }
 0x2cd   : > { %v7717_v36 = vld [vmem:[#allocation3 + $0x68] sm:$0xff]  ;;  %2582 = vst [vmem:[#allocation3 + $0x81] sm:$0xff] %v2495_v56  ;;  %v2378_v38 = vadd.f32 %v5674_v42, %v7530_v33  ;;  %5158 = vmatprep.mubr.f32.mxu0 %v7715_v8 }
 0x2ce   : > { %3731 = vmatmul.mubr.f32.gmra.mrb[50].mxu1 %v7717_v36  ;;  %v2157_v60 = vpop.f32.mrb[22].mxu0  ;;  %5159 = vmatmul.mubr.f32.gmra.mrb[68].mxu0 %v7719_v18 }
 0x2cf   : > { %3735 = vmatprep.mubr.f32.mxu1 %v2494_v37  ;;  %v2496_v5 = vmax.f32 %v2378_v38, 0.0  ;;  %v5675_v39 = vadd.f32 %v7651_v45, %v2157_v60  ;;  %v2159_v29 = vpop.f32.mrb[23].mxu0 }
 0x2d0   : > { %v7726_v4 = vld [vmem:[#allocation3 + $0x78] sm:$0xff] }
 0x2d1   : > { %2583 = vst [vmem:[#allocation3 + $0x91] sm:$0xff] %v2496_v5  ;;  %v2383_v14 = vadd.f32 %v5675_v39, %v7527_v34 }
 0x2d2   : > { %3736 = vmatmul.mubr.f32.gmra.mrb[52].mxu1 %v7726_v4  ;;  %v2162_v33 = vpop.f32.mrb[24].mxu0 }
 0x2d3   : > { %3740 = vmatprep.mubr.f32.mxu1 %v2495_v56  ;;  %v2497_v7 = vmax.f32 %v2383_v14, 0.0  ;;  %v5676_v59 = vadd.f32 %v7651_v45, %v2162_v33  ;;  %v2164_v51 = vpop.f32.mrb[25].mxu0 }
 0x2d4   : > { %v7731_v50 = vld [vmem:[#allocation3 + $0x7a] sm:$0xff]  ;;  %v7735_v35 = vld [vmem:[#allocation3 + $0x82] sm:$0xff] }
 0x2d5   : > { %v7733_v37 = vld [vmem:[#allocation3 + $0x80] sm:$0xff]  ;;  %2584 = vst [vmem:[#allocation3 + $0x99] sm:$0xff] %v2497_v7  ;;  %v2388_v46 = vadd.f32 %v5676_v59, %v7541_v44  ;;  %5161 = vmatprep.mubr.f32.mxu0 %v7731_v50 }
 0x2d6   : > { %3741 = vmatmul.mubr.f32.gmra.mrb[54].mxu1 %v7733_v37  ;;  %v2167_v34 = vpop.f32.mrb[26].mxu0  ;;  %5162 = vmatmul.mubr.f32.gmra.mrb[70].mxu0 %v7735_v35 }
 0x2d7   : > { %3745 = vmatprep.mubr.f32.mxu1 %v2496_v5  ;;  %v2498_v15 = vmax.f32 %v2388_v46, 0.0  ;;  %v5677_v56 = vadd.f32 %v7651_v45, %v2167_v34  ;;  %v2169_v42 = vpop.f32.mrb[27].mxu0 }
 0x2d8   : > { %v7742_v6 = vld [vmem:[#allocation3 + $0x90] sm:$0xff] }
 0x2d9   : > { %2585 = vst [vmem:[#allocation3 + $0xa9] sm:$0xff] %v2498_v15  ;;  %v2393_v38 = vadd.f32 %v5677_v56, %v7539_v19 }
 0x2da   : > { %3746 = vmatmul.mubr.f32.gmra.mrb[56].mxu1 %v7742_v6  ;;  %v2172_v44 = vpop.f32.mrb[28].mxu0 }
 0x2db   : > { %3750 = vmatprep.mubr.f32.mxu1 %v2497_v7  ;;  %v2499_v60 = vmax.f32 %v2393_v38, 0.0  ;;  %v5678_v39 = vadd.f32 %v7651_v45, %v2172_v44  ;;  %v2174_v29 = vpop.f32.mrb[29].mxu0 }
 0x2dc   : > { %v7747_v14 = vld [vmem:[#allocation3 + $0x92] sm:$0xff]  ;;  %v7751_v33 = vld [vmem:[#allocation3 + $0x9a] sm:$0xff] }
 0x2dd   : > { %v7749_v5 = vld [vmem:[#allocation3 + $0x98] sm:$0xff]  ;;  %2586 = vst [vmem:[#allocation3 + $0xb1] sm:$0xff] %v2499_v60  ;;  %v2398_v59 = vadd.f32 %v5678_v39, %v7552_v16  ;;  %5164 = vmatprep.mubr.f32.mxu0 %v7747_v14 }
 0x2de   : > { %3751 = vmatmul.mubr.f32.gmra.mrb[58].mxu1 %v7749_v5  ;;  %v2177_v19 = vpop.f32.mrb[30].mxu0  ;;  %5165 = vmatmul.mubr.f32.gmra.mrb[72].mxu0 %v7751_v33 }
 0x2df   : > { %3755 = vmatprep.mubr.f32.mxu1 %v2498_v15  ;;  %v2500_v7 = vmax.f32 %v2398_v59, 0.0  ;;  %v5679_v51 = vadd.f32 %v7651_v45, %v2177_v19  ;;  %v2179_v46 = vpop.f32.mrb[31].mxu0 }
 0x2e0   : > { %v7758_v34 = vld [vmem:[#allocation3 + $0xa8] sm:$0xff] }
 0x2e1   : > { %2587 = vst [vmem:[#allocation3 + $0xc1] sm:$0xff] %v2500_v7  ;;  %v2403_v56 = vadd.f32 %v5679_v51, %v7550_v40 }
 0x2e2   : > { %3756 = vmatmul.mubr.f32.gmra.mrb[60].mxu1 %v7758_v34  ;;  %v2182_v16 = vpop.f32.mrb[32].mxu0 }
 0x2e3   : > { %3760 = vmatprep.mubr.f32.mxu1 %v2499_v60  ;;  %v2501_v42 = vmax.f32 %v2403_v56, 0.0  ;;  %v5680_v38 = vadd.f32 %v7651_v45, %v2182_v16  ;;  %v2184_v44 = vpop.f32.mrb[33].mxu0 }
 0x2e4   : > { %v7763_v39 = vld [vmem:[#allocation3 + $0xaa] sm:$0xff]  ;;  %v7767_v29 = vld [vmem:[#allocation3 + $0xb2] sm:$0xff] }
 0x2e5   : > { %v7765_v15 = vld [vmem:[#allocation3 + $0xb0] sm:$0xff]  ;;  %2588 = vst [vmem:[#allocation3 + $0xc9] sm:$0xff] %v2501_v42  ;;  %v2408_v59 = vadd.f32 %v5680_v38, %v7563_v63  ;;  %5167 = vmatprep.mubr.f32.mxu0 %v7763_v39 }
 0x2e6   : > { %3761 = vmatmul.mubr.f32.gmra.mrb[62].mxu1 %v7765_v15  ;;  %v2187_v40 = vpop.f32.mrb[34].mxu0  ;;  %5168 = vmatmul.mubr.f32.gmra.mrb[74].mxu0 %v7767_v29 }
 0x2e7   : > { %3765 = vmatprep.mubr.f32.mxu1 %v2500_v7  ;;  %v2502_v60 = vmax.f32 %v2408_v59, 0.0  ;;  %v5681_v19 = vadd.f32 %v7651_v45, %v2187_v40  ;;  %v2189_v51 = vpop.f32.mrb[35].mxu0 }
 0x2e8   : > { %v7774_v46 = vld [vmem:[#allocation3 + $0xc0] sm:$0xff] }
 0x2e9   : > { %2589 = vst [vmem:[#allocation3 + $0xd9] sm:$0xff] %v2502_v60  ;;  %v2413_v56 = vadd.f32 %v5681_v19, %v7561_v57 }
 0x2ea   : > { %3766 = vmatmul.mubr.f32.gmra.mrb[64].mxu1 %v7774_v46  ;;  %v2192_v63 = vpop.f32.mrb[36].mxu0 }
 0x2eb   : > { %3770 = vmatprep.mubr.f32.mxu1 %v2501_v42  ;;  %v2503_v16 = vmax.f32 %v2413_v56, 0.0  ;;  %v5682_v38 = vadd.f32 %v7651_v45, %v2192_v63  ;;  %v2194_v44 = vpop.f32.mrb[37].mxu0 }
 0x2ec   : > { %v7779_v1 = vld [vmem:[#allocation3 + $0xc2] sm:$0xff]  ;;  %v7783_v59 = vld [vmem:[#allocation3 + $0xca] sm:$0xff] }
 0x2ed   : > { %v7781_v7 = vld [vmem:[#allocation3 + $0xc8] sm:$0xff]  ;;  %2590 = vst [vmem:[#allocation3 + $0xe1] sm:$0xff] %v2503_v16  ;;  %v2418_v40 = vadd.f32 %v5682_v38, %v7574_v54  ;;  %5170 = vmatprep.mubr.f32.mxu0 %v7779_v1 }
 0x2ee   : > { %3771 = vmatmul.mubr.f32.gmra.mrb[66].mxu1 %v7781_v7  ;;  %v2197_v57 = vpop.f32.mrb[38].mxu0  ;;  %5171 = vmatmul.mubr.f32.gmra.mrb[76].mxu0 %v7783_v59 }
 0x2ef   : > { %3775 = vmatprep.mubr.f32.mxu1 %v2502_v60  ;;  %v2504_v42 = vmax.f32 %v2418_v40, 0.0  ;;  %v5683_v19 = vadd.f32 %v7651_v45, %v2197_v57  ;;  %v2199_v51 = vpop.f32.mrb[39].mxu0 }
 0x2f0   : > { %v7790_v56 = vld [vmem:[#allocation3 + $0xd8] sm:$0xff] }
 0x2f1   : > { %2591 = vst [vmem:[#allocation3 + $0xf1] sm:$0xff] %v2504_v42  ;;  %v2423_v63 = vadd.f32 %v5683_v19, %v7572_v48 }
 0x2f2   : > { %3776 = vmatmul.mubr.f32.gmra.mrb[68].mxu1 %v7790_v56  ;;  %v2202_v54 = vpop.f32.mrb[40].mxu0 }
 0x2f3   : > { %3780 = vmatprep.mubr.f32.mxu1 %v2503_v16  ;;  %v2505_v38 = vmax.f32 %v2423_v63, 0.0  ;;  %v5684_v44 = vadd.f32 %v7651_v45, %v2202_v54  ;;  %v2204_v13 = vpop.f32.mrb[41].mxu0 }
 0x2f4   : > { %v7795_v62 = vld [vmem:[#allocation3 + $0xda] sm:$0xff]  ;;  %v7799_v40 = vld [vmem:[#allocation3 + $0xe2] sm:$0xff] }
 0x2f5   : > { %v7797_v60 = vld [vmem:[#allocation3 + $0xe0] sm:$0xff]  ;;  %2592 = vst [vmem:[#allocation3 + $0xf9] sm:$0xff] %v2505_v38  ;;  %v2428_v57 = vadd.f32 %v5684_v44, %v7585_v28  ;;  %5173 = vmatprep.mubr.f32.mxu0 %v7795_v62 }
 0x2f6   : > { %3781 = vmatmul.mubr.f32.gmra.mrb[70].mxu1 %v7797_v60  ;;  %v2207_v48 = vpop.f32.mrb[42].mxu0  ;;  %5174 = vmatmul.mubr.f32.gmra.mrb[78].mxu0 %v7799_v40 }
 0x2f7   : > { %3785 = vmatprep.mubr.f32.mxu1 %v2504_v42  ;;  %v2506_v16 = vmax.f32 %v2428_v57, 0.0  ;;  %v5685_v13 = vadd.f32 %v7651_v45, %v2207_v48  ;;  %v2209_v19 = vpop.f32.mrb[43].mxu0 }
 0x2f8   : > { %v7806_v51 = vld [vmem:[#allocation3 + $0xf0] sm:$0xff] }
 0x2f9   : > { %2593 = vst [vmem:[#allocation3 + $0x109] sm:$0xff] %v2506_v16  ;;  %v2433_v63 = vadd.f32 %v5685_v13, %v7583_v10 }
 0x2fa   : > { %3786 = vmatmul.mubr.f32.gmra.mrb[72].mxu1 %v7806_v51  ;;  %v2212_v28 = vpop.f32.mrb[44].mxu0 }
 0x2fb   : > { %3790 = vmatprep.mubr.f32.mxu1 %v2505_v38  ;;  %v2507_v54 = vmax.f32 %v2433_v63, 0.0  ;;  %v5686_v44 = vadd.f32 %v7651_v45, %v2212_v28  ;;  %v2214_v22 = vpop.f32.mrb[45].mxu0 }
 0x2fc   : > { %v7811_v43 = vld [vmem:[#allocation3 + $0xf2] sm:$0xff]  ;;  %v7815_v57 = vld [vmem:[#allocation3 + $0xfa] sm:$0xff] }
 0x2fd   : > { %v7813_v42 = vld [vmem:[#allocation3 + $0xf8] sm:$0xff]  ;;  %2594 = vst [vmem:[#allocation3 + $0x111] sm:$0xff] %v2507_v54  ;;  %v2438_v48 = vadd.f32 %v5686_v44, %v7596_v0  ;;  %5176 = vmatprep.mubr.f32.mxu0 %v7811_v43 }
 0x2fe   : > { %3791 = vmatmul.mubr.f32.gmra.mrb[74].mxu1 %v7813_v42  ;;  %v2217_v10 = vpop.f32.mrb[46].mxu0  ;;  %5177 = vmatmul.mubr.f32.gmra.mrb[80].mxu0 %v7815_v57 }
 0x2ff   : > { %3795 = vmatprep.mubr.f32.mxu1 %v2506_v16  ;;  %v2508_v38 = vmax.f32 %v2438_v48, 0.0  ;;  %v5687_v22 = vadd.f32 %v7651_v45, %v2217_v10  ;;  %v2219_v13 = vpop.f32.mrb[47].mxu0 }
 0x300   : > { %v7822_v19 = vld [vmem:[#allocation3 + $0x108] sm:$0xff] }
 0x301   : > { %2595 = vst [vmem:[#allocation3 + $0x121] sm:$0xff] %v2508_v38  ;;  %v2443_v63 = vadd.f32 %v5687_v22, %v7594_v23 }
 0x302   : > { %3796 = vmatmul.mubr.f32.gmra.mrb[76].mxu1 %v7822_v19  ;;  %v2222_v0 = vpop.f32.mrb[48].mxu0 }
 0x303   : > { %3800 = vmatprep.mubr.f32.mxu1 %v2507_v54  ;;  %v2509_v28 = vmax.f32 %v2443_v63, 0.0  ;;  %v5688_v44 = vadd.f32 %v7651_v45, %v2222_v0  ;;  %v2224_v24 = vpop.f32.mrb[49].mxu0 }
 0x304   : > { %v7827_v3 = vld [vmem:[#allocation3 + $0x10a] sm:$0xff]  ;;  %v7831_v48 = vld [vmem:[#allocation3 + $0x112] sm:$0xff] }
 0x305   : > { %v7829_v16 = vld [vmem:[#allocation3 + $0x110] sm:$0xff]  ;;  %2596 = vst [vmem:[#allocation3 + $0x129] sm:$0xff] %v2509_v28  ;;  %v2448_v10 = vadd.f32 %v5688_v44, %v7607_v25  ;;  %5179 = vmatprep.mubr.f32.mxu0 %v7827_v3 }
 0x306   : > { %3801 = vmatmul.mubr.f32.gmra.mrb[78].mxu1 %v7829_v16  ;;  %v2227_v23 = vpop.f32.mrb[50].mxu0  ;;  %5180 = vmatmul.mubr.f32.gmra.mrb[82].mxu0 %v7831_v48 }
 0x307   : > { %3805 = vmatprep.mubr.f32.mxu1 %v2508_v38  ;;  %v7837_v54 = vmax.f32 %v2448_v10, 0.0  ;;  %v5689_v24 = vadd.f32 %v7651_v45, %v2227_v23  ;;  %v2229_v22 = vpop.f32.mrb[51].mxu0 }
 0x308   : > { %v7840_v13 = vld [vmem:[#allocation3 + $0x120] sm:$0xff] }
 0x309   : > { %8584 = vst [vmem:[#allocation11_spill] sm:$0xff] %v7837_v54  ;;  %2597 = vst [vmem:[#allocation3 + $0x139] sm:$0xff] %v7837_v54  ;;  %v2453_v63 = vadd.f32 %v5689_v24, %v7605_v27 }
 0x30a   : > { %3806 = vmatmul.mubr.f32.gmra.mrb[80].mxu1 %v7840_v13  ;;  %v2232_v25 = vpop.f32.mrb[52].mxu0 }
 0x30b   : > { %3810 = vmatprep.mubr.f32.mxu1 %v2509_v28  ;;  %v7845_v0 = vmax.f32 %v2453_v63, 0.0  ;;  %v5690_v44 = vadd.f32 %v7651_v45, %v2232_v25  ;;  %v2234_v38 = vpop.f32.mrb[53].mxu0 }
 0x30c   : > { %v7848_v10 = vld [vmem:[#allocation3 + $0x122] sm:$0xff]  ;;  %v7852_v23 = vld [vmem:[#allocation3 + $0x12a] sm:$0xff] }
 0x30d   : > { %8585 = vst [vmem:[#allocation14_spill] sm:$0xff] %v7845_v0  ;;  %v7850_v21 = vld [vmem:[#allocation3 + $0x128] sm:$0xff]  ;;  %8586 = vst [vmem:[#allocation15_spill] sm:$0xff] %v7852_v23  ;;  %v2458_v22 = vadd.f32 %v5690_v44, %v7618_v12  ;;  %5182 = vmatprep.mubr.f32.mxu0 %v7848_v10 }
 0x30e   : > { %2598 = vst [vmem:[#allocation3 + $0x141] sm:$0xff] %v7845_v0  ;;  %3811 = vmatmul.mubr.f32.gmra.mrb[82].mxu1 %v7850_v21  ;;  %v2237_v27 = vpop.f32.mrb[54].mxu0  ;;  %5183 = vmatmul.mubr.f32.gmra.mrb[84].mxu0 %v7852_v23 }
 0x30f   : > { %3815 = vmatprep.mubr.f32.mxu1 %v7837_v54  ;;  %v7860_v28 = vmax.f32 %v2458_v22, 0.0  ;;  %v5691_v24 = vadd.f32 %v7651_v45, %v2237_v27  ;;  %v2239_v63 = vpop.f32.mrb[55].mxu0 }
 0x310   : > { %v7863_v25 = vld [vmem:[#allocation3 + $0x138] sm:$0xff] }
 0x311   : > { %8587 = vst [vmem:[#allocation16_spill] sm:$0xff] %v7860_v28  ;;  %2599 = vst [vmem:[#allocation3 + $0x151] sm:$0xff] %v7860_v28  ;;  %v2463_v12 = vadd.f32 %v5691_v24, %v7616_v61 }
 0x312   : > { %3816 = vmatmul.mubr.f32.gmra.mrb[84].mxu1 %v7863_v25  ;;  %v2242_v44 = vpop.f32.mrb[56].mxu0 }
 0x313   : > { %3820 = vmatprep.mubr.f32.mxu1 %v7845_v0  ;;  %v7869_v38 = vmax.f32 %v2463_v12, 0.0  ;;  %v5692_v54 = vadd.f32 %v7651_v45, %v2242_v44  ;;  %v2244_v22 = vpop.f32.mrb[57].mxu0 }
 0x315   : > { %8588 = vst [vmem:[#allocation17_spill] sm:$0xff] %v7869_v38  ;;  %v7872_v23 = vld [vmem:[#allocation3 + $0x13a] sm:$0xff]  ;;  %v7876_v63 = vld [vmem:[#allocation3 + $0x142] sm:$0xff]  ;;  %2600 = vst [vmem:[#allocation3 + $0x159] sm:$0xff] %v7869_v38  ;;  %v2468_v61 = vadd.f32 %v5692_v54, %v7629_v26 }
 0x316   : > { %8589 = vst [vmem:[#allocation18_spill] sm:$0xff] %v7872_v23  ;;  %v7874_v27 = vld [vmem:[#allocation3 + $0x140] sm:$0xff]  ;;  %8590 = vst [vmem:[#allocation19_spill] sm:$0xff] %v7876_v63  ;;  %5185 = vmatprep.mubr.f32.mxu0 %v7872_v23  ;;  %v2247_v24 = vpop.f32.mrb[58].mxu0 }
 0x317   : > { %3821 = vmatmul.mubr.f32.gmra.mrb[86].mxu1 %v7874_v27  ;;  %5186 = vmatmul.mubr.f32.gmra.mrb[86].mxu0 %v7876_v63  ;;  %v7884_v12 = vmax.f32 %v2468_v61, 0.0  ;;  %v5693_v44 = vadd.f32 %v7651_v45, %v2247_v24  ;;  %v2249_v22 = vpop.f32.mrb[59].mxu0 }
 0x318   : > { %3825 = vmatprep.mubr.f32.mxu1 %v7860_v28  ;;  %v7887_v0 = vld [vmem:[#allocation3 + $0x150] sm:$0xff] }
 0x319   : > { %2601 = vst [vmem:[#allocation3 + $0x169] sm:$0xff] %v7884_v12  ;;  %v2473_v26 = vadd.f32 %v5693_v44, %v7627_v9 }
 0x31a   : > { %v2252_v54 = vpop.f32.mrb[60].mxu0 }
 0x31b   : > { %3826 = vmatmul.mubr.f32.gmra.mrb[88].mxu1 %v7887_v0  ;;  %v7893_v23 = vmax.f32 %v2473_v26, 0.0  ;;  %v5694_v28 = vadd.f32 %v7651_v45, %v2252_v54  ;;  %v2254_v61 = vpop.f32.mrb[61].mxu0 }
 0x31c   : > { %3830 = vmatprep.mubr.f32.mxu1 %v7869_v38  ;;  %v7896_v63 = vld [vmem:[#allocation3 + $0x158] sm:$0xff] }
 0x31d   : > { %2602 = vst [vmem:[#allocation3 + $0x171] sm:$0xff] %v7893_v23  ;;  %v7900_v24 = vadd.f32 %v5694_v28, %v7640_v32  ;;  %v3534_v28 = vld [vmem:[%s8520_s3 + $0x200] sm:$0xff] }
 0x31e   : > { %v2257_v9 = vpop.f32.mrb[62].mxu0 }
 0x31f   : > { %3831 = vmatmul.mubr.f32.gmra.mrb[90].mxu1 %v7896_v63  ;;  %v8558_v44 = vmax.f32 %v7900_v24, 0.0  ;;  %v5695_v22 = vadd.f32 %v7651_v45, %v2257_v9  ;;  %v2259_v26 = vpop.f32.mrb[63].mxu0  ;;  %v3535_v45 = vld [vmem:[%s8520_s3 + $0x208] sm:$0xff] }
 0x320   : > { %3835 = vmatprep.mubr.f32.mxu1 %v7884_v12  ;;  %v7906_v38 = vld [vmem:[#allocation3 + $0x168] sm:$0xff]  ;;  %v5521_v9 = vpack.c.bf16 %v3535_v45, %v3534_v28  ;;  %v3539_v28 = vld [vmem:[%s8520_s3 + $0x228] sm:$0xff] }
 0x321   : > { %2603 = vst [vmem:[#allocation3 + $0x181] sm:$0xff] %v8558_v44  ;;  %v7911_v54 = vadd.f32 %v5695_v22, %v7638_v31  ;;  %v2733_v31 = vld [vmem:[#allocation3 + $0x2] sm:$0xff]  ;;  %v2734_v44 = vld [vmem:[#allocation3 + $0xa] sm:$0xff] }
 0x322   : > { %v3536_v22 = vld [vmem:[%s8520_s3 + $0x210] sm:$0xff]  ;;  %v3537_v26 = vld [vmem:[%s8520_s3 + $0x218] sm:$0xff] }
 0x323   : > { %3836 = vmatmul.mubr.f32.gmra.mrb[92].mxu1 %v7906_v38  ;;  %v8559_v32 = vmax.f32 %v7911_v54, 0.0 }
 0x324   : > { %3840 = vmatprep.mubr.f32.mxu1 %v7893_v23  ;;  %v7922_v61 = vld [vmem:[#allocation3 + $0x170] sm:$0xff] }
 0x325   : > { %2604 = vst [vmem:[#allocation3 + $0x189] sm:$0xff] %v8559_v32  ;;  %v5524_v32 = vpack.c.bf16 %v3537_v26, %v3536_v22  ;;  %v7961_v22 = vld [vmem:[#allocation3 + $0x22] sm:$0xff] }
 0x326   : > { %v3544_v26 = vld [vmem:[%s8520_s3 + $0x250] sm:$0xff] }
 0x327   : > { %3841 = vmatmul.mubr.f32.gmra.mrb[94].mxu1 %v7922_v61 }
 0x328   : > { %3910 = vmatprep.mubr.f32.mxu1 %v7668_v47  ;;  %v3538_v47 = vld [vmem:[%s8520_s3 + $0x220] sm:$0xff] }
 0x329   : > { %v5527_v45 = vpack.c.bf16 %v3539_v28, %v3538_v47  ;;  %v3545_v47 = vld [vmem:[%s8520_s3 + $0x258] sm:$0xff] }
 0x32a   : > { %v5536_v28 = vpack.c.bf16 %v3545_v47, %v3544_v26  ;;  %v3561_v26 = vld [vmem:[%s8520_s3 + $0x2d8] sm:$0xff]  ;;  %v3563_v47 = vld [vmem:[%s8520_s3 + $0x2e8] sm:$0xff] }
 0x32b   : > { %3911 = vmatmul.mubr.f32.vlgmr.msra.gmra.mrb[32].mxu1 %v2733_v31  ;;  %v3541_v31 = vld [vmem:[%s8520_s3 + $0x238] sm:$0xff] }
 0x32c   : > { %3915 = vmatprep.mubr.f32.mxu1 %v7673_v58  ;;  %5522 = vmatpush1.bf16.msra.mxu1 %v5521_v9  ;;  %v3540_v58 = vld [vmem:[%s8520_s3 + $0x230] sm:$0xff] }
 0x32d   : > { %5523 = vmatprep.subr.bf16.mxu1 %v8567_v11  ;;  %v7950_v9 = vld [vmem:[#allocation3 + $0x1a] sm:$0xff] }
 0x32f   : > { %3916 = vmatmul.mubr.f32.gmra.mrb[34].mxu1 %v2734_v44  ;;  %v3542_v44 = vld [vmem:[%s8520_s3 + $0x240] sm:$0xff] }
 0x330   : > { %3920 = vmatprep.mubr.f32.mxu1 %v7678_v41  ;;  %5525 = vmatpush1.bf16.msra.mxu1 %v5524_v32  ;;  %v5530_v41 = vpack.c.bf16 %v3541_v31, %v3540_v58  ;;  %v3543_v32 = vld [vmem:[%s8520_s3 + $0x248] sm:$0xff]  ;;  %v3549_v58 = vld [vmem:[%s8520_s3 + $0x278] sm:$0xff] }
 0x331   : > { %5526 = vmatprep.subr.bf16.mxu1 %v8567_v11  ;;  %v3551_v31 = vld [vmem:[%s8520_s3 + $0x288] sm:$0xff] }
 0x333   : > { %3921 = vmatmul.mubr.f32.gmra.mrb[36].mxu1 %v7950_v9 }
 0x334   : > { %3925 = vmatprep.mubr.f32.mxu1 %v7685_v2  ;;  %5528 = vmatpush1.bf16.msra.mxu1 %v5527_v45  ;;  %v5533_v2 = vpack.c.bf16 %v3543_v32, %v3542_v44  ;;  %v3547_v45 = vld [vmem:[%s8520_s3 + $0x268] sm:$0xff]  ;;  %v3557_v32 = vld [vmem:[%s8520_s3 + $0x2b8] sm:$0xff] }
 0x335   : > { %5529 = vmatprep.subr.bf16.mxu1 %v8567_v11  ;;  %v3555_v44 = vld [vmem:[%s8520_s3 + $0x2a8] sm:$0xff] }
 0x337   : > { %3926 = vmatmul.mubr.f32.gmra.mrb[38].mxu1 %v7961_v22 }
 0x338   : > { %3930 = vmatprep.mubr.f32.mxu1 %v7694_v49  ;;  %5531 = vmatpush1.bf16.msra.mxu1 %v5530_v41  ;;  %v3546_v49 = vld [vmem:[%s8520_s3 + $0x260] sm:$0xff]  ;;  %v3553_v41 = vld [vmem:[%s8520_s3 + $0x298] sm:$0xff] }
 0x339   : > { %5532 = vmatprep.subr.bf16.mxu1 %v8567_v11 }
 0x33b   : > { %3931 = vmatmul.mubr.f32.gmra.mrb[40].mxu1 %v7683_v30  ;;  %v5539_v30 = vpack.c.bf16 %v3547_v45, %v3546_v49  ;;  %v2861_v49 = vld [vmem:[#allocation3 + $0x19] sm:$0xff] }
 0x33c   : > { %3935 = vmatprep.mubr.f32.mxu1 %v7701_v55  ;;  %5534 = vmatpush1.bf16.msra.mxu1 %v5533_v2  ;;  %v3548_v55 = vld [vmem:[%s8520_s3 + $0x270] sm:$0xff]  ;;  %v3559_v2 = vld [vmem:[%s8520_s3 + $0x2c8] sm:$0xff] }
 0x33d   : > { %5535 = vmatprep.subr.bf16.mxu1 %v8567_v11 }
 0x33f   : > { %3936 = vmatmul.mubr.f32.gmra.mrb[42].mxu1 %v7687_v17  ;;  %v5542_v17 = vpack.c.bf16 %v3549_v58, %v3548_v55  ;;  %v3571_v58 = vld [vmem:[%s8520_s3 + $0x328] sm:$0xff] }
 0x340   : > { %3940 = vmatprep.mubr.f32.mxu1 %v7710_v20  ;;  %5537 = vmatpush1.bf16.msra.mxu1 %v5536_v28  ;;  %v3550_v20 = vld [vmem:[%s8520_s3 + $0x280] sm:$0xff]  ;;  %v3565_v28 = vld [vmem:[%s8520_s3 + $0x2f8] sm:$0xff] }
 0x341   : > { %5538 = vmatprep.subr.bf16.mxu1 %v8567_v11 }
 0x343   : > { %3941 = vmatmul.mubr.f32.gmra.mrb[44].mxu1 %v7699_v52  ;;  %v5545_v52 = vpack.c.bf16 %v3551_v31, %v3550_v20  ;;  %v2927_v20 = vld [vmem:[#allocation3 + $0x32] sm:$0xff] }
 0x344   : > { %3945 = vmatprep.mubr.f32.mxu1 %v7717_v36  ;;  %5540 = vmatpush1.bf16.msra.mxu1 %v5539_v30  ;;  %v3552_v36 = vld [vmem:[%s8520_s3 + $0x290] sm:$0xff] }
 0x345   : > { %5541 = vmatprep.subr.bf16.mxu1 %v8567_v11 }
 0x347   : > { %3946 = vmatmul.mubr.f32.gmra.mrb[46].mxu1 %v7703_v53  ;;  %v5548_v53 = vpack.c.bf16 %v3553_v41, %v3552_v36  ;;  %v8155_v36 = vld [vmem:[#allocation3 + $0x31] sm:$0xff] }
 0x348   : > { %3950 = vmatprep.mubr.f32.mxu1 %v7726_v4  ;;  %5543 = vmatpush1.bf16.msra.mxu1 %v5542_v17  ;;  %v3554_v4 = vld [vmem:[%s8520_s3 + $0x2a0] sm:$0xff]  ;;  %v2862_v17 = vld [vmem:[#allocation3 + $0x21] sm:$0xff] }
 0x349   : > { %5544 = vmatprep.subr.bf16.mxu1 %v8567_v11 }
 0x34b   : > { %3951 = vmatmul.mubr.f32.gmra.mrb[48].mxu1 %v7715_v8  ;;  %v5551_v8 = vpack.c.bf16 %v3555_v44, %v3554_v4 }
 0x34c   : > { %3955 = vmatprep.mubr.f32.mxu1 %v7733_v37  ;;  %5546 = vmatpush1.bf16.msra.mxu1 %v5545_v52  ;;  %v3556_v37 = vld [vmem:[%s8520_s3 + $0x2b0] sm:$0xff]  ;;  %v3573_v52 = vld [vmem:[%s8520_s3 + $0x338] sm:$0xff] }
 0x34d   : > { %5547 = vmatprep.subr.bf16.mxu1 %v8567_v11 }
 0x34f   : > { %3956 = vmatmul.mubr.f32.gmra.mrb[50].mxu1 %v7719_v18  ;;  %v5554_v18 = vpack.c.bf16 %v3557_v32, %v3556_v37  ;;  %v3575_v37 = vld [vmem:[%s8520_s3 + $0x348] sm:$0xff] }
 0x350   : > { %3960 = vmatprep.mubr.f32.mxu1 %v7742_v6  ;;  %5549 = vmatpush1.bf16.msra.mxu1 %v5548_v53  ;;  %v3558_v6 = vld [vmem:[%s8520_s3 + $0x2c0] sm:$0xff]  ;;  %v2928_v53 = vld [vmem:[#allocation3 + $0x3a] sm:$0xff] }
 0x351   : > { %5550 = vmatprep.subr.bf16.mxu1 %v8567_v11  ;;  %v8169_v32 = vld [vmem:[#allocation3 + $0x39] sm:$0xff] }
 0x353   : > { %3961 = vmatmul.mubr.f32.gmra.mrb[52].mxu1 %v7731_v50  ;;  %v5557_v50 = vpack.c.bf16 %v3559_v2, %v3558_v6  ;;  %v3576_v2 = vld [vmem:[%s8520_s3 + $0x350] sm:$0xff] }
 0x354   : > { %3965 = vmatprep.mubr.f32.mxu1 %v7749_v5  ;;  %5552 = vmatpush1.bf16.msra.mxu1 %v5551_v8  ;;  %v3560_v5 = vld [vmem:[%s8520_s3 + $0x2d0] sm:$0xff]  ;;  %v3574_v8 = vld [vmem:[%s8520_s3 + $0x340] sm:$0xff] }
 0x355   : > { %5553 = vmatprep.subr.bf16.mxu1 %v8567_v11  ;;  %v5581_v6 = vpack.c.bf16 %v3575_v37, %v3574_v8  ;;  %v2934_v37 = vld [vmem:[#allocation3 + $0x82] sm:$0xff] }
 0x357   : > { %3966 = vmatmul.mubr.f32.gmra.mrb[54].mxu1 %v7735_v35  ;;  %v5560_v35 = vpack.c.bf16 %v3561_v26, %v3560_v5  ;;  %v8179_v5 = vld [vmem:[#allocation3 + $0x49] sm:$0xff] }
 0x358   : > { %3970 = vmatprep.mubr.f32.mxu1 %v7758_v34  ;;  %5555 = vmatpush1.bf16.msra.mxu1 %v5554_v18  ;;  %v3562_v34 = vld [vmem:[%s8520_s3 + $0x2e0] sm:$0xff] }
 0x359   : > { %5556 = vmatprep.subr.bf16.mxu1 %v8567_v11  ;;  %v2929_v18 = vld [vmem:[#allocation3 + $0x4a] sm:$0xff] }
 0x35b   : > { %3971 = vmatmul.mubr.f32.gmra.mrb[56].mxu1 %v7747_v14  ;;  %v5563_v14 = vpack.c.bf16 %v3563_v47, %v3562_v34 }
 0x35c   : > { %3975 = vmatprep.mubr.f32.mxu1 %v7765_v15  ;;  %5558 = vmatpush1.bf16.msra.mxu1 %v5557_v50  ;;  %v3564_v15 = vld [vmem:[%s8520_s3 + $0x2f0] sm:$0xff]  ;;  %v3577_v50 = vld [vmem:[%s8520_s3 + $0x358] sm:$0xff] }
 0x35d   : > { %5559 = vmatprep.subr.bf16.mxu1 %v8567_v11  ;;  %v5584_v47 = vpack.c.bf16 %v3577_v50, %v3576_v2  ;;  %v3586_v2 = vld [vmem:[%s8520_s3 + $0x3a0] sm:$0xff]  ;;  %v3587_v50 = vld [vmem:[%s8520_s3 + $0x3a8] sm:$0xff] }
 0x35f   : > { %3976 = vmatmul.mubr.f32.gmra.mrb[58].mxu1 %v7751_v33  ;;  %v5566_v33 = vpack.c.bf16 %v3565_v28, %v3564_v15  ;;  %v3579_v15 = vld [vmem:[%s8520_s3 + $0x368] sm:$0xff] }
 0x360   : > { %3980 = vmatprep.mubr.f32.mxu1 %v7774_v46  ;;  %5561 = vmatpush1.bf16.msra.mxu1 %v5560_v35  ;;  %v2930_v35 = vld [vmem:[#allocation3 + $0x52] sm:$0xff] }
 0x361   : > { %5562 = vmatprep.subr.bf16.mxu1 %v8567_v11  ;;  %v8193_v28 = vld [vmem:[#allocation3 + $0x51] sm:$0xff] }
 0x363   : > { %3981 = vmatmul.mubr.f32.gmra.mrb[60].mxu1 %v7763_v39 }
 0x364   : > { %3985 = vmatprep.mubr.f32.mxu1 %v7781_v7  ;;  %5564 = vmatpush1.bf16.msra.mxu1 %v5563_v14  ;;  %v8096_v7 = vld [vmem:[#allocation3 + $0x152] sm:$0xff] }
 0x365   : > { %5565 = vmatprep.subr.bf16.mxu1 %v8567_v11  ;;  %v3578_v14 = vld [vmem:[%s8520_s3 + $0x360] sm:$0xff] }
 0x367   : > { %3986 = vmatmul.mubr.f32.gmra.mrb[62].mxu1 %v7767_v29  ;;  %v8592_v29 = vld [vmem:[#allocation18_spill] sm:$0xff] }
 0x368   : > { %3990 = vmatprep.mubr.f32.mxu1 %v7790_v56  ;;  %5567 = vmatpush1.bf16.msra.mxu1 %v5566_v33  ;;  %v2931_v33 = vld [vmem:[#allocation3 + $0x62] sm:$0xff] }
 0x369   : > { %5568 = vmatprep.subr.bf16.mxu1 %v8567_v11 }
 0x36b   : > { %3991 = vmatmul.mubr.f32.gmra.mrb[64].mxu1 %v7779_v1  ;;  %v8591_v1 = vld [vmem:[#allocation15_spill] sm:$0xff] }
 0x36c   : > { %3995 = vmatprep.mubr.f32.mxu1 %v7797_v60  ;;  %v8104_v60 = vld [vmem:[#allocation3 + $0x15a] sm:$0xff] }
 0x36f   : > { %3996 = vmatmul.mubr.f32.gmra.mrb[66].mxu1 %v7783_v59 }
 0x370   : > { %4000 = vmatprep.mubr.f32.mxu1 %v7806_v51  ;;  %v8107_v51 = vld [vmem:[#allocation3 + $0x180] sm:$0xff] }
 0x373   : > { %4001 = vmatmul.mubr.f32.gmra.mrb[68].mxu1 %v7795_v62 }
 0x374   : > { %4005 = vmatprep.mubr.f32.mxu1 %v7813_v42  ;;  %v8110_v42 = vld [vmem:[#allocation3 + $0x16a] sm:$0xff] }
 0x377   : > { %4006 = vmatmul.mubr.f32.gmra.mrb[70].mxu1 %v7799_v40 }
 0x378   : > { %4010 = vmatprep.mubr.f32.mxu1 %v7822_v19 }
 0x37b   : > { %4011 = vmatmul.mubr.f32.gmra.mrb[72].mxu1 %v7811_v43 }
 0x37c   : > { %4015 = vmatprep.mubr.f32.mxu1 %v7829_v16  ;;  %v8115_v16 = vld [vmem:[#allocation3 + $0x188] sm:$0xff] }
 0x37f   : > { %4016 = vmatmul.mubr.f32.gmra.mrb[74].mxu1 %v7815_v57 }
 0x380   : > { %4020 = vmatprep.mubr.f32.mxu1 %v7840_v13 }
 0x383   : > { %4021 = vmatmul.mubr.f32.gmra.mrb[76].mxu1 %v7827_v3 }
 0x384   : > { %4025 = vmatprep.mubr.f32.mxu1 %v7850_v21  ;;  %v8593_v21 = vld [vmem:[#allocation19_spill] sm:$0xff] }
 0x387   : > { %4026 = vmatmul.mubr.f32.gmra.mrb[78].mxu1 %v7831_v48 }
 0x388   : > { %4030 = vmatprep.mubr.f32.mxu1 %v7863_v25  ;;  %v3567_v25 = vld [vmem:[%s8520_s3 + $0x308] sm:$0xff] }
 0x38b   : > { %4031 = vmatmul.mubr.f32.gmra.mrb[80].mxu1 %v7848_v10 }
 0x38c   : > { %4035 = vmatprep.mubr.f32.mxu1 %v7874_v27 }
 0x38f   : > { %4036 = vmatmul.mubr.f32.gmra.mrb[82].mxu1 %v8591_v1 }
 0x390   : > { %4040 = vmatprep.mubr.f32.mxu1 %v7887_v0  ;;  %v3566_v0 = vld [vmem:[%s8520_s3 + $0x300] sm:$0xff] }
 0x391   : > { %v8088_v39 = vpop.f32.mrb[64].mxu0  ;;  %v5569_v27 = vpack.c.bf16 %v3567_v25, %v3566_v0  ;;  %v5587_v0 = vpack.c.bf16 %v3579_v15, %v3578_v14  ;;  %v3580_v25 = vld [vmem:[%s8520_s3 + $0x370] sm:$0xff]  ;;  %v5599_v14 = vpack.c.bf16 %v3587_v50, %v3586_v2  ;;  %v2938_v50 = vld [vmem:[#allocation3 + $0xb2] sm:$0xff] }
 0x392   : > { %v8091_v46 = vpop.f32.mrb[65].mxu0  ;;  %v3588_v15 = vld [vmem:[%s8520_s3 + $0x3b0] sm:$0xff] }
 0x393   : > { %4041 = vmatmul.mubr.f32.gmra.mrb[84].mxu1 %v8592_v29 }
 0x394   : > { %4045 = vmatprep.mubr.f32.mxu1 %v7896_v63  ;;  %v3568_v63 = vld [vmem:[%s8520_s3 + $0x310] sm:$0xff] }
 0x397   : > { %4046 = vmatmul.mubr.f32.gmra.mrb[86].mxu1 %v8593_v21 }
 0x398   : > { %4050 = vmatprep.mubr.f32.mxu1 %v7906_v38  ;;  %v8126_v38 = vld [vmem:[#allocation3 + $0x172] sm:$0xff] }
 0x399   : > { %v8098_v59 = vpop.f32.mrb[66].mxu0 }
 0x39a   : > { %v8101_v56 = vpop.f32.mrb[67].mxu0 }
 0x39b   : > { %4051 = vmatmul.mubr.f32.gmra.mrb[88].mxu1 %v8096_v7 }
 0x39c   : > { %4055 = vmatprep.mubr.f32.mxu1 %v7922_v61  ;;  %v3569_v61 = vld [vmem:[%s8520_s3 + $0x318] sm:$0xff] }
 0x39d   : > { %v5572_v55 = vpack.c.bf16 %v3569_v61, %v3568_v63  ;;  %v8203_v63 = vld [vmem:[#allocation3 + $0x61] sm:$0xff] }
 0x39f   : > { %4056 = vmatmul.mubr.f32.gmra.mrb[90].mxu1 %v8104_v60 }
 0x3a0   : > { %4060 = vmatprep.mubr.f32.mxu1 %v8107_v51 }
 0x3a1   : > { %v8112_v19 = vpop.f32.mrb[68].mxu0 }
 0x3a2   : > { %v8117_v13 = vpop.f32.mrb[69].mxu0 }
 0x3a3   : > { %4061 = vmatmul.mubr.f32.gmra.mrb[92].mxu1 %v8110_v42 }
 0x3a4   : > { %4065 = vmatprep.mubr.f32.mxu1 %v8115_v16 }
 0x3a7   : > { %4066 = vmatmul.mubr.f32.gmra.mrb[94].mxu1 %v8126_v38 }
 0x3a8   : > { %4135 = vmatprep.mubr.f32.mxu1 %v7950_v9  ;;  %v3570_v9 = vld [vmem:[%s8520_s3 + $0x320] sm:$0xff] }
 0x3a9   : > { %v8136_v45 = vpop.f32.mrb[70].mxu0  ;;  %v5575_v31 = vpack.c.bf16 %v3571_v58, %v3570_v9  ;;  %v3582_v58 = vld [vmem:[%s8520_s3 + $0x380] sm:$0xff] }
 0x3aa   : > { %v8138_v30 = vpop.f32.mrb[71].mxu0 }
 0x3ab   : > { %4136 = vmatmul.mubr.f32.vlgmr.msra.gmra.mrb[32].mxu1 %v2861_v49  ;;  %v2932_v49 = vld [vmem:[#allocation3 + $0x6a] sm:$0xff] }
 0x3ac   : > { %4140 = vmatprep.mubr.f32.mxu1 %v7961_v22  ;;  %5570 = vmatpush1.bf16.msra.mxu1 %v5569_v27  ;;  %v3572_v22 = vld [vmem:[%s8520_s3 + $0x330] sm:$0xff]  ;;  %v3581_v27 = vld [vmem:[%s8520_s3 + $0x378] sm:$0xff] }
 0x3ad   : > { %5571 = vmatprep.subr.bf16.mxu1 %v8567_v11  ;;  %v5578_v44 = vpack.c.bf16 %v3573_v52, %v3572_v22  ;;  %v5590_v9 = vpack.c.bf16 %v3581_v27, %v3580_v25  ;;  %v3584_v52 = vld [vmem:[%s8520_s3 + $0x390] sm:$0xff] }
 0x3ae   : > { %v2936_v27 = vld [vmem:[#allocation3 + $0x9a] sm:$0xff] }
 0x3af   : > { %4141 = vmatmul.mubr.f32.gmra.mrb[34].mxu1 %v2862_v17  ;;  %v3583_v17 = vld [vmem:[%s8520_s3 + $0x388] sm:$0xff] }
 0x3b0   : > { %4145 = vmatprep.mubr.f32.mxu1 %v2927_v20  ;;  %5573 = vmatpush1.bf16.msra.mxu1 %v5572_v55  ;;  %v8217_v20 = vld [vmem:[#allocation3 + $0x69] sm:$0xff]  ;;  %v5593_v22 = vpack.c.bf16 %v3583_v17, %v3582_v58  ;;  %v3591_v17 = vld [vmem:[%s8520_s3 + $0x3c8] sm:$0xff] }
 0x3b1   : > { %5574 = vmatprep.subr.bf16.mxu1 %v8567_v11  ;;  %v8157_v41 = vpop.f32.mrb[72].mxu0  ;;  %v3590_v58 = vld [vmem:[%s8520_s3 + $0x3c0] sm:$0xff] }
 0x3b2   : > { %v8160_v4 = vpop.f32.mrb[73].mxu0 }
 0x3b3   : > { %4146 = vmatmul.mubr.f32.gmra.mrb[36].mxu1 %v8155_v36 }
 0x3b4   : > { %4150 = vmatprep.mubr.f32.mxu1 %v2928_v53  ;;  %5576 = vmatpush1.bf16.msra.mxu1 %v5575_v31  ;;  %v2933_v31 = vld [vmem:[#allocation3 + $0x7a] sm:$0xff]  ;;  %v3585_v53 = vld [vmem:[%s8520_s3 + $0x398] sm:$0xff] }
 0x3b5   : > { %5577 = vmatprep.subr.bf16.mxu1 %v8567_v11 }
 0x3b7   : > { %4151 = vmatmul.mubr.f32.gmra.mrb[38].mxu1 %v8169_v32 }
 0x3b8   : > { %4155 = vmatprep.mubr.f32.mxu1 %v2929_v18  ;;  %5579 = vmatpush1.bf16.msra.mxu1 %v5578_v44  ;;  %v8227_v44 = vld [vmem:[#allocation3 + $0x79] sm:$0xff] }
 0x3b9   : > { %5580 = vmatprep.subr.bf16.mxu1 %v8567_v11  ;;  %v8181_v26 = vpop.f32.mrb[74].mxu0 }
 0x3ba   : > { %v8184_v34 = vpop.f32.mrb[75].mxu0 }
 0x3bb   : > { %4156 = vmatmul.mubr.f32.gmra.mrb[40].mxu1 %v8179_v5 }
 0x3bc   : > { %4160 = vmatprep.mubr.f32.mxu1 %v2930_v35  ;;  %5582 = vmatpush1.bf16.msra.mxu1 %v5581_v6  ;;  %v5596_v6 = vpack.c.bf16 %v3585_v53, %v3584_v52  ;;  %v8241_v35 = vld [vmem:[#allocation3 + $0x81] sm:$0xff]  ;;  %v5605_v52 = vpack.c.bf16 %v3591_v17, %v3590_v58 }
 0x3bd   : > { %5583 = vmatprep.subr.bf16.mxu1 %v8567_v11  ;;  %v3592_v53 = vld [vmem:[%s8520_s3 + $0x3d0] sm:$0xff] }
 0x3be   : > { %v3596_v17 = vld [vmem:[%s8520_s3 + $0x3f0] sm:$0xff] }
 0x3bf   : > { %4161 = vmatmul.mubr.f32.gmra.mrb[42].mxu1 %v8193_v28 }
 0x3c0   : > { %4165 = vmatprep.mubr.f32.mxu1 %v2931_v33  ;;  %5585 = vmatpush1.bf16.msra.mxu1 %v5584_v47  ;;  %v2935_v47 = vld [vmem:[#allocation3 + $0x92] sm:$0xff]  ;;  %v3589_v33 = vld [vmem:[%s8520_s3 + $0x3b8] sm:$0xff] }
 0x3c1   : > { %5586 = vmatprep.subr.bf16.mxu1 %v8567_v11  ;;  %v8205_v61 = vpop.f32.mrb[76].mxu0 }
 0x3c2   : > { %v8208_v55 = vpop.f32.mrb[77].mxu0 }
 0x3c3   : > { %4166 = vmatmul.mubr.f32.gmra.mrb[44].mxu1 %v8203_v63 }
 0x3c4   : > { %4170 = vmatprep.mubr.f32.mxu1 %v2932_v49  ;;  %5588 = vmatpush1.bf16.msra.mxu1 %v5587_v0  ;;  %v8251_v0 = vld [vmem:[#allocation3 + $0x91] sm:$0xff] }
 0x3c5   : > { %5589 = vmatprep.subr.bf16.mxu1 %v8567_v11 }
 0x3c7   : > { %4171 = vmatmul.mubr.f32.gmra.mrb[46].mxu1 %v8217_v20 }
 0x3c8   : > { %4175 = vmatprep.mubr.f32.mxu1 %v2933_v31  ;;  %5591 = vmatpush1.bf16.msra.mxu1 %v5590_v9  ;;  %v5602_v9 = vpack.c.bf16 %v3589_v33, %v3588_v15  ;;  %v8265_v31 = vld [vmem:[#allocation3 + $0x99] sm:$0xff]  ;;  %v3594_v15 = vld [vmem:[%s8520_s3 + $0x3e0] sm:$0xff] }
 0x3c9   : > { %5592 = vmatprep.subr.bf16.mxu1 %v8567_v11  ;;  %v8229_v8 = vpop.f32.mrb[78].mxu0  ;;  %v3595_v33 = vld [vmem:[%s8520_s3 + $0x3e8] sm:$0xff] }
 0x3ca   : > { %v8232_v18 = vpop.f32.mrb[79].mxu0  ;;  %v5611_v58 = vpack.c.bf16 %v3595_v33, %v3594_v15  ;;  %v8307_v15 = vld [vmem:[#allocation3 + $0xc9] sm:$0xff] }
 0x3cb   : > { %4176 = vmatmul.mubr.f32.gmra.mrb[48].mxu1 %v8227_v44  ;;  %v8595_v33 = vld [vmem:[#allocation5_spill] sm:$0xff] }
 0x3cc   : > { %4180 = vmatprep.mubr.f32.mxu1 %v2934_v37  ;;  %5594 = vmatpush1.bf16.msra.mxu1 %v5593_v22  ;;  %v2937_v22 = vld [vmem:[#allocation3 + $0xaa] sm:$0xff] }
 0x3cd   : > { %5595 = vmatprep.subr.bf16.mxu1 %v8567_v11  ;;  %v3593_v37 = vld [vmem:[%s8520_s3 + $0x3d8] sm:$0xff] }
 0x3cf   : > { %4181 = vmatmul.mubr.f32.gmra.mrb[50].mxu1 %v8241_v35 }
 0x3d0   : > { %4185 = vmatprep.mubr.f32.mxu1 %v2935_v47  ;;  %5597 = vmatpush1.bf16.msra.mxu1 %v5596_v6  ;;  %v8275_v6 = vld [vmem:[#allocation3 + $0xa9] sm:$0xff] }
 0x3d1   : > { %5598 = vmatprep.subr.bf16.mxu1 %v8567_v11  ;;  %v8253_v25 = vpop.f32.mrb[80].mxu0 }
 0x3d2   : > { %v8256_v49 = vpop.f32.mrb[81].mxu0 }
 0x3d3   : > { %4186 = vmatmul.mubr.f32.gmra.mrb[52].mxu1 %v8251_v0 }
 0x3d4   : > { %4190 = vmatprep.mubr.f32.mxu1 %v2936_v27  ;;  %5600 = vmatpush1.bf16.msra.mxu1 %v5599_v14  ;;  %v5608_v14 = vpack.c.bf16 %v3593_v37, %v3592_v53  ;;  %v8289_v27 = vld [vmem:[#allocation3 + $0xb1] sm:$0xff] }
 0x3d5   : > { %5601 = vmatprep.subr.bf16.mxu1 %v8567_v11  ;;  %v2940_v37 = vld [vmem:[#allocation3 + $0xca] sm:$0xff] }
 0x3d7   : > { %4191 = vmatmul.mubr.f32.gmra.mrb[54].mxu1 %v8265_v31 }
 0x3d8   : > { %4195 = vmatprep.mubr.f32.mxu1 %v2937_v22  ;;  %5603 = vmatpush1.bf16.msra.mxu1 %v5602_v9  ;;  %v2939_v9 = vld [vmem:[#allocation3 + $0xc2] sm:$0xff] }
 0x3d9   : > { %5604 = vmatprep.subr.bf16.mxu1 %v8567_v11  ;;  %v8277_v2 = vpop.f32.mrb[82].mxu0  ;;  %v3597_v22 = vld [vmem:[%s8520_s3 + $0x3f8] sm:$0xff] }
 0x3da   : > { %v8280_v47 = vpop.f32.mrb[83].mxu0 }
 0x3db   : > { %4196 = vmatmul.mubr.f32.gmra.mrb[56].mxu1 %v8275_v6 }
 0x3dc   : > { %4200 = vmatprep.mubr.f32.mxu1 %v2938_v50  ;;  %5606 = vmatpush1.bf16.msra.mxu1 %v5605_v52  ;;  %v8299_v52 = vld [vmem:[#allocation3 + $0xc1] sm:$0xff] }
 0x3dd   : > { %5607 = vmatprep.subr.bf16.mxu1 %v8567_v11 }
 0x3df   : > { %4201 = vmatmul.mubr.f32.gmra.mrb[58].mxu1 %v8289_v27 }
 0x3e0   : > { %4205 = vmatprep.mubr.f32.mxu1 %v2939_v9  ;;  %5609 = vmatpush1.bf16.msra.mxu1 %v5608_v14  ;;  %v5614_v14 = vpack.c.bf16 %v3597_v22, %v3596_v17  ;;  %v8312_v9 = vld [vmem:[#allocation3 + $0xd9] sm:$0xff]  ;;  %v8332_v17 = vld [vmem:[#allocation3 + $0x109] sm:$0xff] }
 0x3e1   : > { %5610 = vmatprep.subr.bf16.mxu1 %v8567_v11  ;;  %v8301_v53 = vpop.f32.mrb[84].mxu0  ;;  %v8599_v22 = vld [vmem:[#allocation17_spill] sm:$0xff] }
 0x3e2   : > { %8594 = vst [vmem:[#allocation15_spill] sm:$0xff] %v8301_v53  ;;  %v8304_v50 = vpop.f32.mrb[85].mxu0 }
 0x3e3   : > { %4206 = vmatmul.mubr.f32.gmra.mrb[60].mxu1 %v8299_v52 }
 0x3e4   : > { %4210 = vmatprep.mubr.f32.mxu1 %v2940_v37  ;;  %5612 = vmatpush1.bf16.msra.mxu1 %v5611_v58  ;;  %v8328_v58 = vld [vmem:[#allocation3 + $0xf9] sm:$0xff] }
 0x3e5   : > { %5613 = vmatprep.subr.bf16.mxu1 %v8567_v11  ;;  %v8320_v11 = vld [vmem:[#allocation3 + $0xe1] sm:$0xff] }
 0x3e7   : > { %4211 = vmatmul.mubr.f32.gmra.mrb[62].mxu1 %v8307_v15 }
 0x3e8   : > { %4215 = vmatprep.mubr.f32.mxu1 %v7795_v62  ;;  %5615 = vmatpush1.bf16.msra.mxu1 %v5614_v14  ;;  %v8324_v62 = vld [vmem:[#allocation3 + $0xf1] sm:$0xff]  ;;  %v8601_v14 = vmax.f32 %v7911_v54, 0.0  ;;  %v2992_v54 = vld [vmem:[#allocation3 + $0x48] sm:$0xff] }
 0x3e9   : > { %5648 = vmatprep.subr.bf16.mxu1 %v8595_v33 }
 0x3ea   : > { %v8314_v53 = vpop.f32.mrb[86].mxu0 }
 0x3eb   : > { %4216 = vmatmul.mubr.f32.gmra.mrb[64].mxu1 %v8312_v9  ;;  %v8317_v37 = vpop.f32.mrb[87].mxu0 }
 0x3ec   : > { %4220 = vmatprep.mubr.f32.mxu1 %v7799_v40  ;;  %v8336_v40 = vld [vmem:[#allocation3 + $0x111] sm:$0xff] }
 0x3ef   : > { %4221 = vmatmul.mubr.f32.gmra.mrb[66].mxu1 %v8320_v11 }
 0x3f0   : > { %4225 = vmatprep.mubr.f32.mxu1 %v7811_v43  ;;  %v8340_v43 = vld [vmem:[#allocation3 + $0x121] sm:$0xff] }
 0x3f3   : > { %4226 = vmatmul.mubr.f32.gmra.mrb[68].mxu1 %v8324_v62 }
 0x3f4   : > { %4230 = vmatprep.mubr.f32.mxu1 %v7815_v57  ;;  %v8344_v57 = vld [vmem:[#allocation3 + $0x129] sm:$0xff] }
 0x3f7   : > { %4231 = vmatmul.mubr.f32.gmra.mrb[70].mxu1 %v8328_v58 }
 0x3f8   : > { %4235 = vmatprep.mubr.f32.mxu1 %v7827_v3  ;;  %v8596_v3 = vld [vmem:[#allocation11_spill] sm:$0xff] }
 0x3fb   : > { %4236 = vmatmul.mubr.f32.gmra.mrb[72].mxu1 %v8332_v17 }
 0x3fc   : > { %4240 = vmatprep.mubr.f32.mxu1 %v7831_v48  ;;  %v8597_v48 = vld [vmem:[#allocation14_spill] sm:$0xff] }
 0x3ff   : > { %4241 = vmatmul.mubr.f32.gmra.mrb[74].mxu1 %v8336_v40 }
 0x400   : > { %4245 = vmatprep.mubr.f32.mxu1 %v7848_v10  ;;  %v8598_v10 = vld [vmem:[#allocation16_spill] sm:$0xff] }
 0x403   : > { %4246 = vmatmul.mubr.f32.gmra.mrb[76].mxu1 %v8340_v43 }
 0x404   : > { %4250 = vmatprep.mubr.f32.mxu1 %v8591_v1  ;;  %v8359_v1 = vld [vmem:[#allocation3 + $0x182] sm:$0xff] }
 0x407   : > { %4251 = vmatmul.mubr.f32.gmra.mrb[78].mxu1 %v8344_v57 }
 0x408   : > { %4255 = vmatprep.mubr.f32.mxu1 %v8592_v29  ;;  %v8600_v29 = vmax.f32 %v7900_v24, 0.0  ;;  %v8603_v24 = vld [vmem:[#allocation7_spill] sm:$0xff] }
 0x40b   : > { %4256 = vmatmul.mubr.f32.gmra.mrb[80].mxu1 %v8596_v3  ;;  %v2991_v3 = vld [vmem:[#allocation3 + $0x38] sm:$0xff] }
 0x40c   : > { %4260 = vmatprep.mubr.f32.mxu1 %v8593_v21  ;;  %v8364_v21 = vld [vmem:[#allocation3 + $0x18a] sm:$0xff] }
 0x40f   : > { %4261 = vmatmul.mubr.f32.gmra.mrb[82].mxu1 %v8597_v48  ;;  %v8606_v48 = vld [vmem:[#allocation10_spill] sm:$0xff] }
 0x410   : > { %4265 = vmatprep.mubr.f32.mxu1 %v8096_v7 }
 0x413   : > { %4266 = vmatmul.mubr.f32.gmra.mrb[84].mxu1 %v8598_v10  ;;  %v8607_v10 = vld [vmem:[#allocation12_spill] sm:$0xff] }
 0x414   : > { %4270 = vmatprep.mubr.f32.mxu1 %v8104_v60 }
 0x417   : > { %4271 = vmatmul.mubr.f32.gmra.mrb[86].mxu1 %v8599_v22  ;;  %v8608_v22 = vld [vmem:[#allocation13_spill] sm:$0xff] }
 0x418   : > { %4275 = vmatprep.mubr.f32.mxu1 %v8110_v42 }
 0x41b   : > { %4276 = vmatmul.mubr.f32.gmra.mrb[88].mxu1 %v7884_v12  ;;  %v2990_v12 = vld [vmem:[#allocation3 + $0x30] sm:$0xff] }
 0x41c   : > { %4280 = vmatprep.mubr.f32.mxu1 %v8126_v38 }
 0x41f   : > { %4281 = vmatmul.mubr.f32.gmra.mrb[90].mxu1 %v7893_v23  ;;  %v8602_v23 = vld [vmem:[#allocation6_spill] sm:$0xff] }
 0x420   : > { %4285 = vmatprep.mubr.f32.mxu1 %v8359_v1 }
 0x423   : > { %4286 = vmatmul.mubr.f32.gmra.mrb[92].mxu1 %v8600_v29  ;;  %v2998_v29 = vld [vmem:[#allocation3 + $0x90] sm:$0xff] }
 0x424   : > { %4290 = vmatprep.mubr.f32.mxu1 %v8364_v21 }
 0x427   : > { %4291 = vmatmul.mubr.f32.gmra.mrb[94].mxu1 %v8601_v14  ;;  %v3000_v14 = vld [vmem:[#allocation3 + $0xa8] sm:$0xff] }
 0x428   : > { %4360 = vmatprep.mubr.f32.mxu1 %v8155_v36  ;;  %v8604_v36 = vld [vmem:[#allocation8_spill] sm:$0xff] }
 0x42b   : > { %4361 = vmatmul.mubr.f32.vlgmr.msra.gmra.mrb[32].mxu1 %v2990_v12  ;;  %v3002_v12 = vld [vmem:[#allocation3 + $0xc0] sm:$0xff] }
 0x42c   : > { %4365 = vmatprep.mubr.f32.mxu1 %v8169_v32  ;;  %5656 = vmatpush3.bf16.msra.mxu1 %v8595_v33  ;;  %v2993_v32 = vld [vmem:[#allocation3 + $0x50] sm:$0xff] }
 0x42d   : > { %5649 = vmatprep.subr.bf16.mxu1 %v8602_v23  ;;  %v8605_v33 = vld [vmem:[#allocation9_spill] sm:$0xff] }
 0x42f   : > { %4366 = vmatmul.mubr.f32.gmra.mrb[34].mxu1 %v2991_v3  ;;  %v3077_v3 = vld [vmem:[#allocation3 + $0x141] sm:$0xff] }
 0x430   : > { %4370 = vmatprep.mubr.f32.mxu1 %v8179_v5  ;;  %5657 = vmatpush3.bf16.msra.mxu1 %v8602_v23  ;;  %v2994_v5 = vld [vmem:[#allocation3 + $0x60] sm:$0xff] }
 0x431   : > { %5650 = vmatprep.subr.bf16.mxu1 %v8603_v24  ;;  %v3076_v23 = vld [vmem:[#allocation3 + $0x139] sm:$0xff] }
 0x433   : > { %4371 = vmatmul.mubr.f32.gmra.mrb[36].mxu1 %v2992_v54  ;;  %v3079_v54 = vld [vmem:[#allocation3 + $0x159] sm:$0xff] }
 0x434   : > { %4375 = vmatprep.mubr.f32.mxu1 %v8193_v28  ;;  %5658 = vmatpush3.bf16.msra.mxu1 %v8603_v24  ;;  %v2995_v28 = vld [vmem:[#allocation3 + $0x68] sm:$0xff]  ;;  %v3078_v24 = vld [vmem:[#allocation3 + $0x151] sm:$0xff] }
 0x435   : > { %5651 = vmatprep.subr.bf16.mxu1 %v8604_v36 }
 0x437   : > { %4376 = vmatmul.mubr.f32.gmra.mrb[38].mxu1 %v2993_v32  ;;  %v3081_v32 = vld [vmem:[#allocation3 + $0x171] sm:$0xff] }
 0x438   : > { %4380 = vmatprep.mubr.f32.mxu1 %v8203_v63  ;;  %5659 = vmatpush3.bf16.msra.mxu1 %v8604_v36  ;;  %v2996_v63 = vld [vmem:[#allocation3 + $0x78] sm:$0xff]  ;;  %v3080_v36 = vld [vmem:[#allocation3 + $0x169] sm:$0xff] }
 0x439   : > { %5652 = vmatprep.subr.bf16.mxu1 %v8605_v33 }
 0x43b   : > { %4381 = vmatmul.mubr.f32.gmra.mrb[40].mxu1 %v2994_v5  ;;  %v3082_v5 = vld [vmem:[#allocation3 + $0x181] sm:$0xff] }
 0x43c   : > { %4385 = vmatprep.mubr.f32.mxu1 %v8217_v20  ;;  %5660 = vmatpush3.bf16.msra.mxu1 %v8605_v33  ;;  %v2997_v20 = vld [vmem:[#allocation3 + $0x80] sm:$0xff]  ;;  %v3017_v33 = vld [vmem:[#allocation3 + $0x170] sm:$0xff] }
 0x43d   : > { %5653 = vmatprep.subr.bf16.mxu1 %v8606_v48 }
 0x43f   : > { %4386 = vmatmul.mubr.f32.gmra.mrb[42].mxu1 %v2995_v28  ;;  %v3084_v28 = vld [vmem:[#allocation3 + $0x199] sm:$0xff] }
 0x440   : > { %4390 = vmatprep.mubr.f32.mxu1 %v8227_v44  ;;  %5661 = vmatpush3.bf16.msra.mxu1 %v8606_v48  ;;  %v2999_v44 = vld [vmem:[#allocation3 + $0x98] sm:$0xff]  ;;  %v3083_v48 = vld [vmem:[#allocation3 + $0x189] sm:$0xff] }
 0x441   : > { %5654 = vmatprep.subr.bf16.mxu1 %v8607_v10 }
 0x443   : > { %4391 = vmatmul.mubr.f32.gmra.mrb[44].mxu1 %v2996_v63  ;;  %v6123_v63 = vld [vmem:[#allocation2] sm:$0xff] }
 0x444   : > { %4395 = vmatprep.mubr.f32.mxu1 %v8241_v35  ;;  %5662 = vmatpush3.bf16.msra.mxu1 %v8607_v10  ;;  %v3001_v35 = vld [vmem:[#allocation3 + $0xb0] sm:$0xff]  ;;  %v3085_v10 = vld [vmem:[#allocation3 + $0x1a1] sm:$0xff] }
 0x445   : > { %5655 = vmatprep.subr.bf16.mxu1 %v8608_v22 }
 0x447   : > { %4396 = vmatmul.mubr.f32.gmra.mrb[46].mxu1 %v2997_v20  ;;  %v4746_v20 = vld [vmem:[#allocation2 + $0x19] sm:$0xff] }
 0x448   : > { %4400 = vmatprep.mubr.f32.mxu1 %v8251_v0  ;;  %5663 = vmatpush3.bf16.msra.mxu1 %v8608_v22  ;;  %v3003_v0 = vld [vmem:[#allocation3 + $0xc8] sm:$0xff]  ;;  %v8417_v22 = vld [vmem:[%s8521_s4] ss:$0 sm:$0xff] }
 0x44b   : > { %4401 = vmatmul.mubr.f32.gmra.mrb[48].mxu1 %v2998_v29 }
 0x44c   : > { %4405 = vmatprep.mubr.f32.mxu1 %v8265_v31  ;;  %v3004_v31 = vld [vmem:[#allocation3 + $0xd8] sm:$0xff] }
 0x44f   : > { %4406 = vmatmul.mubr.f32.gmra.mrb[50].mxu1 %v2999_v44 }
 0x450   : > { %4410 = vmatprep.mubr.f32.mxu1 %v8275_v6  ;;  %v3005_v6 = vld [vmem:[#allocation3 + $0xe0] sm:$0xff] }
 0x453   : > { %4411 = vmatmul.mubr.f32.gmra.mrb[52].mxu1 %v3000_v14  ;;  %v4747_v14 = vld [vmem:[#allocation2 + $0x21] sm:$0xff] }
 0x454   : > { %4415 = vmatprep.mubr.f32.mxu1 %v8289_v27  ;;  %v3006_v27 = vld [vmem:[#allocation3 + $0xf0] sm:$0xff] }
 0x457   : > { %4416 = vmatmul.mubr.f32.gmra.mrb[54].mxu1 %v3001_v35 }
 0x458   : > { %4420 = vmatprep.mubr.f32.mxu1 %v8299_v52  ;;  %v3007_v52 = vld [vmem:[#allocation3 + $0xf8] sm:$0xff] }
 0x45b   : > { %4421 = vmatmul.mubr.f32.gmra.mrb[56].mxu1 %v3002_v12 }
 0x45c   : > { %4425 = vmatprep.mubr.f32.mxu1 %v8307_v15  ;;  %v3008_v15 = vld [vmem:[#allocation3 + $0x108] sm:$0xff] }
 0x45f   : > { %4426 = vmatmul.mubr.f32.gmra.mrb[58].mxu1 %v3003_v0 }
 0x460   : > { %4430 = vmatprep.mubr.f32.mxu1 %v8312_v9  ;;  %v3009_v9 = vld [vmem:[#allocation3 + $0x110] sm:$0xff] }
 0x463   : > { %4431 = vmatmul.mubr.f32.gmra.mrb[60].mxu1 %v3004_v31 }
 0x464   : > { %4435 = vmatprep.mubr.f32.mxu1 %v8320_v11  ;;  %v3010_v11 = vld [vmem:[#allocation3 + $0x120] sm:$0xff] }
 0x467   : > { %4436 = vmatmul.mubr.f32.gmra.mrb[62].mxu1 %v3005_v6 }
 0x468   : > { %4440 = vmatprep.mubr.f32.mxu1 %v8324_v62  ;;  %v3011_v62 = vld [vmem:[#allocation3 + $0x128] sm:$0xff] }
 0x46b   : > { %4441 = vmatmul.mubr.f32.gmra.mrb[64].mxu1 %v3006_v27  ;;  %v4748_v27 = vld [vmem:[#allocation2 + $0x31] sm:$0xff] }
 0x46c   : > { %4445 = vmatprep.mubr.f32.mxu1 %v8328_v58  ;;  %v3012_v58 = vld [vmem:[#allocation3 + $0x138] sm:$0xff] }
 0x46f   : > { %4446 = vmatmul.mubr.f32.gmra.mrb[66].mxu1 %v3007_v52 }
 0x470   : > { %4450 = vmatprep.mubr.f32.mxu1 %v8332_v17  ;;  %v3013_v17 = vld [vmem:[#allocation3 + $0x140] sm:$0xff] }
 0x473   : > { %4451 = vmatmul.mubr.f32.gmra.mrb[68].mxu1 %v3008_v15 }
 0x474   : > { %4455 = vmatprep.mubr.f32.mxu1 %v8336_v40  ;;  %v3014_v40 = vld [vmem:[#allocation3 + $0x150] sm:$0xff] }
 0x477   : > { %4456 = vmatmul.mubr.f32.gmra.mrb[70].mxu1 %v3009_v9 }
 0x478   : > { %4460 = vmatprep.mubr.f32.mxu1 %v8340_v43  ;;  %v3015_v43 = vld [vmem:[#allocation3 + $0x158] sm:$0xff] }
 0x47b   : > { %4461 = vmatmul.mubr.f32.gmra.mrb[72].mxu1 %v3010_v11 }
 0x47c   : > { %4465 = vmatprep.mubr.f32.mxu1 %v8344_v57  ;;  %v3016_v57 = vld [vmem:[#allocation3 + $0x168] sm:$0xff] }
 0x47f   : > { %4466 = vmatmul.mubr.f32.gmra.mrb[74].mxu1 %v3011_v62 }
 0x480   : > { %4470 = vmatprep.mubr.f32.mxu1 %v3076_v23 }
 0x483   : > { %4471 = vmatmul.mubr.f32.gmra.mrb[76].mxu1 %v3012_v58  ;;  %v4749_v58 = vld [vmem:[#allocation2 + $0x39] sm:$0xff] }
 0x484   : > { %4475 = vmatprep.mubr.f32.mxu1 %v3077_v3 }
 0x487   : > { %4476 = vmatmul.mubr.f32.gmra.mrb[78].mxu1 %v3013_v17 }
 0x488   : > { %4480 = vmatprep.mubr.f32.mxu1 %v3078_v24 }
 0x48b   : > { %4481 = vmatmul.mubr.f32.gmra.mrb[80].mxu1 %v3014_v40 }
 0x48c   : > { %4485 = vmatprep.mubr.f32.mxu1 %v3079_v54 }
 0x48f   : > { %4486 = vmatmul.mubr.f32.gmra.mrb[82].mxu1 %v3015_v43  ;;  %v4750_v43 = vld [vmem:[#allocation2 + $0x49] sm:$0xff] }
 0x490   : > { %4490 = vmatprep.mubr.f32.mxu1 %v3080_v36 }
 0x493   : > { %4491 = vmatmul.mubr.f32.gmra.mrb[84].mxu1 %v3016_v57 }
 0x494   : > { %4495 = vmatprep.mubr.f32.mxu1 %v3081_v32 }
 0x497   : > { %4496 = vmatmul.mubr.f32.gmra.mrb[86].mxu1 %v3017_v33 }
 0x498   : > { %4500 = vmatprep.mubr.f32.mxu1 %v3082_v5 }
 0x49b   : > { %4501 = vmatmul.mubr.f32.gmra.mrb[88].mxu1 %v8107_v51  ;;  %v3148_v51 = vld [vmem:[#allocation3 + $0x19a] sm:$0xff] }
 0x49c   : > { %4505 = vmatprep.mubr.f32.mxu1 %v3083_v48  ;;  %v4751_v48 = vld [vmem:[#allocation2 + $0x51] sm:$0xff] }
 0x49f   : > { %4506 = vmatmul.mubr.f32.gmra.mrb[90].mxu1 %v8115_v16  ;;  %v3149_v16 = vld [vmem:[#allocation3 + $0x1a2] sm:$0xff] }
 0x4a0   : > { %4510 = vmatprep.mubr.f32.mxu1 %v3084_v28 }
 0x4a3   : > { %4511 = vmatmul.mubr.f32.gmra.mrb[92].mxu1 %v6123_v63 }
 0x4a4   : > { %4515 = vmatprep.mubr.f32.mxu1 %v3085_v10 }
 0x4a7   : > { %4516 = vmatmul.mubr.f32.gmra.mrb[94].mxu1 %v6123_v63 }
 0x4a8   : > { %5188 = vmatprep.mubr.f32.mxu1 %v8096_v7 }
 0x4ab   : > { %5189 = vmatmul.mubr.f32.vlgmr.msra.gmra.mrb[96].mxu1 %v8104_v60 }
 0x4ac   : > { %5191 = vmatprep.mubr.f32.mxu1 %v8110_v42 }
 0x4af   : > { %5192 = vmatmul.mubr.f32.gmra.mrb[98].mxu1 %v8126_v38 }
 0x4b0   : > { %5194 = vmatprep.mubr.f32.mxu1 %v8359_v1 }
 0x4b3   : > { %5195 = vmatmul.mubr.f32.gmra.mrb[100].mxu1 %v8364_v21 }
 0x4b4   : > { %5197 = vmatprep.mubr.f32.mxu1 %v3148_v51 }
 0x4b7   : > { %5198 = vmatmul.mubr.f32.gmra.mrb[102].mxu1 %v3149_v16 }
 0x4fe   : > { %v4362_v7 = vpop.f32.mrb[32].mxu1 }
 0x4ff   : > { %v5696_v60 = vadd.f32 %v8417_v22, %v4362_v7  ;;  %v4364_v42 = vpop.f32.mrb[33].mxu1  ;;  %v4752_v7 = vld [vmem:[#allocation2 + $0x61] sm:$0xff] }
 0x501   : > { %v4588_v38 = vadd.f32 %v5696_v60, %v8091_v46 }
 0x502   : > { %v4367_v1 = vpop.f32.mrb[34].mxu1 }
 0x503   : > { %v4778_v29 = vadd.f32 %v4746_v20, %v4588_v38  ;;  %v5697_v44 = vadd.f32 %v8417_v22, %v4367_v1  ;;  %v4369_v21 = vpop.f32.mrb[35].mxu1 }
 0x505   : > { %v4810_v35 = vmax.f32 %v4778_v29, 0.0  ;;  %v4593_v12 = vadd.f32 %v5697_v44, %v8088_v39  ;;  %v4753_v29 = vld [vmem:[#allocation2 + $0x69] sm:$0xff] }
 0x506   : > { %v4372_v0 = vpop.f32.mrb[36].mxu1 }
 0x507   : > { %4842 = vst [vmem:[%s8427_s14] sm:$0xff] %v4810_v35  ;;  %v4779_v46 = vadd.f32 %v4747_v14, %v4593_v12  ;;  %v5698_v31 = vadd.f32 %v8417_v22, %v4372_v0  ;;  %v4374_v6 = vpop.f32.mrb[37].mxu1  ;;  %v4754_v0 = vld [vmem:[#allocation2 + $0x79] sm:$0xff] }
 0x509   : > { %v4811_v52 = vmax.f32 %v4779_v46, 0.0  ;;  %v4598_v15 = vadd.f32 %v5698_v31, %v8101_v56 }
 0x50a   : > { %v4377_v9 = vpop.f32.mrb[38].mxu1 }
 0x50b   : > { %4843 = vst [vmem:[%s8427_s14 + $0x8] sm:$0xff] %v4811_v52  ;;  %v4780_v11 = vadd.f32 %v4748_v27, %v4598_v15  ;;  %v5699_v62 = vadd.f32 %v8417_v22, %v4377_v9  ;;  %v4379_v23 = vpop.f32.mrb[39].mxu1  ;;  %v4755_v15 = vld [vmem:[#allocation2 + $0x81] sm:$0xff] }
 0x50d   : > { %v4812_v39 = vmax.f32 %v4780_v11, 0.0  ;;  %v4603_v3 = vadd.f32 %v5699_v62, %v8098_v59 }
 0x50e   : > { %v4382_v17 = vpop.f32.mrb[40].mxu1 }
 0x50f   : > { %4844 = vst [vmem:[%s8427_s14 + $0x10] sm:$0xff] %v4812_v39  ;;  %v4781_v24 = vadd.f32 %v4749_v58, %v4603_v3  ;;  %v5700_v40 = vadd.f32 %v8417_v22, %v4382_v17  ;;  %v4384_v54 = vpop.f32.mrb[41].mxu1  ;;  %v4756_v39 = vld [vmem:[#allocation2 + $0x91] sm:$0xff] }
 0x511   : > { %v4813_v56 = vmax.f32 %v4781_v24, 0.0  ;;  %v4608_v36 = vadd.f32 %v5700_v40, %v8117_v13 }
 0x512   : > { %v4387_v57 = vpop.f32.mrb[42].mxu1 }
 0x513   : > { %4845 = vst [vmem:[%s8427_s14 + $0x18] sm:$0xff] %v4813_v56  ;;  %v4782_v32 = vadd.f32 %v4750_v43, %v4608_v36  ;;  %v5701_v33 = vadd.f32 %v8417_v22, %v4387_v57  ;;  %v4389_v5 = vpop.f32.mrb[43].mxu1  ;;  %v4757_v43 = vld [vmem:[#allocation2 + $0x99] sm:$0xff] }
 0x514   : > { %v4758_v5 = vld [vmem:[#allocation2 + $0xa9] sm:$0xff] }
 0x515   : > { %v4814_v59 = vmax.f32 %v4782_v32, 0.0  ;;  %v4613_v28 = vadd.f32 %v5701_v33, %v8112_v19 }
 0x516   : > { %v4392_v10 = vpop.f32.mrb[44].mxu1 }
 0x517   : > { %4846 = vst [vmem:[%s8427_s14 + $0x20] sm:$0xff] %v4814_v59  ;;  %v4783_v63 = vadd.f32 %v4751_v48, %v4613_v28  ;;  %v5702_v51 = vadd.f32 %v8417_v22, %v4392_v10  ;;  %v4394_v16 = vpop.f32.mrb[45].mxu1 }
 0x519   : > { %v4815_v13 = vmax.f32 %v4783_v63, 0.0  ;;  %v4618_v60 = vadd.f32 %v5702_v51, %v8138_v30  ;;  %v4759_v51 = vld [vmem:[#allocation2 + $0xb1] sm:$0xff] }
 0x51a   : > { %v4397_v42 = vpop.f32.mrb[46].mxu1 }
 0x51b   : > { %4847 = vst [vmem:[%s8427_s14 + $0x28] sm:$0xff] %v4815_v13  ;;  %v4784_v20 = vadd.f32 %v4752_v7, %v4618_v60  ;;  %v5703_v38 = vadd.f32 %v8417_v22, %v4397_v42  ;;  %v4399_v1 = vpop.f32.mrb[47].mxu1 }
 0x51d   : > { %v4816_v19 = vmax.f32 %v4784_v20, 0.0  ;;  %v4623_v44 = vadd.f32 %v5703_v38, %v8136_v45  ;;  %v4760_v20 = vld [vmem:[#allocation2 + $0xc1] sm:$0xff] }
 0x51e   : > { %v4402_v21 = vpop.f32.mrb[48].mxu1 }
 0x51f   : > { %4848 = vst [vmem:[%s8427_s14 + $0x30] sm:$0xff] %v4816_v19  ;;  %v4785_v14 = vadd.f32 %v4753_v29, %v4623_v44  ;;  %v5704_v35 = vadd.f32 %v8417_v22, %v4402_v21  ;;  %v4404_v12 = vpop.f32.mrb[49].mxu1  ;;  %v4761_v21 = vld [vmem:[#allocation2 + $0xc9] sm:$0xff] }
 0x521   : > { %v4817_v30 = vmax.f32 %v4785_v14, 0.0  ;;  %v4628_v46 = vadd.f32 %v5704_v35, %v8160_v4 }
 0x522   : > { %v4407_v31 = vpop.f32.mrb[50].mxu1 }
 0x523   : > { %4849 = vst [vmem:[%s8427_s14 + $0x38] sm:$0xff] %v4817_v30  ;;  %v4786_v6 = vadd.f32 %v4754_v0, %v4628_v46  ;;  %v5705_v27 = vadd.f32 %v8417_v22, %v4407_v31  ;;  %v4409_v52 = vpop.f32.mrb[51].mxu1  ;;  %v4762_v46 = vld [vmem:[#allocation2 + $0xd9] sm:$0xff] }
 0x525   : > { %v4818_v45 = vmax.f32 %v4786_v6, 0.0  ;;  %v4633_v9 = vadd.f32 %v5705_v27, %v8157_v41 }
 0x526   : > { %v4412_v11 = vpop.f32.mrb[52].mxu1 }
 0x527   : > { %4850 = vst [vmem:[%s8427_s14 + $0x40] sm:$0xff] %v4818_v45  ;;  %v4787_v62 = vadd.f32 %v4755_v15, %v4633_v9  ;;  %v5706_v23 = vadd.f32 %v8417_v22, %v4412_v11  ;;  %v4414_v58 = vpop.f32.mrb[53].mxu1  ;;  %v4763_v45 = vld [vmem:[#allocation2 + $0xe1] sm:$0xff] }
 0x529   : > { %v4819_v4 = vmax.f32 %v4787_v62, 0.0  ;;  %v4638_v3 = vadd.f32 %v5706_v23, %v8184_v34 }
 0x52a   : > { %v4417_v17 = vpop.f32.mrb[54].mxu1 }
 0x52b   : > { %4851 = vst [vmem:[%s8427_s14 + $0x48] sm:$0xff] %v4819_v4  ;;  %v4788_v24 = vadd.f32 %v4756_v39, %v4638_v3  ;;  %v5707_v40 = vadd.f32 %v8417_v22, %v4417_v17  ;;  %v4419_v54 = vpop.f32.mrb[55].mxu1  ;;  %v4764_v39 = vld [vmem:[#allocation2 + $0xf1] sm:$0xff] }
 0x52c   : > { %v4765_v54 = vld [vmem:[#allocation2 + $0xf9] sm:$0xff] }
 0x52d   : > { %v4820_v41 = vmax.f32 %v4788_v24, 0.0  ;;  %v4643_v56 = vadd.f32 %v5707_v40, %v8181_v26 }
 0x52e   : > { %v4422_v36 = vpop.f32.mrb[56].mxu1 }
 0x52f   : > { %4852 = vst [vmem:[%s8427_s14 + $0x50] sm:$0xff] %v4820_v41  ;;  %v4789_v57 = vadd.f32 %v4757_v43, %v4643_v56  ;;  %v5708_v32 = vadd.f32 %v8417_v22, %v4422_v36  ;;  %v4424_v33 = vpop.f32.mrb[57].mxu1 }
 0x531   : > { %v4821_v34 = vmax.f32 %v4789_v57, 0.0  ;;  %v4648_v48 = vadd.f32 %v5708_v32, %v8208_v55  ;;  %v4766_v32 = vld [vmem:[#allocation2 + $0x109] sm:$0xff] }
 0x532   : > { %v4427_v59 = vpop.f32.mrb[58].mxu1 }
 0x533   : > { %4853 = vst [vmem:[%s8427_s14 + $0x58] sm:$0xff] %v4821_v34  ;;  %v4790_v28 = vadd.f32 %v4758_v5, %v4648_v48  ;;  %v5709_v10 = vadd.f32 %v8417_v22, %v4427_v59  ;;  %v4429_v63 = vpop.f32.mrb[59].mxu1 }
 0x535   : > { %v4822_v26 = vmax.f32 %v4790_v28, 0.0  ;;  %v4653_v16 = vadd.f32 %v5709_v10, %v8205_v61  ;;  %v4767_v28 = vld [vmem:[#allocation2 + $0x111] sm:$0xff] }
 0x536   : > { %v4432_v7 = vpop.f32.mrb[60].mxu1  ;;  %v8609_v10 = vld [vmem:[#allocation15_spill] sm:$0xff] }
 0x537   : > { %4854 = vst [vmem:[%s8427_s14 + $0x60] sm:$0xff] %v4822_v26  ;;  %v4791_v13 = vadd.f32 %v4759_v51, %v4653_v16  ;;  %v5710_v60 = vadd.f32 %v8417_v22, %v4432_v7  ;;  %v4434_v42 = vpop.f32.mrb[61].mxu1 }
 0x539   : > { %v4823_v55 = vmax.f32 %v4791_v13, 0.0  ;;  %v4658_v38 = vadd.f32 %v5710_v60, %v8232_v18  ;;  %v4768_v13 = vld [vmem:[#allocation2 + $0x121] sm:$0xff] }
 0x53a   : > { %v4437_v1 = vpop.f32.mrb[62].mxu1 }
 0x53b   : > { %4855 = vst [vmem:[%s8427_s14 + $0x68] sm:$0xff] %v4823_v55  ;;  %v4792_v29 = vadd.f32 %v4760_v20, %v4658_v38  ;;  %v5711_v19 = vadd.f32 %v8417_v22, %v4437_v1  ;;  %v4439_v44 = vpop.f32.mrb[63].mxu1  ;;  %v4769_v1 = vld [vmem:[#allocation2 + $0x129] sm:$0xff] }
 0x53d   : > { %v4824_v61 = vmax.f32 %v4792_v29, 0.0  ;;  %v4663_v14 = vadd.f32 %v5711_v19, %v8229_v8 }
 0x53e   : > { %v4442_v35 = vpop.f32.mrb[64].mxu1 }
 0x53f   : > { %4856 = vst [vmem:[%s8427_s14 + $0x70] sm:$0xff] %v4824_v61  ;;  %v4793_v12 = vadd.f32 %v4761_v21, %v4663_v14  ;;  %v5712_v0 = vadd.f32 %v8417_v22, %v4442_v35  ;;  %v4444_v30 = vpop.f32.mrb[65].mxu1 }
 0x541   : > { %v4825_v18 = vmax.f32 %v4793_v12, 0.0  ;;  %v4668_v31 = vadd.f32 %v5712_v0, %v8256_v49 }
 0x542   : > { %v4447_v6 = vpop.f32.mrb[66].mxu1 }
 0x543   : > { %4857 = vst [vmem:[%s8427_s14 + $0x78] sm:$0xff] %v4825_v18  ;;  %v4794_v27 = vadd.f32 %v4762_v46, %v4668_v31  ;;  %v5713_v52 = vadd.f32 %v8417_v22, %v4447_v6  ;;  %v4449_v15 = vpop.f32.mrb[67].mxu1 }
 0x545   : > { %v4826_v8 = vmax.f32 %v4794_v27, 0.0  ;;  %v4673_v9 = vadd.f32 %v5713_v52, %v8253_v25 }
 0x546   : > { %v4452_v11 = vpop.f32.mrb[68].mxu1 }
 0x547   : > { %4858 = vst [vmem:[%s8427_s14 + $0x80] sm:$0xff] %v4826_v8  ;;  %v4795_v62 = vadd.f32 %v4763_v45, %v4673_v9  ;;  %v5714_v23 = vadd.f32 %v8417_v22, %v4452_v11  ;;  %v4454_v58 = vpop.f32.mrb[69].mxu1 }
 0x549   : > { %v4827_v49 = vmax.f32 %v4795_v62, 0.0  ;;  %v4678_v4 = vadd.f32 %v5714_v23, %v8280_v47  ;;  %v4771_v62 = vld [vmem:[#allocation2 + $0x141] sm:$0xff] }
 0x54a   : > { %v4457_v3 = vpop.f32.mrb[70].mxu1 }
 0x54b   : > { %4859 = vst [vmem:[%s8427_s14 + $0x88] sm:$0xff] %v4827_v49  ;;  %v4796_v17 = vadd.f32 %v4764_v39, %v4678_v4  ;;  %v5715_v24 = vadd.f32 %v8417_v22, %v4457_v3  ;;  %v4459_v40 = vpop.f32.mrb[71].mxu1  ;;  %v4770_v39 = vld [vmem:[#allocation2 + $0x139] sm:$0xff] }
 0x54d   : > { %v4828_v25 = vmax.f32 %v4796_v17, 0.0  ;;  %v4683_v43 = vadd.f32 %v5715_v24, %v8277_v2 }
 0x54e   : > { %v4462_v41 = vpop.f32.mrb[72].mxu1 }
 0x54f   : > { %4860 = vst [vmem:[%s8427_s14 + $0x90] sm:$0xff] %v4828_v25  ;;  %v4797_v56 = vadd.f32 %v4765_v54, %v4683_v43  ;;  %v5716_v36 = vadd.f32 %v8417_v22, %v4462_v41  ;;  %v4464_v57 = vpop.f32.mrb[73].mxu1  ;;  %v4773_v54 = vld [vmem:[#allocation2 + $0x159] sm:$0xff] }
 0x551   : > { %v4829_v47 = vmax.f32 %v4797_v56, 0.0  ;;  %v4688_v33 = vadd.f32 %v5716_v36, %v8304_v50  ;;  %v4772_v56 = vld [vmem:[#allocation2 + $0x151] sm:$0xff] }
 0x552   : > { %v4467_v5 = vpop.f32.mrb[74].mxu1 }
 0x553   : > { %4861 = vst [vmem:[%s8427_s14 + $0x98] sm:$0xff] %v4829_v47  ;;  %v4798_v34 = vadd.f32 %v4766_v32, %v4688_v33  ;;  %v5717_v48 = vadd.f32 %v8417_v22, %v4467_v5  ;;  %v4469_v59 = vpop.f32.mrb[75].mxu1 }
 0x555   : > { %v4830_v2 = vmax.f32 %v4798_v34, 0.0  ;;  %v4693_v63 = vadd.f32 %v5717_v48, %v8609_v10  ;;  %v4775_v48 = vld [vmem:[#allocation2 + $0x171] sm:$0xff]  ;;  %v4774_v10 = vld [vmem:[#allocation2 + $0x169] sm:$0xff] }
 0x556   : > { %v4472_v51 = vpop.f32.mrb[76].mxu1 }
 0x557   : > { %4862 = vst [vmem:[%s8427_s14 + $0xa0] sm:$0xff] %v4830_v2  ;;  %v4799_v26 = vadd.f32 %v4767_v28, %v4693_v63  ;;  %v5718_v16 = vadd.f32 %v8417_v22, %v4472_v51  ;;  %v4474_v7 = vpop.f32.mrb[77].mxu1 }
 0x559   : > { %v4831_v50 = vmax.f32 %v4799_v26, 0.0  ;;  %v4698_v60 = vadd.f32 %v5718_v16, %v8317_v37 }
 0x55a   : > { %v4477_v42 = vpop.f32.mrb[78].mxu1 }
 0x55b   : > { %4863 = vst [vmem:[%s8427_s14 + $0xa8] sm:$0xff] %v4831_v50  ;;  %v4800_v20 = vadd.f32 %v4768_v13, %v4698_v60  ;;  %v5719_v55 = vadd.f32 %v8417_v22, %v4477_v42  ;;  %v4479_v38 = vpop.f32.mrb[79].mxu1  ;;  %v4777_v60 = vld [vmem:[#allocation2 + $0x189] sm:$0xff] }
 0x55c   : > { %v4776_v38 = vld [vmem:[#allocation2 + $0x181] sm:$0xff] }
 0x55d   : > { %v4832_v29 = vmax.f32 %v4800_v20, 0.0  ;;  %v4703_v19 = vadd.f32 %v5719_v55, %v8314_v53 }
 0x55e   : > { %v4482_v44 = vpop.f32.mrb[80].mxu1 }
 0x55f   : > { %4864 = vst [vmem:[%s8427_s14 + $0xb0] sm:$0xff] %v4832_v29  ;;  %v4801_v21 = vadd.f32 %v4769_v1, %v4703_v19  ;;  %v4484_v61 = vpop.f32.mrb[81].mxu1  ;;  %v5720_v9 = vadd.f32 %v8417_v22, %v4482_v44 }
 0x561   : > { %v4833_v14 = vmax.f32 %v4801_v21, 0.0 }
 0x562   : > { %v4487_v35 = vpop.f32.mrb[82].mxu1 }
 0x563   : > { %4865 = vst [vmem:[%s8427_s14 + $0xb8] sm:$0xff] %v4833_v14  ;;  %v4489_v12 = vpop.f32.mrb[83].mxu1  ;;  %v5721_v8 = vadd.f32 %v8417_v22, %v4487_v35 }
 0x566   : > { %v4492_v0 = vpop.f32.mrb[84].mxu1 }
 0x567   : > { %v4494_v37 = vpop.f32.mrb[85].mxu1  ;;  %v5722_v17 = vadd.f32 %v8417_v22, %v4492_v0 }
 0x56a   : > { %v4497_v30 = vpop.f32.mrb[86].mxu1 }
 0x56b   : > { %v4499_v46 = vpop.f32.mrb[87].mxu1  ;;  %v5723_v4 = vadd.f32 %v8417_v22, %v4497_v30 }
 0x56e   : > { %v4502_v18 = vpop.f32.mrb[88].mxu1 }
 0x56f   : > { %v4504_v31 = vpop.f32.mrb[89].mxu1  ;;  %v5724_v33 = vadd.f32 %v8417_v22, %v4502_v18 }
 0x572   : > { %v4507_v6 = vpop.f32.mrb[90].mxu1 }
 0x573   : > { %v4509_v27 = vpop.f32.mrb[91].mxu1  ;;  %v5725_v32 = vadd.f32 %v8417_v22, %v4507_v6 }
 0x576   : > { %v4512_v52 = vpop.f32.mrb[92].mxu1 }
 0x577   : > { %v4514_v15 = vpop.f32.mrb[93].mxu1  ;;  %v5726_v7 = vadd.f32 %v8417_v22, %v4512_v52 }
 0x57a   : > { %v4517_v45 = vpop.f32.mrb[94].mxu1 }
 0x57b   : > { %v4519_v53 = vpop.f32.mrb[95].mxu1  ;;  %v5727_v26 = vadd.f32 %v8417_v22, %v4517_v45 }
 0x57e   : > { %v5190_v11 = vpop.f32.mrb[96].mxu1 }
 0x57f   : > { %v4713_v23 = vadd.f32 %v5721_v8, %v5190_v11  ;;  %v4707_v58 = vpop.f32.mrb[97].mxu1 }
 0x580   : > { %v4708_v49 = vadd.f32 %v5720_v9, %v4707_v58 }
 0x581   : > { %v4803_v3 = vadd.f32 %v4771_v62, %v4713_v23 }
 0x582   : > { %v4802_v24 = vadd.f32 %v4770_v39, %v4708_v49  ;;  %v5193_v40 = vpop.f32.mrb[98].mxu1 }
 0x583   : > { %v4835_v25 = vmax.f32 %v4803_v3, 0.0  ;;  %v4723_v43 = vadd.f32 %v5723_v4, %v5193_v40  ;;  %v4717_v41 = vpop.f32.mrb[99].mxu1 }
 0x584   : > { %v4834_v36 = vmax.f32 %v4802_v24, 0.0  ;;  %v4718_v57 = vadd.f32 %v5722_v17, %v4717_v41 }
 0x585   : > { %4867 = vst [vmem:[%s8427_s14 + $0xc8] sm:$0xff] %v4835_v25  ;;  %v4805_v47 = vadd.f32 %v4773_v54, %v4723_v43 }
 0x586   : > { %4866 = vst [vmem:[%s8427_s14 + $0xc0] sm:$0xff] %v4834_v36  ;;  %v4804_v5 = vadd.f32 %v4772_v56, %v4718_v57  ;;  %v5196_v34 = vpop.f32.mrb[100].mxu1 }
 0x587   : > { %v4837_v59 = vmax.f32 %v4805_v47, 0.0  ;;  %v4733_v28 = vadd.f32 %v5725_v32, %v5196_v34  ;;  %v4727_v2 = vpop.f32.mrb[101].mxu1 }
 0x588   : > { %v4836_v63 = vmax.f32 %v4804_v5, 0.0  ;;  %v4728_v51 = vadd.f32 %v5724_v33, %v4727_v2 }
 0x589   : > { %4869 = vst [vmem:[%s8427_s14 + $0xd8] sm:$0xff] %v4837_v59  ;;  %v4807_v16 = vadd.f32 %v4775_v48, %v4733_v28 }
 0x58a   : > { %4868 = vst [vmem:[%s8427_s14 + $0xd0] sm:$0xff] %v4836_v63  ;;  %v4806_v13 = vadd.f32 %v4774_v10, %v4728_v51  ;;  %v5199_v50 = vpop.f32.mrb[102].mxu1 }
 0x58b   : > { %v4839_v42 = vmax.f32 %v4807_v16, 0.0  ;;  %v4743_v20 = vadd.f32 %v5727_v26, %v5199_v50  ;;  %v4737_v55 = vpop.f32.mrb[103].mxu1 }
 0x58c   : > { %v4838_v1 = vmax.f32 %v4806_v13, 0.0  ;;  %v4738_v29 = vadd.f32 %v5726_v7, %v4737_v55 }
 0x58d   : > { %4871 = vst [vmem:[%s8427_s14 + $0xe8] sm:$0xff] %v4839_v42  ;;  %v4809_v19 = vadd.f32 %v4777_v60, %v4743_v20 }
 0x58e   : > { %4870 = vst [vmem:[%s8427_s14 + $0xe0] sm:$0xff] %v4838_v1  ;;  %v4808_v44 = vadd.f32 %v4776_v38, %v4738_v29 }
 0x58f   : > { %v4841_v21 = vmax.f32 %v4809_v19, 0.0 }
 0x590   : > { %v4840_v61 = vmax.f32 %v4808_v44, 0.0 }
 0x591   : > { %4873 = vst [vmem:[%s8427_s14 + $0xf8] sm:$0xff] %v4841_v21 }
 0x592   : > { %4872 = vst [vmem:[%s8427_s14 + $0xf0] sm:$0xff] %v4840_v61 }
 0x593 PF: > { %s15_s18 = sadd.s32 1, %s6130_s18  }
 0x594   : > { %p12_p4 = scmp.ge.s32.totalorder %s15_s18, 4  }
 0x596   :  { %14 = sbr.rel (!%p12_p4) target bundleno = 1 (0x1), region = 74 }

</bundles_post_ra>
